<compile_context>
chip_gen: v5e
topology: v5e:2x2
jax: 0.10.0
libtpu: 0.0.40
codegen_flags: <defaults>
</compile_context>

<pallas_src>
import numpy as np
import jax
import jax.numpy as jnp
from jax import lax
from jax.experimental import pallas as pl
from jax.experimental.pallas import tpu as pltpu

TILE = 128        # frame rows per grid step per side (x / y)
EPS = 1e-7        # magnitude clamp, as in the reference StftLoss


# ----------------------------- Pallas kernel ------------------------------ #
def _make_stft_loss_kernel(tile, nb_pad):
    n_slabs = tile // 8

    def kernel(res_ref, first_ref, x_ref, y_ref, basis_ref, acc_ref,
               ox_ref, oy_ref):
        t = pl.program_id(0)

        # Zero the per-resolution accumulator on its first tile.
        @pl.when(first_ref[t] == 1)
        def _init():
            acc_ref[...] = jnp.zeros_like(acc_ref)

        bs = basis_ref[...]                       # (k_max, 2*nb_pad) bf16
        # Two MXU matmuls (same RHS), f32 accumulation into VMEM scratch.
        ox_ref[...] = jnp.dot(x_ref[...], bs, preferred_element_type=jnp.float32)
        oy_ref[...] = jnp.dot(y_ref[...], bs, preferred_element_type=jnp.float32)

        # Slab-wise epilogue: 8-row slabs keep the live vreg set small.
        def slab(s, carry):
            r0 = pl.multiple_of(s * 8, 8)
            xr = ox_ref[pl.ds(r0, 8), :nb_pad]
            xi = ox_ref[pl.ds(r0, 8), nb_pad:]
            yr = oy_ref[pl.ds(r0, 8), :nb_pad]
            yi = oy_ref[pl.ds(r0, 8), nb_pad:]

            xsq = jnp.maximum(xr * xr + xi * xi, EPS)
            ysq = jnp.maximum(yr * yr + yi * yi, EPS)

            # (y_mag - x_mag)^2 with a single sqrt (padding -> exactly ~0).
            d2 = xsq + ysq - 2.0 * jnp.sqrt(xsq * ysq)
            # |log y_mag - log x_mag| with a single log and exact divide
            # (padding -> log(1) = 0).
            dl = 0.5 * jnp.abs(jnp.log(ysq / xsq))

            acc_ref[0, :, :] += d2     # -> ||y_mag - x_mag||^2
            acc_ref[1, :, :] += ysq    # -> ||y_mag||^2 (+ EPS padding, corrected)
            acc_ref[2, :, :] += dl     # -> L1(log mags)
            return carry

        lax.fori_loop(0, n_slabs, slab, 0, unroll=True)

    return kernel


# ------------------------ host-side (numpy) constants ---------------------- #
def _hann_centered_np(n_fft, win_length):
    # periodic Hann, zero-padded (centered) to n_fft, as torch.stft does.
    k = np.arange(win_length, dtype=np.float64)
    win = 0.5 * (1.0 - np.cos(2.0 * np.pi * k / win_length))
    full = np.zeros(n_fft, dtype=np.float64)
    lp = (n_fft - win_length) // 2
    full[lp:lp + win_length] = win
    return full


def _windowed_basis_np(n_fft, win_length, k_rows, nb_cols):
    # Window-folded DFT basis, zero-padded to (k_rows, 2*nb_cols):
    #   [:, :nb]                = win * cos
    #   [:, nb_cols:nb_cols+nb] = -win * sin
    nb = n_fft // 2 + 1
    n = np.arange(n_fft, dtype=np.float64)[:, None]
    f = np.arange(nb, dtype=np.float64)[None, :]
    ang = 2.0 * np.pi * n * f / n_fft
    win = _hann_centered_np(n_fft, win_length)[:, None]
    out = np.zeros((k_rows, 2 * nb_cols), dtype=np.float32)
    out[:n_fft, :nb] = (np.cos(ang) * win).astype(np.float32)
    out[:n_fft, nb_cols:nb_cols + nb] = (-np.sin(ang) * win).astype(np.float32)
    return out


# ------------------------------ JAX glue ---------------------------------- #
def _frame_signal(sig, n_fft, hop):
    # sig: (B, T) -> (B*n_frames, n_fft) UN-windowed frames (torch.stft center=True).
    b, t = sig.shape
    pad = n_fft // 2
    padded = jnp.pad(sig, ((0, 0), (pad, pad)), mode="reflect")
    n_frames = 1 + t // hop
    assert (n_frames - 1) * hop + n_fft <= t + 2 * pad
    idx = jnp.arange(n_frames)[:, None] * hop + jnp.arange(n_fft)[None, :]
    frames = padded[:, idx]                      # (B, n_frames, n_fft)
    return frames.reshape(b * n_frames, n_fft)


def make_mrstft_loss(fft_sizes, hop_sizes, win_lengths):
    assert len(fft_sizes) == len(hop_sizes) == len(win_lengths)
    cfg = tuple(zip(fft_sizes, hop_sizes, win_lengths))
    n_res = len(cfg)
    k_max = max(fft_sizes)
    nb_pad = ((max(fs // 2 + 1 for fs in fft_sizes) + 127) // 128) * 128

    # Stacked, window-folded, zero-padded bases — built on host, bf16 once.
    basis_np = np.stack([_windowed_basis_np(fs, wl, k_max, nb_pad)
                         for fs, _, wl in cfg])                     # (R, k_max, 2*nb_pad)
    basis = jnp.asarray(basis_np, dtype=jnp.bfloat16)

    kernel = _make_stft_loss_kernel(TILE, nb_pad)

    def loss_fn(x, y):
        b, t = x.shape

        # Per-resolution framing (trace-time static metadata, runtime gather).
        fx_list, fy_list = [], []
        tiles, res_id, first_flag = [], [], []
        for r, (fs, ss, wl) in enumerate(cfg):
            fx = _frame_signal(x, fs, ss)
            fy = _frame_signal(y, fs, ss)
            nv = fx.shape[0]
            nt = -(-nv // TILE)                      # ceil(nv / TILE)
            rows = nt * TILE
            # Explicit zero padding of rows (to TILE) and columns (to k_max):
            # load-bearing for the analytic EPS correction below.
            fx = jnp.pad(fx, ((0, rows - nv), (0, k_max - fs)))
            fy = jnp.pad(fy, ((0, rows - nv), (0, k_max - fs)))
            fx_list.append(fx)
            fy_list.append(fy)
            tiles.append(nt)
            res_id += [r] * nt
            first_flag += [1] + [0] * (nt - 1)

        x_frames = jnp.concatenate(fx_list, axis=0).astype(jnp.bfloat16)
        y_frames = jnp.concatenate(fy_list, axis=0).astype(jnp.bfloat16)
        total_tiles = sum(tiles)
        res_arr = jnp.asarray(np.asarray(res_id, np.int32))
        first_arr = jnp.asarray(np.asarray(first_flag, np.int32))

        acc = pl.pallas_call(
            kernel,
            out_shape=jax.ShapeDtypeStruct((n_res, 3, 8, nb_pad), jnp.float32),
            grid_spec=pltpu.PrefetchScalarGridSpec(
                num_scalar_prefetch=2,
                grid=(total_tiles,),
                in_specs=[
                    pl.BlockSpec((TILE, k_max), lambda i, res, first: (i, 0)),
                    pl.BlockSpec((TILE, k_max), lambda i, res, first: (i, 0)),
                    pl.BlockSpec((None, k_max, 2 * nb_pad),
                                 lambda i, res, first: (res[i], 0, 0)),
                ],
                out_specs=pl.BlockSpec((None, 3, 8, nb_pad),
                                       lambda i, res, first: (res[i], 0, 0, 0)),
                scratch_shapes=[pltpu.VMEM((TILE, 2 * nb_pad), jnp.float32),
                                pltpu.VMEM((TILE, 2 * nb_pad), jnp.float32)],
            ),
            compiler_params=pltpu.CompilerParams(
                dimension_semantics=("arbitrary",)),
        )(res_arr, first_arr, x_frames, y_frames, basis)

        # Final (tiny) cross-lane reduction in XLA + analytic EPS correction.
        sums = jnp.sum(acc, axis=(2, 3))             # (n_res, 3)

        sc_total = jnp.float32(0.0)
        mag_total = jnp.float32(0.0)
        for r, (fs, ss, wl) in enumerate(cfg):
            nb = fs // 2 + 1
            nv = b * (1 + t // ss)
            rows = tiles[r] * TILE
            s1 = sums[r, 0]
            # Every zero-padded frame row / bin column contributes exactly EPS
            # to sum(ysq) and exactly 0 to s1 / s3.
            s2 = sums[r, 1] - jnp.float32(EPS) * jnp.float32(rows * nb_pad - nv * nb)
            s3 = sums[r, 2]
            sc_total = sc_total + jnp.sqrt(s1) / jnp.sqrt(s2)
            mag_total = mag_total + s3 / jnp.float32(nv * nb)

        n = jnp.float32(n_res)
        return sc_total / n, mag_total / n

    # One jit, one pallas_call for all resolutions.
    return jax.jit(loss_fn)


# --------------------------- pure-JAX reference ---------------------------- #
def _ref_single(x, y, n_fft, hop, win_length):
    nb = n_fft // 2 + 1
    basis = jnp.asarray(_windowed_basis_np(n_fft, win_length, n_fft, nb))

    def stft_mag(sig):
        frames = _frame_signal(sig, n_fft, hop)
        out = jnp.matmul(frames, basis, precision=jax.lax.Precision.HIGHEST)
        re, im = out[:, :nb], out[:, nb:]
        return jnp.sqrt(jnp.maximum(re * re + im * im, EPS))

    xm, ym = stft_mag(x), stft_mag(y)
    sc = jnp.linalg.norm(ym - xm) / jnp.linalg.norm(ym)
    ml = jnp.mean(jnp.abs(jnp.log(ym) - jnp.log(xm)))
    return sc, ml


def _ref_mrstft(x, y, fft_sizes, hop_sizes, win_lengths):
    scs, mls = [], []
    for fs, ss, wl in zip(fft_sizes, hop_sizes, win_lengths):
        sc, ml = _ref_single(x, y, fs, ss, wl)
        scs.append(sc)
        mls.append(ml)
    return sum(scs) / len(scs), sum(mls) / len(mls)


# --------------------------------- main ------------------------------------ #
if __name__ == "__main__":
    # Module "parameters": the multi-resolution STFT configuration
    # (deterministic, defined in-script; the module has no learned weights).
    fft_sizes = [64, 128, 256]
    hop_sizes = [16, 32, 64]
    win_lengths = [32, 64, 128]

    key = jax.random.PRNGKey(0)
    kx, ky = jax.random.split(key)
    B, T = 2, 256
    x = jax.random.normal(kx, (B, T), dtype=jnp.float32)
    y = x + 0.1 * jax.random.normal(ky, (B, T), dtype=jnp.float32)

    loss_fn = make_mrstft_loss(fft_sizes, hop_sizes, win_lengths)
    sc_loss, mag_loss = loss_fn(x, y)
    sc_loss = jax.block_until_ready(sc_loss)
    mag_loss = jax.block_until_ready(mag_loss)

    sc_ref, mag_ref = _ref_mrstft(x, y, fft_sizes, hop_sizes, win_lengths)

    assert jnp.isfinite(sc_loss) and jnp.isfinite(mag_loss)
    assert jnp.allclose(sc_loss, sc_ref, rtol=2e-2, atol=1e-3), (sc_loss, sc_ref)
    assert jnp.allclose(mag_loss, mag_ref, rtol=2e-2, atol=1e-3), (mag_loss, mag_ref)

    print("KERNEL_OK")
</pallas_src>

<mosaic_0001>
module attributes {stable_mosaic.version = 11 : i64} {
  func.func @kernel(%arg0: i32, %arg1: memref<3xi32, #tpu.memory_space<smem>>, %arg2: memref<3xi32, #tpu.memory_space<smem>>, %arg3: memref<128x256xbf16, #tpu.memory_space<vmem>>, %arg4: memref<128x256xbf16, #tpu.memory_space<vmem>>, %arg5: memref<1x256x512xbf16, #tpu.memory_space<vmem>>, %arg6: memref<1x3x8x256xf32, #tpu.memory_space<vmem>>, %arg7: memref<128x512xf32, #tpu.memory_space<vmem>>, %arg8: memref<128x512xf32, #tpu.memory_space<vmem>>) attributes {dimension_semantics = [#tpu.dimension_semantics<arbitrary>], iteration_bounds = array<i64: 3>, scalar_prefetch = 2 : i64, scratch_operands = 2 : i64, tpu.core_type = #tpu.core_type<tc>, window_params = [{transform_indices = @transform_0, window_bounds = array<i64: 128, 256>}, {transform_indices = @transform_1, window_bounds = array<i64: 128, 256>}, {transform_indices = @transform_2, window_bounds = array<i64: 1, 256, 512>}, {transform_indices = @transform_3, window_bounds = array<i64: 1, 3, 8, 256>}]} {
    %0 = arith.index_cast %arg0 : i32 to index
    %1 = memref.load %arg2[%0] : memref<3xi32, #tpu.memory_space<smem>>
    %c1_i32 = arith.constant 1 : i32
    %2 = arith.cmpi eq, %1, %c1_i32 : i32
    %3 = arith.extui %2 : i1 to i32
    %c0_i32 = arith.constant 0 : i32
    %4 = arith.cmpi ne, %3, %c0_i32 : i32
    scf.if %4 {
      %cst_538 = arith.constant 0.000000e+00 : f32
      %797 = vector.broadcast %cst_538 : f32 to vector<3x8x256xf32>
      %c0_539 = arith.constant 0 : index
      %c0_540 = arith.constant 0 : index
      %c0_541 = arith.constant 0 : index
      %c0_542 = arith.constant 0 : index
      %798 = vector.load %arg6[%c0_539, %c0_540, %c0_541, %c0_542] : memref<1x3x8x256xf32, #tpu.memory_space<vmem>>, vector<1x3x8x256xf32>
      %799 = vector.shape_cast %798 : vector<1x3x8x256xf32> to vector<3x8x256xf32>
      %800 = vector.shape_cast %797 : vector<3x8x256xf32> to vector<1x3x8x256xf32>
      tpu.vector_store %arg6[%c0_539, %c0_540, %c0_541, %c0_542], %800 {strides = array<i32>} : memref<1x3x8x256xf32, #tpu.memory_space<vmem>>, vector<1x3x8x256xf32>,
    } else {
    }
    %c0 = arith.constant 0 : index
    %c0_0 = arith.constant 0 : index
    %c0_1 = arith.constant 0 : index
    %5 = vector.load %arg5[%c0, %c0_0, %c0_1] : memref<1x256x512xbf16, #tpu.memory_space<vmem>>, vector<1x256x512xbf16>
    %6 = vector.shape_cast %5 : vector<1x256x512xbf16> to vector<256x512xbf16>
    %c0_2 = arith.constant 0 : index
    %c0_3 = arith.constant 0 : index
    %7 = vector.load %arg3[%c0_2, %c0_3] : memref<128x256xbf16, #tpu.memory_space<vmem>>, vector<128x256xbf16>
    %cst = arith.constant dense<0.000000e+00> : vector<128x512xf32>
    %8 = tpu.matmul %7, %6, %cst {dimension_numbers = #tpu.dot_dimension_numbers<[1], [0], [0], [1], [0, 0, 1, 1], [], []>} : vector<128x256xbf16>, vector<256x512xbf16>, vector<128x512xf32> -> vector<128x512xf32>
    %c0_4 = arith.constant 0 : index
    %c0_5 = arith.constant 0 : index
    %9 = vector.load %arg7[%c0_4, %c0_5] : memref<128x512xf32, #tpu.memory_space<vmem>>, vector<128x512xf32>
    tpu.vector_store %arg7[%c0_4, %c0_5], %8 {strides = array<i32>} : memref<128x512xf32, #tpu.memory_space<vmem>>, vector<128x512xf32>,
    %c0_6 = arith.constant 0 : index
    %c0_7 = arith.constant 0 : index
    %10 = vector.load %arg4[%c0_6, %c0_7] : memref<128x256xbf16, #tpu.memory_space<vmem>>, vector<128x256xbf16>
    %cst_8 = arith.constant dense<0.000000e+00> : vector<128x512xf32>
    %11 = tpu.matmul %10, %6, %cst_8 {dimension_numbers = #tpu.dot_dimension_numbers<[1], [0], [0], [1], [0, 0, 1, 1], [], []>} : vector<128x256xbf16>, vector<256x512xbf16>, vector<128x512xf32> -> vector<128x512xf32>
    %c0_9 = arith.constant 0 : index
    %c0_10 = arith.constant 0 : index
    %12 = vector.load %arg8[%c0_9, %c0_10] : memref<128x512xf32, #tpu.memory_space<vmem>>, vector<128x512xf32>
    tpu.vector_store %arg8[%c0_9, %c0_10], %11 {strides = array<i32>} : memref<128x512xf32, #tpu.memory_space<vmem>>, vector<128x512xf32>,
    %c0_i32_11 = arith.constant 0 : i32
    %c8_i32 = arith.constant 8 : i32
    %13 = arith.muli %c0_i32_11, %c8_i32 : i32
    %14 = tpu.assume_multiple %13, 8 : i32
    %15 = arith.index_cast %14 : i32 to index
    %c0_12 = arith.constant 0 : index
    %16 = vector.load %arg7[%15, %c0_12] : memref<128x512xf32, #tpu.memory_space<vmem>>, vector<8x256xf32>
    %17 = arith.index_cast %14 : i32 to index
    %c256 = arith.constant 256 : index
    %18 = vector.load %arg7[%17, %c256] : memref<128x512xf32, #tpu.memory_space<vmem>>, vector<8x256xf32>
    %19 = arith.index_cast %14 : i32 to index
    %c0_13 = arith.constant 0 : index
    %20 = vector.load %arg8[%19, %c0_13] : memref<128x512xf32, #tpu.memory_space<vmem>>, vector<8x256xf32>
    %21 = arith.index_cast %14 : i32 to index
    %c256_14 = arith.constant 256 : index
    %22 = vector.load %arg8[%21, %c256_14] : memref<128x512xf32, #tpu.memory_space<vmem>>, vector<8x256xf32>
    %23 = arith.mulf %16, %16 : vector<8x256xf32>
    %24 = arith.mulf %18, %18 : vector<8x256xf32>
    %25 = arith.addf %23, %24 : vector<8x256xf32>
    %cst_15 = arith.constant 1.000000e-07 : f32
    %26 = vector.broadcast %cst_15 : f32 to vector<8x256xf32>
    %27 = arith.maximumf %25, %26 : vector<8x256xf32>
    %28 = arith.mulf %20, %20 : vector<8x256xf32>
    %29 = arith.mulf %22, %22 : vector<8x256xf32>
    %30 = arith.addf %28, %29 : vector<8x256xf32>
    %cst_16 = arith.constant 1.000000e-07 : f32
    %31 = vector.broadcast %cst_16 : f32 to vector<8x256xf32>
    %32 = arith.maximumf %30, %31 : vector<8x256xf32>
    %33 = arith.addf %27, %32 : vector<8x256xf32>
    %34 = arith.mulf %27, %32 : vector<8x256xf32>
    %35 = math.sqrt %34 : vector<8x256xf32>
    %cst_17 = arith.constant 2.000000e+00 : f32
    %36 = vector.broadcast %cst_17 : f32 to vector<8x256xf32>
    %37 = arith.mulf %36, %35 : vector<8x256xf32>
    %38 = arith.subf %33, %37 : vector<8x256xf32>
    %39 = arith.divf %32, %27 : vector<8x256xf32>
    %40 = math.log %39 : vector<8x256xf32>
    %41 = math.absf %40 : vector<8x256xf32>
    %cst_18 = arith.constant 5.000000e-01 : f32
    %42 = vector.broadcast %cst_18 : f32 to vector<8x256xf32>
    %43 = arith.mulf %42, %41 : vector<8x256xf32>
    %c0_19 = arith.constant 0 : index
    %c0_20 = arith.constant 0 : index
    %c0_21 = arith.constant 0 : index
    %c0_22 = arith.constant 0 : index
    %44 = vector.load %arg6[%c0_19, %c0_20, %c0_21, %c0_22] : memref<1x3x8x256xf32, #tpu.memory_space<vmem>>, vector<1x1x8x256xf32>
    %45 = vector.shape_cast %44 : vector<1x1x8x256xf32> to vector<8x256xf32>
    %46 = arith.addf %45, %38 : vector<8x256xf32>
    %c0_23 = arith.constant 0 : index
    %c0_24 = arith.constant 0 : index
    %c0_25 = arith.constant 0 : index
    %c0_26 = arith.constant 0 : index
    %47 = vector.load %arg6[%c0_23, %c0_24, %c0_25, %c0_26] : memref<1x3x8x256xf32, #tpu.memory_space<vmem>>, vector<1x1x8x256xf32>
    %48 = vector.shape_cast %47 : vector<1x1x8x256xf32> to vector<8x256xf32>
    %49 = vector.shape_cast %46 : vector<8x256xf32> to vector<1x1x8x256xf32>
    tpu.vector_store %arg6[%c0_23, %c0_24, %c0_25, %c0_26], %49 {strides = array<i32>} : memref<1x3x8x256xf32, #tpu.memory_space<vmem>>, vector<1x1x8x256xf32>,
    %c0_27 = arith.constant 0 : index
    %c1 = arith.constant 1 : index
    %c0_28 = arith.constant 0 : index
    %c0_29 = arith.constant 0 : index
    %50 = vector.load %arg6[%c0_27, %c1, %c0_28, %c0_29] : memref<1x3x8x256xf32, #tpu.memory_space<vmem>>, vector<1x1x8x256xf32>
    %51 = vector.shape_cast %50 : vector<1x1x8x256xf32> to vector<8x256xf32>
    %52 = arith.addf %51, %32 : vector<8x256xf32>
    %c0_30 = arith.constant 0 : index
    %c1_31 = arith.constant 1 : index
    %c0_32 = arith.constant 0 : index
    %c0_33 = arith.constant 0 : index
    %53 = vector.load %arg6[%c0_30, %c1_31, %c0_32, %c0_33] : memref<1x3x8x256xf32, #tpu.memory_space<vmem>>, vector<1x1x8x256xf32>
    %54 = vector.shape_cast %53 : vector<1x1x8x256xf32> to vector<8x256xf32>
    %55 = vector.shape_cast %52 : vector<8x256xf32> to vector<1x1x8x256xf32>
    tpu.vector_store %arg6[%c0_30, %c1_31, %c0_32, %c0_33], %55 {strides = array<i32>} : memref<1x3x8x256xf32, #tpu.memory_space<vmem>>, vector<1x1x8x256xf32>,
    %c0_34 = arith.constant 0 : index
    %c2 = arith.constant 2 : index
    %c0_35 = arith.constant 0 : index
    %c0_36 = arith.constant 0 : index
    %56 = vector.load %arg6[%c0_34, %c2, %c0_35, %c0_36] : memref<1x3x8x256xf32, #tpu.memory_space<vmem>>, vector<1x1x8x256xf32>
    %57 = vector.shape_cast %56 : vector<1x1x8x256xf32> to vector<8x256xf32>
    %58 = arith.addf %57, %43 : vector<8x256xf32>
    %c0_37 = arith.constant 0 : index
    %c2_38 = arith.constant 2 : index
    %c0_39 = arith.constant 0 : index
    %c0_40 = arith.constant 0 : index
    %59 = vector.load %arg6[%c0_37, %c2_38, %c0_39, %c0_40] : memref<1x3x8x256xf32, #tpu.memory_space<vmem>>, vector<1x1x8x256xf32>
    %60 = vector.shape_cast %59 : vector<1x1x8x256xf32> to vector<8x256xf32>
    %61 = vector.shape_cast %58 : vector<8x256xf32> to vector<1x1x8x256xf32>
    tpu.vector_store %arg6[%c0_37, %c2_38, %c0_39, %c0_40], %61 {strides = array<i32>} : memref<1x3x8x256xf32, #tpu.memory_space<vmem>>, vector<1x1x8x256xf32>,
    %c1_i32_41 = arith.constant 1 : i32
    %c8_i32_42 = arith.constant 8 : i32
    %62 = arith.muli %c1_i32_41, %c8_i32_42 : i32
    %63 = tpu.assume_multiple %62, 8 : i32
    %64 = arith.index_cast %63 : i32 to index
    %c0_43 = arith.constant 0 : index
    %65 = vector.load %arg7[%64, %c0_43] : memref<128x512xf32, #tpu.memory_space<vmem>>, vector<8x256xf32>
    %66 = arith.index_cast %63 : i32 to index
    %c256_44 = arith.constant 256 : index
    %67 = vector.load %arg7[%66, %c256_44] : memref<128x512xf32, #tpu.memory_space<vmem>>, vector<8x256xf32>
    %68 = arith.index_cast %63 : i32 to index
    %c0_45 = arith.constant 0 : index
    %69 = vector.load %arg8[%68, %c0_45] : memref<128x512xf32, #tpu.memory_space<vmem>>, vector<8x256xf32>
    %70 = arith.index_cast %63 : i32 to index
    %c256_46 = arith.constant 256 : index
    %71 = vector.load %arg8[%70, %c256_46] : memref<128x512xf32, #tpu.memory_space<vmem>>, vector<8x256xf32>
    %72 = arith.mulf %65, %65 : vector<8x256xf32>
    %73 = arith.mulf %67, %67 : vector<8x256xf32>
    %74 = arith.addf %72, %73 : vector<8x256xf32>
    %cst_47 = arith.constant 1.000000e-07 : f32
    %75 = vector.broadcast %cst_47 : f32 to vector<8x256xf32>
    %76 = arith.maximumf %74, %75 : vector<8x256xf32>
    %77 = arith.mulf %69, %69 : vector<8x256xf32>
    %78 = arith.mulf %71, %71 : vector<8x256xf32>
    %79 = arith.addf %77, %78 : vector<8x256xf32>
    %cst_48 = arith.constant 1.000000e-07 : f32
    %80 = vector.broadcast %cst_48 : f32 to vector<8x256xf32>
    %81 = arith.maximumf %79, %80 : vector<8x256xf32>
    %82 = arith.addf %76, %81 : vector<8x256xf32>
    %83 = arith.mulf %76, %81 : vector<8x256xf32>
    %84 = math.sqrt %83 : vector<8x256xf32>
    %cst_49 = arith.constant 2.000000e+00 : f32
    %85 = vector.broadcast %cst_49 : f32 to vector<8x256xf32>
    %86 = arith.mulf %85, %84 : vector<8x256xf32>
    %87 = arith.subf %82, %86 : vector<8x256xf32>
    %88 = arith.divf %81, %76 : vector<8x256xf32>
    %89 = math.log %88 : vector<8x256xf32>
    %90 = math.absf %89 : vector<8x256xf32>
    %cst_50 = arith.constant 5.000000e-01 : f32
    %91 = vector.broadcast %cst_50 : f32 to vector<8x256xf32>
    %92 = arith.mulf %91, %90 : vector<8x256xf32>
    %c0_51 = arith.constant 0 : index
    %c0_52 = arith.constant 0 : index
    %c0_53 = arith.constant 0 : index
    %c0_54 = arith.constant 0 : index
    %93 = vector.load %arg6[%c0_51, %c0_52, %c0_53, %c0_54] : memref<1x3x8x256xf32, #tpu.memory_space<vmem>>, vector<1x1x8x256xf32>
    %94 = vector.shape_cast %93 : vector<1x1x8x256xf32> to vector<8x256xf32>
    %95 = arith.addf %94, %87 : vector<8x256xf32>
    %c0_55 = arith.constant 0 : index
    %c0_56 = arith.constant 0 : index
    %c0_57 = arith.constant 0 : index
    %c0_58 = arith.constant 0 : index
    %96 = vector.load %arg6[%c0_55, %c0_56, %c0_57, %c0_58] : memref<1x3x8x256xf32, #tpu.memory_space<vmem>>, vector<1x1x8x256xf32>
    %97 = vector.shape_cast %96 : vector<1x1x8x256xf32> to vector<8x256xf32>
    %98 = vector.shape_cast %95 : vector<8x256xf32> to vector<1x1x8x256xf32>
    tpu.vector_store %arg6[%c0_55, %c0_56, %c0_57, %c0_58], %98 {strides = array<i32>} : memref<1x3x8x256xf32, #tpu.memory_space<vmem>>, vector<1x1x8x256xf32>,
    %c0_59 = arith.constant 0 : index
    %c1_60 = arith.constant 1 : index
    %c0_61 = arith.constant 0 : index
    %c0_62 = arith.constant 0 : index
    %99 = vector.load %arg6[%c0_59, %c1_60, %c0_61, %c0_62] : memref<1x3x8x256xf32, #tpu.memory_space<vmem>>, vector<1x1x8x256xf32>
    %100 = vector.shape_cast %99 : vector<1x1x8x256xf32> to vector<8x256xf32>
    %101 = arith.addf %100, %81 : vector<8x256xf32>
    %c0_63 = arith.constant 0 : index
    %c1_64 = arith.constant 1 : index
    %c0_65 = arith.constant 0 : index
    %c0_66 = arith.constant 0 : index
    %102 = vector.load %arg6[%c0_63, %c1_64, %c0_65, %c0_66] : memref<1x3x8x256xf32, #tpu.memory_space<vmem>>, vector<1x1x8x256xf32>
    %103 = vector.shape_cast %102 : vector<1x1x8x256xf32> to vector<8x256xf32>
    %104 = vector.shape_cast %101 : vector<8x256xf32> to vector<1x1x8x256xf32>
    tpu.vector_store %arg6[%c0_63, %c1_64, %c0_65, %c0_66], %104 {strides = array<i32>} : memref<1x3x8x256xf32, #tpu.memory_space<vmem>>, vector<1x1x8x256xf32>,
    %c0_67 = arith.constant 0 : index
    %c2_68 = arith.constant 2 : index
    %c0_69 = arith.constant 0 : index
    %c0_70 = arith.constant 0 : index
    %105 = vector.load %arg6[%c0_67, %c2_68, %c0_69, %c0_70] : memref<1x3x8x256xf32, #tpu.memory_space<vmem>>, vector<1x1x8x256xf32>
    %106 = vector.shape_cast %105 : vector<1x1x8x256xf32> to vector<8x256xf32>
    %107 = arith.addf %106, %92 : vector<8x256xf32>
    %c0_71 = arith.constant 0 : index
    %c2_72 = arith.constant 2 : index
    %c0_73 = arith.constant 0 : index
    %c0_74 = arith.constant 0 : index
    %108 = vector.load %arg6[%c0_71, %c2_72, %c0_73, %c0_74] : memref<1x3x8x256xf32, #tpu.memory_space<vmem>>, vector<1x1x8x256xf32>
    %109 = vector.shape_cast %108 : vector<1x1x8x256xf32> to vector<8x256xf32>
    %110 = vector.shape_cast %107 : vector<8x256xf32> to vector<1x1x8x256xf32>
    tpu.vector_store %arg6[%c0_71, %c2_72, %c0_73, %c0_74], %110 {strides = array<i32>} : memref<1x3x8x256xf32, #tpu.memory_space<vmem>>, vector<1x1x8x256xf32>,
    %c2_i32 = arith.constant 2 : i32
    %c8_i32_75 = arith.constant 8 : i32
    %111 = arith.muli %c2_i32, %c8_i32_75 : i32
    %112 = tpu.assume_multiple %111, 8 : i32
    %113 = arith.index_cast %112 : i32 to index
    %c0_76 = arith.constant 0 : index
    %114 = vector.load %arg7[%113, %c0_76] : memref<128x512xf32, #tpu.memory_space<vmem>>, vector<8x256xf32>
    %115 = arith.index_cast %112 : i32 to index
    %c256_77 = arith.constant 256 : index
    %116 = vector.load %arg7[%115, %c256_77] : memref<128x512xf32, #tpu.memory_space<vmem>>, vector<8x256xf32>
    %117 = arith.index_cast %112 : i32 to index
    %c0_78 = arith.constant 0 : index
    %118 = vector.load %arg8[%117, %c0_78] : memref<128x512xf32, #tpu.memory_space<vmem>>, vector<8x256xf32>
    %119 = arith.index_cast %112 : i32 to index
    %c256_79 = arith.constant 256 : index
    %120 = vector.load %arg8[%119, %c256_79] : memref<128x512xf32, #tpu.memory_space<vmem>>, vector<8x256xf32>
    %121 = arith.mulf %114, %114 : vector<8x256xf32>
    %122 = arith.mulf %116, %116 : vector<8x256xf32>
    %123 = arith.addf %121, %122 : vector<8x256xf32>
    %cst_80 = arith.constant 1.000000e-07 : f32
    %124 = vector.broadcast %cst_80 : f32 to vector<8x256xf32>
    %125 = arith.maximumf %123, %124 : vector<8x256xf32>
    %126 = arith.mulf %118, %118 : vector<8x256xf32>
    %127 = arith.mulf %120, %120 : vector<8x256xf32>
    %128 = arith.addf %126, %127 : vector<8x256xf32>
    %cst_81 = arith.constant 1.000000e-07 : f32
    %129 = vector.broadcast %cst_81 : f32 to vector<8x256xf32>
    %130 = arith.maximumf %128, %129 : vector<8x256xf32>
    %131 = arith.addf %125, %130 : vector<8x256xf32>
    %132 = arith.mulf %125, %130 : vector<8x256xf32>
    %133 = math.sqrt %132 : vector<8x256xf32>
    %cst_82 = arith.constant 2.000000e+00 : f32
    %134 = vector.broadcast %cst_82 : f32 to vector<8x256xf32>
    %135 = arith.mulf %134, %133 : vector<8x256xf32>
    %136 = arith.subf %131, %135 : vector<8x256xf32>
    %137 = arith.divf %130, %125 : vector<8x256xf32>
    %138 = math.log %137 : vector<8x256xf32>
    %139 = math.absf %138 : vector<8x256xf32>
    %cst_83 = arith.constant 5.000000e-01 : f32
    %140 = vector.broadcast %cst_83 : f32 to vector<8x256xf32>
    %141 = arith.mulf %140, %139 : vector<8x256xf32>
    %c0_84 = arith.constant 0 : index
    %c0_85 = arith.constant 0 : index
    %c0_86 = arith.constant 0 : index
    %c0_87 = arith.constant 0 : index
    %142 = vector.load %arg6[%c0_84, %c0_85, %c0_86, %c0_87] : memref<1x3x8x256xf32, #tpu.memory_space<vmem>>, vector<1x1x8x256xf32>
    %143 = vector.shape_cast %142 : vector<1x1x8x256xf32> to vector<8x256xf32>
    %144 = arith.addf %143, %136 : vector<8x256xf32>
    %c0_88 = arith.constant 0 : index
    %c0_89 = arith.constant 0 : index
    %c0_90 = arith.constant 0 : index
    %c0_91 = arith.constant 0 : index
    %145 = vector.load %arg6[%c0_88, %c0_89, %c0_90, %c0_91] : memref<1x3x8x256xf32, #tpu.memory_space<vmem>>, vector<1x1x8x256xf32>
    %146 = vector.shape_cast %145 : vector<1x1x8x256xf32> to vector<8x256xf32>
    %147 = vector.shape_cast %144 : vector<8x256xf32> to vector<1x1x8x256xf32>
    tpu.vector_store %arg6[%c0_88, %c0_89, %c0_90, %c0_91], %147 {strides = array<i32>} : memref<1x3x8x256xf32, #tpu.memory_space<vmem>>, vector<1x1x8x256xf32>,
    %c0_92 = arith.constant 0 : index
    %c1_93 = arith.constant 1 : index
    %c0_94 = arith.constant 0 : index
    %c0_95 = arith.constant 0 : index
    %148 = vector.load %arg6[%c0_92, %c1_93, %c0_94, %c0_95] : memref<1x3x8x256xf32, #tpu.memory_space<vmem>>, vector<1x1x8x256xf32>
    %149 = vector.shape_cast %148 : vector<1x1x8x256xf32> to vector<8x256xf32>
    %150 = arith.addf %149, %130 : vector<8x256xf32>
    %c0_96 = arith.constant 0 : index
    %c1_97 = arith.constant 1 : index
    %c0_98 = arith.constant 0 : index
    %c0_99 = arith.constant 0 : index
    %151 = vector.load %arg6[%c0_96, %c1_97, %c0_98, %c0_99] : memref<1x3x8x256xf32, #tpu.memory_space<vmem>>, vector<1x1x8x256xf32>
    %152 = vector.shape_cast %151 : vector<1x1x8x256xf32> to vector<8x256xf32>
    %153 = vector.shape_cast %150 : vector<8x256xf32> to vector<1x1x8x256xf32>
    tpu.vector_store %arg6[%c0_96, %c1_97, %c0_98, %c0_99], %153 {strides = array<i32>} : memref<1x3x8x256xf32, #tpu.memory_space<vmem>>, vector<1x1x8x256xf32>,
    %c0_100 = arith.constant 0 : index
    %c2_101 = arith.constant 2 : index
    %c0_102 = arith.constant 0 : index
    %c0_103 = arith.constant 0 : index
    %154 = vector.load %arg6[%c0_100, %c2_101, %c0_102, %c0_103] : memref<1x3x8x256xf32, #tpu.memory_space<vmem>>, vector<1x1x8x256xf32>
    %155 = vector.shape_cast %154 : vector<1x1x8x256xf32> to vector<8x256xf32>
    %156 = arith.addf %155, %141 : vector<8x256xf32>
    %c0_104 = arith.constant 0 : index
    %c2_105 = arith.constant 2 : index
    %c0_106 = arith.constant 0 : index
    %c0_107 = arith.constant 0 : index
    %157 = vector.load %arg6[%c0_104, %c2_105, %c0_106, %c0_107] : memref<1x3x8x256xf32, #tpu.memory_space<vmem>>, vector<1x1x8x256xf32>
    %158 = vector.shape_cast %157 : vector<1x1x8x256xf32> to vector<8x256xf32>
    %159 = vector.shape_cast %156 : vector<8x256xf32> to vector<1x1x8x256xf32>
    tpu.vector_store %arg6[%c0_104, %c2_105, %c0_106, %c0_107], %159 {strides = array<i32>} : memref<1x3x8x256xf32, #tpu.memory_space<vmem>>, vector<1x1x8x256xf32>,
    %c3_i32 = arith.constant 3 : i32
    %c8_i32_108 = arith.constant 8 : i32
    %160 = arith.muli %c3_i32, %c8_i32_108 : i32
    %161 = tpu.assume_multiple %160, 8 : i32
    %162 = arith.index_cast %161 : i32 to index
    %c0_109 = arith.constant 0 : index
    %163 = vector.load %arg7[%162, %c0_109] : memref<128x512xf32, #tpu.memory_space<vmem>>, vector<8x256xf32>
    %164 = arith.index_cast %161 : i32 to index
    %c256_110 = arith.constant 256 : index
    %165 = vector.load %arg7[%164, %c256_110] : memref<128x512xf32, #tpu.memory_space<vmem>>, vector<8x256xf32>
    %166 = arith.index_cast %161 : i32 to index
    %c0_111 = arith.constant 0 : index
    %167 = vector.load %arg8[%166, %c0_111] : memref<128x512xf32, #tpu.memory_space<vmem>>, vector<8x256xf32>
    %168 = arith.index_cast %161 : i32 to index
    %c256_112 = arith.constant 256 : index
    %169 = vector.load %arg8[%168, %c256_112] : memref<128x512xf32, #tpu.memory_space<vmem>>, vector<8x256xf32>
    %170 = arith.mulf %163, %163 : vector<8x256xf32>
    %171 = arith.mulf %165, %165 : vector<8x256xf32>
    %172 = arith.addf %170, %171 : vector<8x256xf32>
    %cst_113 = arith.constant 1.000000e-07 : f32
    %173 = vector.broadcast %cst_113 : f32 to vector<8x256xf32>
    %174 = arith.maximumf %172, %173 : vector<8x256xf32>
    %175 = arith.mulf %167, %167 : vector<8x256xf32>
    %176 = arith.mulf %169, %169 : vector<8x256xf32>
    %177 = arith.addf %175, %176 : vector<8x256xf32>
    %cst_114 = arith.constant 1.000000e-07 : f32
    %178 = vector.broadcast %cst_114 : f32 to vector<8x256xf32>
    %179 = arith.maximumf %177, %178 : vector<8x256xf32>
    %180 = arith.addf %174, %179 : vector<8x256xf32>
    %181 = arith.mulf %174, %179 : vector<8x256xf32>
    %182 = math.sqrt %181 : vector<8x256xf32>
    %cst_115 = arith.constant 2.000000e+00 : f32
    %183 = vector.broadcast %cst_115 : f32 to vector<8x256xf32>
    %184 = arith.mulf %183, %182 : vector<8x256xf32>
    %185 = arith.subf %180, %184 : vector<8x256xf32>
    %186 = arith.divf %179, %174 : vector<8x256xf32>
    %187 = math.log %186 : vector<8x256xf32>
    %188 = math.absf %187 : vector<8x256xf32>
    %cst_116 = arith.constant 5.000000e-01 : f32
    %189 = vector.broadcast %cst_116 : f32 to vector<8x256xf32>
    %190 = arith.mulf %189, %188 : vector<8x256xf32>
    %c0_117 = arith.constant 0 : index
    %c0_118 = arith.constant 0 : index
    %c0_119 = arith.constant 0 : index
    %c0_120 = arith.constant 0 : index
    %191 = vector.load %arg6[%c0_117, %c0_118, %c0_119, %c0_120] : memref<1x3x8x256xf32, #tpu.memory_space<vmem>>, vector<1x1x8x256xf32>
    %192 = vector.shape_cast %191 : vector<1x1x8x256xf32> to vector<8x256xf32>
    %193 = arith.addf %192, %185 : vector<8x256xf32>
    %c0_121 = arith.constant 0 : index
    %c0_122 = arith.constant 0 : index
    %c0_123 = arith.constant 0 : index
    %c0_124 = arith.constant 0 : index
    %194 = vector.load %arg6[%c0_121, %c0_122, %c0_123, %c0_124] : memref<1x3x8x256xf32, #tpu.memory_space<vmem>>, vector<1x1x8x256xf32>
    %195 = vector.shape_cast %194 : vector<1x1x8x256xf32> to vector<8x256xf32>
    %196 = vector.shape_cast %193 : vector<8x256xf32> to vector<1x1x8x256xf32>
    tpu.vector_store %arg6[%c0_121, %c0_122, %c0_123, %c0_124], %196 {strides = array<i32>} : memref<1x3x8x256xf32, #tpu.memory_space<vmem>>, vector<1x1x8x256xf32>,
    %c0_125 = arith.constant 0 : index
    %c1_126 = arith.constant 1 : index
    %c0_127 = arith.constant 0 : index
    %c0_128 = arith.constant 0 : index
    %197 = vector.load %arg6[%c0_125, %c1_126, %c0_127, %c0_128] : memref<1x3x8x256xf32, #tpu.memory_space<vmem>>, vector<1x1x8x256xf32>
    %198 = vector.shape_cast %197 : vector<1x1x8x256xf32> to vector<8x256xf32>
    %199 = arith.addf %198, %179 : vector<8x256xf32>
    %c0_129 = arith.constant 0 : index
    %c1_130 = arith.constant 1 : index
    %c0_131 = arith.constant 0 : index
    %c0_132 = arith.constant 0 : index
    %200 = vector.load %arg6[%c0_129, %c1_130, %c0_131, %c0_132] : memref<1x3x8x256xf32, #tpu.memory_space<vmem>>, vector<1x1x8x256xf32>
    %201 = vector.shape_cast %200 : vector<1x1x8x256xf32> to vector<8x256xf32>
    %202 = vector.shape_cast %199 : vector<8x256xf32> to vector<1x1x8x256xf32>
    tpu.vector_store %arg6[%c0_129, %c1_130, %c0_131, %c0_132], %202 {strides = array<i32>} : memref<1x3x8x256xf32, #tpu.memory_space<vmem>>, vector<1x1x8x256xf32>,
    %c0_133 = arith.constant 0 : index
    %c2_134 = arith.constant 2 : index
    %c0_135 = arith.constant 0 : index
    %c0_136 = arith.constant 0 : index
    %203 = vector.load %arg6[%c0_133, %c2_134, %c0_135, %c0_136] : memref<1x3x8x256xf32, #tpu.memory_space<vmem>>, vector<1x1x8x256xf32>
    %204 = vector.shape_cast %203 : vector<1x1x8x256xf32> to vector<8x256xf32>
    %205 = arith.addf %204, %190 : vector<8x256xf32>
    %c0_137 = arith.constant 0 : index
    %c2_138 = arith.constant 2 : index
    %c0_139 = arith.constant 0 : index
    %c0_140 = arith.constant 0 : index
    %206 = vector.load %arg6[%c0_137, %c2_138, %c0_139, %c0_140] : memref<1x3x8x256xf32, #tpu.memory_space<vmem>>, vector<1x1x8x256xf32>
    %207 = vector.shape_cast %206 : vector<1x1x8x256xf32> to vector<8x256xf32>
    %208 = vector.shape_cast %205 : vector<8x256xf32> to vector<1x1x8x256xf32>
    tpu.vector_store %arg6[%c0_137, %c2_138, %c0_139, %c0_140], %208 {strides = array<i32>} : memref<1x3x8x256xf32, #tpu.memory_space<vmem>>, vector<1x1x8x256xf32>,
    %c4_i32 = arith.constant 4 : i32
    %c8_i32_141 = arith.constant 8 : i32
    %209 = arith.muli %c4_i32, %c8_i32_141 : i32
    %210 = tpu.assume_multiple %209, 8 : i32
    %211 = arith.index_cast %210 : i32 to index
    %c0_142 = arith.constant 0 : index
    %212 = vector.load %arg7[%211, %c0_142] : memref<128x512xf32, #tpu.memory_space<vmem>>, vector<8x256xf32>
    %213 = arith.index_cast %210 : i32 to index
    %c256_143 = arith.constant 256 : index
    %214 = vector.load %arg7[%213, %c256_143] : memref<128x512xf32, #tpu.memory_space<vmem>>, vector<8x256xf32>
    %215 = arith.index_cast %210 : i32 to index
    %c0_144 = arith.constant 0 : index
    %216 = vector.load %arg8[%215, %c0_144] : memref<128x512xf32, #tpu.memory_space<vmem>>, vector<8x256xf32>
    %217 = arith.index_cast %210 : i32 to index
    %c256_145 = arith.constant 256 : index
    %218 = vector.load %arg8[%217, %c256_145] : memref<128x512xf32, #tpu.memory_space<vmem>>, vector<8x256xf32>
    %219 = arith.mulf %212, %212 : vector<8x256xf32>
    %220 = arith.mulf %214, %214 : vector<8x256xf32>
    %221 = arith.addf %219, %220 : vector<8x256xf32>
    %cst_146 = arith.constant 1.000000e-07 : f32
    %222 = vector.broadcast %cst_146 : f32 to vector<8x256xf32>
    %223 = arith.maximumf %221, %222 : vector<8x256xf32>
    %224 = arith.mulf %216, %216 : vector<8x256xf32>
    %225 = arith.mulf %218, %218 : vector<8x256xf32>
    %226 = arith.addf %224, %225 : vector<8x256xf32>
    %cst_147 = arith.constant 1.000000e-07 : f32
    %227 = vector.broadcast %cst_147 : f32 to vector<8x256xf32>
    %228 = arith.maximumf %226, %227 : vector<8x256xf32>
    %229 = arith.addf %223, %228 : vector<8x256xf32>
    %230 = arith.mulf %223, %228 : vector<8x256xf32>
    %231 = math.sqrt %230 : vector<8x256xf32>
    %cst_148 = arith.constant 2.000000e+00 : f32
    %232 = vector.broadcast %cst_148 : f32 to vector<8x256xf32>
    %233 = arith.mulf %232, %231 : vector<8x256xf32>
    %234 = arith.subf %229, %233 : vector<8x256xf32>
    %235 = arith.divf %228, %223 : vector<8x256xf32>
    %236 = math.log %235 : vector<8x256xf32>
    %237 = math.absf %236 : vector<8x256xf32>
    %cst_149 = arith.constant 5.000000e-01 : f32
    %238 = vector.broadcast %cst_149 : f32 to vector<8x256xf32>
    %239 = arith.mulf %238, %237 : vector<8x256xf32>
    %c0_150 = arith.constant 0 : index
    %c0_151 = arith.constant 0 : index
    %c0_152 = arith.constant 0 : index
    %c0_153 = arith.constant 0 : index
    %240 = vector.load %arg6[%c0_150, %c0_151, %c0_152, %c0_153] : memref<1x3x8x256xf32, #tpu.memory_space<vmem>>, vector<1x1x8x256xf32>
    %241 = vector.shape_cast %240 : vector<1x1x8x256xf32> to vector<8x256xf32>
    %242 = arith.addf %241, %234 : vector<8x256xf32>
    %c0_154 = arith.constant 0 : index
    %c0_155 = arith.constant 0 : index
    %c0_156 = arith.constant 0 : index
    %c0_157 = arith.constant 0 : index
    %243 = vector.load %arg6[%c0_154, %c0_155, %c0_156, %c0_157] : memref<1x3x8x256xf32, #tpu.memory_space<vmem>>, vector<1x1x8x256xf32>
    %244 = vector.shape_cast %243 : vector<1x1x8x256xf32> to vector<8x256xf32>
    %245 = vector.shape_cast %242 : vector<8x256xf32> to vector<1x1x8x256xf32>
    tpu.vector_store %arg6[%c0_154, %c0_155, %c0_156, %c0_157], %245 {strides = array<i32>} : memref<1x3x8x256xf32, #tpu.memory_space<vmem>>, vector<1x1x8x256xf32>,
    %c0_158 = arith.constant 0 : index
    %c1_159 = arith.constant 1 : index
    %c0_160 = arith.constant 0 : index
    %c0_161 = arith.constant 0 : index
    %246 = vector.load %arg6[%c0_158, %c1_159, %c0_160, %c0_161] : memref<1x3x8x256xf32, #tpu.memory_space<vmem>>, vector<1x1x8x256xf32>
    %247 = vector.shape_cast %246 : vector<1x1x8x256xf32> to vector<8x256xf32>
    %248 = arith.addf %247, %228 : vector<8x256xf32>
    %c0_162 = arith.constant 0 : index
    %c1_163 = arith.constant 1 : index
    %c0_164 = arith.constant 0 : index
    %c0_165 = arith.constant 0 : index
    %249 = vector.load %arg6[%c0_162, %c1_163, %c0_164, %c0_165] : memref<1x3x8x256xf32, #tpu.memory_space<vmem>>, vector<1x1x8x256xf32>
    %250 = vector.shape_cast %249 : vector<1x1x8x256xf32> to vector<8x256xf32>
    %251 = vector.shape_cast %248 : vector<8x256xf32> to vector<1x1x8x256xf32>
    tpu.vector_store %arg6[%c0_162, %c1_163, %c0_164, %c0_165], %251 {strides = array<i32>} : memref<1x3x8x256xf32, #tpu.memory_space<vmem>>, vector<1x1x8x256xf32>,
    %c0_166 = arith.constant 0 : index
    %c2_167 = arith.constant 2 : index
    %c0_168 = arith.constant 0 : index
    %c0_169 = arith.constant 0 : index
    %252 = vector.load %arg6[%c0_166, %c2_167, %c0_168, %c0_169] : memref<1x3x8x256xf32, #tpu.memory_space<vmem>>, vector<1x1x8x256xf32>
    %253 = vector.shape_cast %252 : vector<1x1x8x256xf32> to vector<8x256xf32>
    %254 = arith.addf %253, %239 : vector<8x256xf32>
    %c0_170 = arith.constant 0 : index
    %c2_171 = arith.constant 2 : index
    %c0_172 = arith.constant 0 : index
    %c0_173 = arith.constant 0 : index
    %255 = vector.load %arg6[%c0_170, %c2_171, %c0_172, %c0_173] : memref<1x3x8x256xf32, #tpu.memory_space<vmem>>, vector<1x1x8x256xf32>
    %256 = vector.shape_cast %255 : vector<1x1x8x256xf32> to vector<8x256xf32>
    %257 = vector.shape_cast %254 : vector<8x256xf32> to vector<1x1x8x256xf32>
    tpu.vector_store %arg6[%c0_170, %c2_171, %c0_172, %c0_173], %257 {strides = array<i32>} : memref<1x3x8x256xf32, #tpu.memory_space<vmem>>, vector<1x1x8x256xf32>,
    %c5_i32 = arith.constant 5 : i32
    %c8_i32_174 = arith.constant 8 : i32
    %258 = arith.muli %c5_i32, %c8_i32_174 : i32
    %259 = tpu.assume_multiple %258, 8 : i32
    %260 = arith.index_cast %259 : i32 to index
    %c0_175 = arith.constant 0 : index
    %261 = vector.load %arg7[%260, %c0_175] : memref<128x512xf32, #tpu.memory_space<vmem>>, vector<8x256xf32>
    %262 = arith.index_cast %259 : i32 to index
    %c256_176 = arith.constant 256 : index
    %263 = vector.load %arg7[%262, %c256_176] : memref<128x512xf32, #tpu.memory_space<vmem>>, vector<8x256xf32>
    %264 = arith.index_cast %259 : i32 to index
    %c0_177 = arith.constant 0 : index
    %265 = vector.load %arg8[%264, %c0_177] : memref<128x512xf32, #tpu.memory_space<vmem>>, vector<8x256xf32>
    %266 = arith.index_cast %259 : i32 to index
    %c256_178 = arith.constant 256 : index
    %267 = vector.load %arg8[%266, %c256_178] : memref<128x512xf32, #tpu.memory_space<vmem>>, vector<8x256xf32>
    %268 = arith.mulf %261, %261 : vector<8x256xf32>
    %269 = arith.mulf %263, %263 : vector<8x256xf32>
    %270 = arith.addf %268, %269 : vector<8x256xf32>
    %cst_179 = arith.constant 1.000000e-07 : f32
    %271 = vector.broadcast %cst_179 : f32 to vector<8x256xf32>
    %272 = arith.maximumf %270, %271 : vector<8x256xf32>
    %273 = arith.mulf %265, %265 : vector<8x256xf32>
    %274 = arith.mulf %267, %267 : vector<8x256xf32>
    %275 = arith.addf %273, %274 : vector<8x256xf32>
    %cst_180 = arith.constant 1.000000e-07 : f32
    %276 = vector.broadcast %cst_180 : f32 to vector<8x256xf32>
    %277 = arith.maximumf %275, %276 : vector<8x256xf32>
    %278 = arith.addf %272, %277 : vector<8x256xf32>
    %279 = arith.mulf %272, %277 : vector<8x256xf32>
    %280 = math.sqrt %279 : vector<8x256xf32>
    %cst_181 = arith.constant 2.000000e+00 : f32
    %281 = vector.broadcast %cst_181 : f32 to vector<8x256xf32>
    %282 = arith.mulf %281, %280 : vector<8x256xf32>
    %283 = arith.subf %278, %282 : vector<8x256xf32>
    %284 = arith.divf %277, %272 : vector<8x256xf32>
    %285 = math.log %284 : vector<8x256xf32>
    %286 = math.absf %285 : vector<8x256xf32>
    %cst_182 = arith.constant 5.000000e-01 : f32
    %287 = vector.broadcast %cst_182 : f32 to vector<8x256xf32>
    %288 = arith.mulf %287, %286 : vector<8x256xf32>
    %c0_183 = arith.constant 0 : index
    %c0_184 = arith.constant 0 : index
    %c0_185 = arith.constant 0 : index
    %c0_186 = arith.constant 0 : index
    %289 = vector.load %arg6[%c0_183, %c0_184, %c0_185, %c0_186] : memref<1x3x8x256xf32, #tpu.memory_space<vmem>>, vector<1x1x8x256xf32>
    %290 = vector.shape_cast %289 : vector<1x1x8x256xf32> to vector<8x256xf32>
    %291 = arith.addf %290, %283 : vector<8x256xf32>
    %c0_187 = arith.constant 0 : index
    %c0_188 = arith.constant 0 : index
    %c0_189 = arith.constant 0 : index
    %c0_190 = arith.constant 0 : index
    %292 = vector.load %arg6[%c0_187, %c0_188, %c0_189, %c0_190] : memref<1x3x8x256xf32, #tpu.memory_space<vmem>>, vector<1x1x8x256xf32>
    %293 = vector.shape_cast %292 : vector<1x1x8x256xf32> to vector<8x256xf32>
    %294 = vector.shape_cast %291 : vector<8x256xf32> to vector<1x1x8x256xf32>
    tpu.vector_store %arg6[%c0_187, %c0_188, %c0_189, %c0_190], %294 {strides = array<i32>} : memref<1x3x8x256xf32, #tpu.memory_space<vmem>>, vector<1x1x8x256xf32>,
    %c0_191 = arith.constant 0 : index
    %c1_192 = arith.constant 1 : index
    %c0_193 = arith.constant 0 : index
    %c0_194 = arith.constant 0 : index
    %295 = vector.load %arg6[%c0_191, %c1_192, %c0_193, %c0_194] : memref<1x3x8x256xf32, #tpu.memory_space<vmem>>, vector<1x1x8x256xf32>
    %296 = vector.shape_cast %295 : vector<1x1x8x256xf32> to vector<8x256xf32>
    %297 = arith.addf %296, %277 : vector<8x256xf32>
    %c0_195 = arith.constant 0 : index
    %c1_196 = arith.constant 1 : index
    %c0_197 = arith.constant 0 : index
    %c0_198 = arith.constant 0 : index
    %298 = vector.load %arg6[%c0_195, %c1_196, %c0_197, %c0_198] : memref<1x3x8x256xf32, #tpu.memory_space<vmem>>, vector<1x1x8x256xf32>
    %299 = vector.shape_cast %298 : vector<1x1x8x256xf32> to vector<8x256xf32>
    %300 = vector.shape_cast %297 : vector<8x256xf32> to vector<1x1x8x256xf32>
    tpu.vector_store %arg6[%c0_195, %c1_196, %c0_197, %c0_198], %300 {strides = array<i32>} : memref<1x3x8x256xf32, #tpu.memory_space<vmem>>, vector<1x1x8x256xf32>,
    %c0_199 = arith.constant 0 : index
    %c2_200 = arith.constant 2 : index
    %c0_201 = arith.constant 0 : index
    %c0_202 = arith.constant 0 : index
    %301 = vector.load %arg6[%c0_199, %c2_200, %c0_201, %c0_202] : memref<1x3x8x256xf32, #tpu.memory_space<vmem>>, vector<1x1x8x256xf32>
    %302 = vector.shape_cast %301 : vector<1x1x8x256xf32> to vector<8x256xf32>
    %303 = arith.addf %302, %288 : vector<8x256xf32>
    %c0_203 = arith.constant 0 : index
    %c2_204 = arith.constant 2 : index
    %c0_205 = arith.constant 0 : index
    %c0_206 = arith.constant 0 : index
    %304 = vector.load %arg6[%c0_203, %c2_204, %c0_205, %c0_206] : memref<1x3x8x256xf32, #tpu.memory_space<vmem>>, vector<1x1x8x256xf32>
    %305 = vector.shape_cast %304 : vector<1x1x8x256xf32> to vector<8x256xf32>
    %306 = vector.shape_cast %303 : vector<8x256xf32> to vector<1x1x8x256xf32>
    tpu.vector_store %arg6[%c0_203, %c2_204, %c0_205, %c0_206], %306 {strides = array<i32>} : memref<1x3x8x256xf32, #tpu.memory_space<vmem>>, vector<1x1x8x256xf32>,
    %c6_i32 = arith.constant 6 : i32
    %c8_i32_207 = arith.constant 8 : i32
    %307 = arith.muli %c6_i32, %c8_i32_207 : i32
    %308 = tpu.assume_multiple %307, 8 : i32
    %309 = arith.index_cast %308 : i32 to index
    %c0_208 = arith.constant 0 : index
    %310 = vector.load %arg7[%309, %c0_208] : memref<128x512xf32, #tpu.memory_space<vmem>>, vector<8x256xf32>
    %311 = arith.index_cast %308 : i32 to index
    %c256_209 = arith.constant 256 : index
    %312 = vector.load %arg7[%311, %c256_209] : memref<128x512xf32, #tpu.memory_space<vmem>>, vector<8x256xf32>
    %313 = arith.index_cast %308 : i32 to index
    %c0_210 = arith.constant 0 : index
    %314 = vector.load %arg8[%313, %c0_210] : memref<128x512xf32, #tpu.memory_space<vmem>>, vector<8x256xf32>
    %315 = arith.index_cast %308 : i32 to index
    %c256_211 = arith.constant 256 : index
    %316 = vector.load %arg8[%315, %c256_211] : memref<128x512xf32, #tpu.memory_space<vmem>>, vector<8x256xf32>
    %317 = arith.mulf %310, %310 : vector<8x256xf32>
    %318 = arith.mulf %312, %312 : vector<8x256xf32>
    %319 = arith.addf %317, %318 : vector<8x256xf32>
    %cst_212 = arith.constant 1.000000e-07 : f32
    %320 = vector.broadcast %cst_212 : f32 to vector<8x256xf32>
    %321 = arith.maximumf %319, %320 : vector<8x256xf32>
    %322 = arith.mulf %314, %314 : vector<8x256xf32>
    %323 = arith.mulf %316, %316 : vector<8x256xf32>
    %324 = arith.addf %322, %323 : vector<8x256xf32>
    %cst_213 = arith.constant 1.000000e-07 : f32
    %325 = vector.broadcast %cst_213 : f32 to vector<8x256xf32>
    %326 = arith.maximumf %324, %325 : vector<8x256xf32>
    %327 = arith.addf %321, %326 : vector<8x256xf32>
    %328 = arith.mulf %321, %326 : vector<8x256xf32>
    %329 = math.sqrt %328 : vector<8x256xf32>
    %cst_214 = arith.constant 2.000000e+00 : f32
    %330 = vector.broadcast %cst_214 : f32 to vector<8x256xf32>
    %331 = arith.mulf %330, %329 : vector<8x256xf32>
    %332 = arith.subf %327, %331 : vector<8x256xf32>
    %333 = arith.divf %326, %321 : vector<8x256xf32>
    %334 = math.log %333 : vector<8x256xf32>
    %335 = math.absf %334 : vector<8x256xf32>
    %cst_215 = arith.constant 5.000000e-01 : f32
    %336 = vector.broadcast %cst_215 : f32 to vector<8x256xf32>
    %337 = arith.mulf %336, %335 : vector<8x256xf32>
    %c0_216 = arith.constant 0 : index
    %c0_217 = arith.constant 0 : index
    %c0_218 = arith.constant 0 : index
    %c0_219 = arith.constant 0 : index
    %338 = vector.load %arg6[%c0_216, %c0_217, %c0_218, %c0_219] : memref<1x3x8x256xf32, #tpu.memory_space<vmem>>, vector<1x1x8x256xf32>
    %339 = vector.shape_cast %338 : vector<1x1x8x256xf32> to vector<8x256xf32>
    %340 = arith.addf %339, %332 : vector<8x256xf32>
    %c0_220 = arith.constant 0 : index
    %c0_221 = arith.constant 0 : index
    %c0_222 = arith.constant 0 : index
    %c0_223 = arith.constant 0 : index
    %341 = vector.load %arg6[%c0_220, %c0_221, %c0_222, %c0_223] : memref<1x3x8x256xf32, #tpu.memory_space<vmem>>, vector<1x1x8x256xf32>
    %342 = vector.shape_cast %341 : vector<1x1x8x256xf32> to vector<8x256xf32>
    %343 = vector.shape_cast %340 : vector<8x256xf32> to vector<1x1x8x256xf32>
    tpu.vector_store %arg6[%c0_220, %c0_221, %c0_222, %c0_223], %343 {strides = array<i32>} : memref<1x3x8x256xf32, #tpu.memory_space<vmem>>, vector<1x1x8x256xf32>,
    %c0_224 = arith.constant 0 : index
    %c1_225 = arith.constant 1 : index
    %c0_226 = arith.constant 0 : index
    %c0_227 = arith.constant 0 : index
    %344 = vector.load %arg6[%c0_224, %c1_225, %c0_226, %c0_227] : memref<1x3x8x256xf32, #tpu.memory_space<vmem>>, vector<1x1x8x256xf32>
    %345 = vector.shape_cast %344 : vector<1x1x8x256xf32> to vector<8x256xf32>
    %346 = arith.addf %345, %326 : vector<8x256xf32>
    %c0_228 = arith.constant 0 : index
    %c1_229 = arith.constant 1 : index
    %c0_230 = arith.constant 0 : index
    %c0_231 = arith.constant 0 : index
    %347 = vector.load %arg6[%c0_228, %c1_229, %c0_230, %c0_231] : memref<1x3x8x256xf32, #tpu.memory_space<vmem>>, vector<1x1x8x256xf32>
    %348 = vector.shape_cast %347 : vector<1x1x8x256xf32> to vector<8x256xf32>
    %349 = vector.shape_cast %346 : vector<8x256xf32> to vector<1x1x8x256xf32>
    tpu.vector_store %arg6[%c0_228, %c1_229, %c0_230, %c0_231], %349 {strides = array<i32>} : memref<1x3x8x256xf32, #tpu.memory_space<vmem>>, vector<1x1x8x256xf32>,
    %c0_232 = arith.constant 0 : index
    %c2_233 = arith.constant 2 : index
    %c0_234 = arith.constant 0 : index
    %c0_235 = arith.constant 0 : index
    %350 = vector.load %arg6[%c0_232, %c2_233, %c0_234, %c0_235] : memref<1x3x8x256xf32, #tpu.memory_space<vmem>>, vector<1x1x8x256xf32>
    %351 = vector.shape_cast %350 : vector<1x1x8x256xf32> to vector<8x256xf32>
    %352 = arith.addf %351, %337 : vector<8x256xf32>
    %c0_236 = arith.constant 0 : index
    %c2_237 = arith.constant 2 : index
    %c0_238 = arith.constant 0 : index
    %c0_239 = arith.constant 0 : index
    %353 = vector.load %arg6[%c0_236, %c2_237, %c0_238, %c0_239] : memref<1x3x8x256xf32, #tpu.memory_space<vmem>>, vector<1x1x8x256xf32>
    %354 = vector.shape_cast %353 : vector<1x1x8x256xf32> to vector<8x256xf32>
    %355 = vector.shape_cast %352 : vector<8x256xf32> to vector<1x1x8x256xf32>
    tpu.vector_store %arg6[%c0_236, %c2_237, %c0_238, %c0_239], %355 {strides = array<i32>} : memref<1x3x8x256xf32, #tpu.memory_space<vmem>>, vector<1x1x8x256xf32>,
    %c7_i32 = arith.constant 7 : i32
    %c8_i32_240 = arith.constant 8 : i32
    %356 = arith.muli %c7_i32, %c8_i32_240 : i32
    %357 = tpu.assume_multiple %356, 8 : i32
    %358 = arith.index_cast %357 : i32 to index
    %c0_241 = arith.constant 0 : index
    %359 = vector.load %arg7[%358, %c0_241] : memref<128x512xf32, #tpu.memory_space<vmem>>, vector<8x256xf32>
    %360 = arith.index_cast %357 : i32 to index
    %c256_242 = arith.constant 256 : index
    %361 = vector.load %arg7[%360, %c256_242] : memref<128x512xf32, #tpu.memory_space<vmem>>, vector<8x256xf32>
    %362 = arith.index_cast %357 : i32 to index
    %c0_243 = arith.constant 0 : index
    %363 = vector.load %arg8[%362, %c0_243] : memref<128x512xf32, #tpu.memory_space<vmem>>, vector<8x256xf32>
    %364 = arith.index_cast %357 : i32 to index
    %c256_244 = arith.constant 256 : index
    %365 = vector.load %arg8[%364, %c256_244] : memref<128x512xf32, #tpu.memory_space<vmem>>, vector<8x256xf32>
    %366 = arith.mulf %359, %359 : vector<8x256xf32>
    %367 = arith.mulf %361, %361 : vector<8x256xf32>
    %368 = arith.addf %366, %367 : vector<8x256xf32>
    %cst_245 = arith.constant 1.000000e-07 : f32
    %369 = vector.broadcast %cst_245 : f32 to vector<8x256xf32>
    %370 = arith.maximumf %368, %369 : vector<8x256xf32>
    %371 = arith.mulf %363, %363 : vector<8x256xf32>
    %372 = arith.mulf %365, %365 : vector<8x256xf32>
    %373 = arith.addf %371, %372 : vector<8x256xf32>
    %cst_246 = arith.constant 1.000000e-07 : f32
    %374 = vector.broadcast %cst_246 : f32 to vector<8x256xf32>
    %375 = arith.maximumf %373, %374 : vector<8x256xf32>
    %376 = arith.addf %370, %375 : vector<8x256xf32>
    %377 = arith.mulf %370, %375 : vector<8x256xf32>
    %378 = math.sqrt %377 : vector<8x256xf32>
    %cst_247 = arith.constant 2.000000e+00 : f32
    %379 = vector.broadcast %cst_247 : f32 to vector<8x256xf32>
    %380 = arith.mulf %379, %378 : vector<8x256xf32>
    %381 = arith.subf %376, %380 : vector<8x256xf32>
    %382 = arith.divf %375, %370 : vector<8x256xf32>
    %383 = math.log %382 : vector<8x256xf32>
    %384 = math.absf %383 : vector<8x256xf32>
    %cst_248 = arith.constant 5.000000e-01 : f32
    %385 = vector.broadcast %cst_248 : f32 to vector<8x256xf32>
    %386 = arith.mulf %385, %384 : vector<8x256xf32>
    %c0_249 = arith.constant 0 : index
    %c0_250 = arith.constant 0 : index
    %c0_251 = arith.constant 0 : index
    %c0_252 = arith.constant 0 : index
    %387 = vector.load %arg6[%c0_249, %c0_250, %c0_251, %c0_252] : memref<1x3x8x256xf32, #tpu.memory_space<vmem>>, vector<1x1x8x256xf32>
    %388 = vector.shape_cast %387 : vector<1x1x8x256xf32> to vector<8x256xf32>
    %389 = arith.addf %388, %381 : vector<8x256xf32>
    %c0_253 = arith.constant 0 : index
    %c0_254 = arith.constant 0 : index
    %c0_255 = arith.constant 0 : index
    %c0_256 = arith.constant 0 : index
    %390 = vector.load %arg6[%c0_253, %c0_254, %c0_255, %c0_256] : memref<1x3x8x256xf32, #tpu.memory_space<vmem>>, vector<1x1x8x256xf32>
    %391 = vector.shape_cast %390 : vector<1x1x8x256xf32> to vector<8x256xf32>
    %392 = vector.shape_cast %389 : vector<8x256xf32> to vector<1x1x8x256xf32>
    tpu.vector_store %arg6[%c0_253, %c0_254, %c0_255, %c0_256], %392 {strides = array<i32>} : memref<1x3x8x256xf32, #tpu.memory_space<vmem>>, vector<1x1x8x256xf32>,
    %c0_257 = arith.constant 0 : index
    %c1_258 = arith.constant 1 : index
    %c0_259 = arith.constant 0 : index
    %c0_260 = arith.constant 0 : index
    %393 = vector.load %arg6[%c0_257, %c1_258, %c0_259, %c0_260] : memref<1x3x8x256xf32, #tpu.memory_space<vmem>>, vector<1x1x8x256xf32>
    %394 = vector.shape_cast %393 : vector<1x1x8x256xf32> to vector<8x256xf32>
    %395 = arith.addf %394, %375 : vector<8x256xf32>
    %c0_261 = arith.constant 0 : index
    %c1_262 = arith.constant 1 : index
    %c0_263 = arith.constant 0 : index
    %c0_264 = arith.constant 0 : index
    %396 = vector.load %arg6[%c0_261, %c1_262, %c0_263, %c0_264] : memref<1x3x8x256xf32, #tpu.memory_space<vmem>>, vector<1x1x8x256xf32>
    %397 = vector.shape_cast %396 : vector<1x1x8x256xf32> to vector<8x256xf32>
    %398 = vector.shape_cast %395 : vector<8x256xf32> to vector<1x1x8x256xf32>
    tpu.vector_store %arg6[%c0_261, %c1_262, %c0_263, %c0_264], %398 {strides = array<i32>} : memref<1x3x8x256xf32, #tpu.memory_space<vmem>>, vector<1x1x8x256xf32>,
    %c0_265 = arith.constant 0 : index
    %c2_266 = arith.constant 2 : index
    %c0_267 = arith.constant 0 : index
    %c0_268 = arith.constant 0 : index
    %399 = vector.load %arg6[%c0_265, %c2_266, %c0_267, %c0_268] : memref<1x3x8x256xf32, #tpu.memory_space<vmem>>, vector<1x1x8x256xf32>
    %400 = vector.shape_cast %399 : vector<1x1x8x256xf32> to vector<8x256xf32>
    %401 = arith.addf %400, %386 : vector<8x256xf32>
    %c0_269 = arith.constant 0 : index
    %c2_270 = arith.constant 2 : index
    %c0_271 = arith.constant 0 : index
    %c0_272 = arith.constant 0 : index
    %402 = vector.load %arg6[%c0_269, %c2_270, %c0_271, %c0_272] : memref<1x3x8x256xf32, #tpu.memory_space<vmem>>, vector<1x1x8x256xf32>
    %403 = vector.shape_cast %402 : vector<1x1x8x256xf32> to vector<8x256xf32>
    %404 = vector.shape_cast %401 : vector<8x256xf32> to vector<1x1x8x256xf32>
    tpu.vector_store %arg6[%c0_269, %c2_270, %c0_271, %c0_272], %404 {strides = array<i32>} : memref<1x3x8x256xf32, #tpu.memory_space<vmem>>, vector<1x1x8x256xf32>,
    %c8_i32_273 = arith.constant 8 : i32
    %c8_i32_274 = arith.constant 8 : i32
    %405 = arith.muli %c8_i32_273, %c8_i32_274 : i32
    %406 = tpu.assume_multiple %405, 8 : i32
    %407 = arith.index_cast %406 : i32 to index
    %c0_275 = arith.constant 0 : index
    %408 = vector.load %arg7[%407, %c0_275] : memref<128x512xf32, #tpu.memory_space<vmem>>, vector<8x256xf32>
    %409 = arith.index_cast %406 : i32 to index
    %c256_276 = arith.constant 256 : index
    %410 = vector.load %arg7[%409, %c256_276] : memref<128x512xf32, #tpu.memory_space<vmem>>, vector<8x256xf32>
    %411 = arith.index_cast %406 : i32 to index
    %c0_277 = arith.constant 0 : index
    %412 = vector.load %arg8[%411, %c0_277] : memref<128x512xf32, #tpu.memory_space<vmem>>, vector<8x256xf32>
    %413 = arith.index_cast %406 : i32 to index
    %c256_278 = arith.constant 256 : index
    %414 = vector.load %arg8[%413, %c256_278] : memref<128x512xf32, #tpu.memory_space<vmem>>, vector<8x256xf32>
    %415 = arith.mulf %408, %408 : vector<8x256xf32>
    %416 = arith.mulf %410, %410 : vector<8x256xf32>
    %417 = arith.addf %415, %416 : vector<8x256xf32>
    %cst_279 = arith.constant 1.000000e-07 : f32
    %418 = vector.broadcast %cst_279 : f32 to vector<8x256xf32>
    %419 = arith.maximumf %417, %418 : vector<8x256xf32>
    %420 = arith.mulf %412, %412 : vector<8x256xf32>
    %421 = arith.mulf %414, %414 : vector<8x256xf32>
    %422 = arith.addf %420, %421 : vector<8x256xf32>
    %cst_280 = arith.constant 1.000000e-07 : f32
    %423 = vector.broadcast %cst_280 : f32 to vector<8x256xf32>
    %424 = arith.maximumf %422, %423 : vector<8x256xf32>
    %425 = arith.addf %419, %424 : vector<8x256xf32>
    %426 = arith.mulf %419, %424 : vector<8x256xf32>
    %427 = math.sqrt %426 : vector<8x256xf32>
    %cst_281 = arith.constant 2.000000e+00 : f32
    %428 = vector.broadcast %cst_281 : f32 to vector<8x256xf32>
    %429 = arith.mulf %428, %427 : vector<8x256xf32>
    %430 = arith.subf %425, %429 : vector<8x256xf32>
    %431 = arith.divf %424, %419 : vector<8x256xf32>
    %432 = math.log %431 : vector<8x256xf32>
    %433 = math.absf %432 : vector<8x256xf32>
    %cst_282 = arith.constant 5.000000e-01 : f32
    %434 = vector.broadcast %cst_282 : f32 to vector<8x256xf32>
    %435 = arith.mulf %434, %433 : vector<8x256xf32>
    %c0_283 = arith.constant 0 : index
    %c0_284 = arith.constant 0 : index
    %c0_285 = arith.constant 0 : index
    %c0_286 = arith.constant 0 : index
    %436 = vector.load %arg6[%c0_283, %c0_284, %c0_285, %c0_286] : memref<1x3x8x256xf32, #tpu.memory_space<vmem>>, vector<1x1x8x256xf32>
    %437 = vector.shape_cast %436 : vector<1x1x8x256xf32> to vector<8x256xf32>
    %438 = arith.addf %437, %430 : vector<8x256xf32>
    %c0_287 = arith.constant 0 : index
    %c0_288 = arith.constant 0 : index
    %c0_289 = arith.constant 0 : index
    %c0_290 = arith.constant 0 : index
    %439 = vector.load %arg6[%c0_287, %c0_288, %c0_289, %c0_290] : memref<1x3x8x256xf32, #tpu.memory_space<vmem>>, vector<1x1x8x256xf32>
    %440 = vector.shape_cast %439 : vector<1x1x8x256xf32> to vector<8x256xf32>
    %441 = vector.shape_cast %438 : vector<8x256xf32> to vector<1x1x8x256xf32>
    tpu.vector_store %arg6[%c0_287, %c0_288, %c0_289, %c0_290], %441 {strides = array<i32>} : memref<1x3x8x256xf32, #tpu.memory_space<vmem>>, vector<1x1x8x256xf32>,
    %c0_291 = arith.constant 0 : index
    %c1_292 = arith.constant 1 : index
    %c0_293 = arith.constant 0 : index
    %c0_294 = arith.constant 0 : index
    %442 = vector.load %arg6[%c0_291, %c1_292, %c0_293, %c0_294] : memref<1x3x8x256xf32, #tpu.memory_space<vmem>>, vector<1x1x8x256xf32>
    %443 = vector.shape_cast %442 : vector<1x1x8x256xf32> to vector<8x256xf32>
    %444 = arith.addf %443, %424 : vector<8x256xf32>
    %c0_295 = arith.constant 0 : index
    %c1_296 = arith.constant 1 : index
    %c0_297 = arith.constant 0 : index
    %c0_298 = arith.constant 0 : index
    %445 = vector.load %arg6[%c0_295, %c1_296, %c0_297, %c0_298] : memref<1x3x8x256xf32, #tpu.memory_space<vmem>>, vector<1x1x8x256xf32>
    %446 = vector.shape_cast %445 : vector<1x1x8x256xf32> to vector<8x256xf32>
    %447 = vector.shape_cast %444 : vector<8x256xf32> to vector<1x1x8x256xf32>
    tpu.vector_store %arg6[%c0_295, %c1_296, %c0_297, %c0_298], %447 {strides = array<i32>} : memref<1x3x8x256xf32, #tpu.memory_space<vmem>>, vector<1x1x8x256xf32>,
    %c0_299 = arith.constant 0 : index
    %c2_300 = arith.constant 2 : index
    %c0_301 = arith.constant 0 : index
    %c0_302 = arith.constant 0 : index
    %448 = vector.load %arg6[%c0_299, %c2_300, %c0_301, %c0_302] : memref<1x3x8x256xf32, #tpu.memory_space<vmem>>, vector<1x1x8x256xf32>
    %449 = vector.shape_cast %448 : vector<1x1x8x256xf32> to vector<8x256xf32>
    %450 = arith.addf %449, %435 : vector<8x256xf32>
    %c0_303 = arith.constant 0 : index
    %c2_304 = arith.constant 2 : index
    %c0_305 = arith.constant 0 : index
    %c0_306 = arith.constant 0 : index
    %451 = vector.load %arg6[%c0_303, %c2_304, %c0_305, %c0_306] : memref<1x3x8x256xf32, #tpu.memory_space<vmem>>, vector<1x1x8x256xf32>
    %452 = vector.shape_cast %451 : vector<1x1x8x256xf32> to vector<8x256xf32>
    %453 = vector.shape_cast %450 : vector<8x256xf32> to vector<1x1x8x256xf32>
    tpu.vector_store %arg6[%c0_303, %c2_304, %c0_305, %c0_306], %453 {strides = array<i32>} : memref<1x3x8x256xf32, #tpu.memory_space<vmem>>, vector<1x1x8x256xf32>,
    %c9_i32 = arith.constant 9 : i32
    %c8_i32_307 = arith.constant 8 : i32
    %454 = arith.muli %c9_i32, %c8_i32_307 : i32
    %455 = tpu.assume_multiple %454, 8 : i32
    %456 = arith.index_cast %455 : i32 to index
    %c0_308 = arith.constant 0 : index
    %457 = vector.load %arg7[%456, %c0_308] : memref<128x512xf32, #tpu.memory_space<vmem>>, vector<8x256xf32>
    %458 = arith.index_cast %455 : i32 to index
    %c256_309 = arith.constant 256 : index
    %459 = vector.load %arg7[%458, %c256_309] : memref<128x512xf32, #tpu.memory_space<vmem>>, vector<8x256xf32>
    %460 = arith.index_cast %455 : i32 to index
    %c0_310 = arith.constant 0 : index
    %461 = vector.load %arg8[%460, %c0_310] : memref<128x512xf32, #tpu.memory_space<vmem>>, vector<8x256xf32>
    %462 = arith.index_cast %455 : i32 to index
    %c256_311 = arith.constant 256 : index
    %463 = vector.load %arg8[%462, %c256_311] : memref<128x512xf32, #tpu.memory_space<vmem>>, vector<8x256xf32>
    %464 = arith.mulf %457, %457 : vector<8x256xf32>
    %465 = arith.mulf %459, %459 : vector<8x256xf32>
    %466 = arith.addf %464, %465 : vector<8x256xf32>
    %cst_312 = arith.constant 1.000000e-07 : f32
    %467 = vector.broadcast %cst_312 : f32 to vector<8x256xf32>
    %468 = arith.maximumf %466, %467 : vector<8x256xf32>
    %469 = arith.mulf %461, %461 : vector<8x256xf32>
    %470 = arith.mulf %463, %463 : vector<8x256xf32>
    %471 = arith.addf %469, %470 : vector<8x256xf32>
    %cst_313 = arith.constant 1.000000e-07 : f32
    %472 = vector.broadcast %cst_313 : f32 to vector<8x256xf32>
    %473 = arith.maximumf %471, %472 : vector<8x256xf32>
    %474 = arith.addf %468, %473 : vector<8x256xf32>
    %475 = arith.mulf %468, %473 : vector<8x256xf32>
    %476 = math.sqrt %475 : vector<8x256xf32>
    %cst_314 = arith.constant 2.000000e+00 : f32
    %477 = vector.broadcast %cst_314 : f32 to vector<8x256xf32>
    %478 = arith.mulf %477, %476 : vector<8x256xf32>
    %479 = arith.subf %474, %478 : vector<8x256xf32>
    %480 = arith.divf %473, %468 : vector<8x256xf32>
    %481 = math.log %480 : vector<8x256xf32>
    %482 = math.absf %481 : vector<8x256xf32>
    %cst_315 = arith.constant 5.000000e-01 : f32
    %483 = vector.broadcast %cst_315 : f32 to vector<8x256xf32>
    %484 = arith.mulf %483, %482 : vector<8x256xf32>
    %c0_316 = arith.constant 0 : index
    %c0_317 = arith.constant 0 : index
    %c0_318 = arith.constant 0 : index
    %c0_319 = arith.constant 0 : index
    %485 = vector.load %arg6[%c0_316, %c0_317, %c0_318, %c0_319] : memref<1x3x8x256xf32, #tpu.memory_space<vmem>>, vector<1x1x8x256xf32>
    %486 = vector.shape_cast %485 : vector<1x1x8x256xf32> to vector<8x256xf32>
    %487 = arith.addf %486, %479 : vector<8x256xf32>
    %c0_320 = arith.constant 0 : index
    %c0_321 = arith.constant 0 : index
    %c0_322 = arith.constant 0 : index
    %c0_323 = arith.constant 0 : index
    %488 = vector.load %arg6[%c0_320, %c0_321, %c0_322, %c0_323] : memref<1x3x8x256xf32, #tpu.memory_space<vmem>>, vector<1x1x8x256xf32>
    %489 = vector.shape_cast %488 : vector<1x1x8x256xf32> to vector<8x256xf32>
    %490 = vector.shape_cast %487 : vector<8x256xf32> to vector<1x1x8x256xf32>
    tpu.vector_store %arg6[%c0_320, %c0_321, %c0_322, %c0_323], %490 {strides = array<i32>} : memref<1x3x8x256xf32, #tpu.memory_space<vmem>>, vector<1x1x8x256xf32>,
    %c0_324 = arith.constant 0 : index
    %c1_325 = arith.constant 1 : index
    %c0_326 = arith.constant 0 : index
    %c0_327 = arith.constant 0 : index
    %491 = vector.load %arg6[%c0_324, %c1_325, %c0_326, %c0_327] : memref<1x3x8x256xf32, #tpu.memory_space<vmem>>, vector<1x1x8x256xf32>
    %492 = vector.shape_cast %491 : vector<1x1x8x256xf32> to vector<8x256xf32>
    %493 = arith.addf %492, %473 : vector<8x256xf32>
    %c0_328 = arith.constant 0 : index
    %c1_329 = arith.constant 1 : index
    %c0_330 = arith.constant 0 : index
    %c0_331 = arith.constant 0 : index
    %494 = vector.load %arg6[%c0_328, %c1_329, %c0_330, %c0_331] : memref<1x3x8x256xf32, #tpu.memory_space<vmem>>, vector<1x1x8x256xf32>
    %495 = vector.shape_cast %494 : vector<1x1x8x256xf32> to vector<8x256xf32>
    %496 = vector.shape_cast %493 : vector<8x256xf32> to vector<1x1x8x256xf32>
    tpu.vector_store %arg6[%c0_328, %c1_329, %c0_330, %c0_331], %496 {strides = array<i32>} : memref<1x3x8x256xf32, #tpu.memory_space<vmem>>, vector<1x1x8x256xf32>,
    %c0_332 = arith.constant 0 : index
    %c2_333 = arith.constant 2 : index
    %c0_334 = arith.constant 0 : index
    %c0_335 = arith.constant 0 : index
    %497 = vector.load %arg6[%c0_332, %c2_333, %c0_334, %c0_335] : memref<1x3x8x256xf32, #tpu.memory_space<vmem>>, vector<1x1x8x256xf32>
    %498 = vector.shape_cast %497 : vector<1x1x8x256xf32> to vector<8x256xf32>
    %499 = arith.addf %498, %484 : vector<8x256xf32>
    %c0_336 = arith.constant 0 : index
    %c2_337 = arith.constant 2 : index
    %c0_338 = arith.constant 0 : index
    %c0_339 = arith.constant 0 : index
    %500 = vector.load %arg6[%c0_336, %c2_337, %c0_338, %c0_339] : memref<1x3x8x256xf32, #tpu.memory_space<vmem>>, vector<1x1x8x256xf32>
    %501 = vector.shape_cast %500 : vector<1x1x8x256xf32> to vector<8x256xf32>
    %502 = vector.shape_cast %499 : vector<8x256xf32> to vector<1x1x8x256xf32>
    tpu.vector_store %arg6[%c0_336, %c2_337, %c0_338, %c0_339], %502 {strides = array<i32>} : memref<1x3x8x256xf32, #tpu.memory_space<vmem>>, vector<1x1x8x256xf32>,
    %c10_i32 = arith.constant 10 : i32
    %c8_i32_340 = arith.constant 8 : i32
    %503 = arith.muli %c10_i32, %c8_i32_340 : i32
    %504 = tpu.assume_multiple %503, 8 : i32
    %505 = arith.index_cast %504 : i32 to index
    %c0_341 = arith.constant 0 : index
    %506 = vector.load %arg7[%505, %c0_341] : memref<128x512xf32, #tpu.memory_space<vmem>>, vector<8x256xf32>
    %507 = arith.index_cast %504 : i32 to index
    %c256_342 = arith.constant 256 : index
    %508 = vector.load %arg7[%507, %c256_342] : memref<128x512xf32, #tpu.memory_space<vmem>>, vector<8x256xf32>
    %509 = arith.index_cast %504 : i32 to index
    %c0_343 = arith.constant 0 : index
    %510 = vector.load %arg8[%509, %c0_343] : memref<128x512xf32, #tpu.memory_space<vmem>>, vector<8x256xf32>
    %511 = arith.index_cast %504 : i32 to index
    %c256_344 = arith.constant 256 : index
    %512 = vector.load %arg8[%511, %c256_344] : memref<128x512xf32, #tpu.memory_space<vmem>>, vector<8x256xf32>
    %513 = arith.mulf %506, %506 : vector<8x256xf32>
    %514 = arith.mulf %508, %508 : vector<8x256xf32>
    %515 = arith.addf %513, %514 : vector<8x256xf32>
    %cst_345 = arith.constant 1.000000e-07 : f32
    %516 = vector.broadcast %cst_345 : f32 to vector<8x256xf32>
    %517 = arith.maximumf %515, %516 : vector<8x256xf32>
    %518 = arith.mulf %510, %510 : vector<8x256xf32>
    %519 = arith.mulf %512, %512 : vector<8x256xf32>
    %520 = arith.addf %518, %519 : vector<8x256xf32>
    %cst_346 = arith.constant 1.000000e-07 : f32
    %521 = vector.broadcast %cst_346 : f32 to vector<8x256xf32>
    %522 = arith.maximumf %520, %521 : vector<8x256xf32>
    %523 = arith.addf %517, %522 : vector<8x256xf32>
    %524 = arith.mulf %517, %522 : vector<8x256xf32>
    %525 = math.sqrt %524 : vector<8x256xf32>
    %cst_347 = arith.constant 2.000000e+00 : f32
    %526 = vector.broadcast %cst_347 : f32 to vector<8x256xf32>
    %527 = arith.mulf %526, %525 : vector<8x256xf32>
    %528 = arith.subf %523, %527 : vector<8x256xf32>
    %529 = arith.divf %522, %517 : vector<8x256xf32>
    %530 = math.log %529 : vector<8x256xf32>
    %531 = math.absf %530 : vector<8x256xf32>
    %cst_348 = arith.constant 5.000000e-01 : f32
    %532 = vector.broadcast %cst_348 : f32 to vector<8x256xf32>
    %533 = arith.mulf %532, %531 : vector<8x256xf32>
    %c0_349 = arith.constant 0 : index
    %c0_350 = arith.constant 0 : index
    %c0_351 = arith.constant 0 : index
    %c0_352 = arith.constant 0 : index
    %534 = vector.load %arg6[%c0_349, %c0_350, %c0_351, %c0_352] : memref<1x3x8x256xf32, #tpu.memory_space<vmem>>, vector<1x1x8x256xf32>
    %535 = vector.shape_cast %534 : vector<1x1x8x256xf32> to vector<8x256xf32>
    %536 = arith.addf %535, %528 : vector<8x256xf32>
    %c0_353 = arith.constant 0 : index
    %c0_354 = arith.constant 0 : index
    %c0_355 = arith.constant 0 : index
    %c0_356 = arith.constant 0 : index
    %537 = vector.load %arg6[%c0_353, %c0_354, %c0_355, %c0_356] : memref<1x3x8x256xf32, #tpu.memory_space<vmem>>, vector<1x1x8x256xf32>
    %538 = vector.shape_cast %537 : vector<1x1x8x256xf32> to vector<8x256xf32>
    %539 = vector.shape_cast %536 : vector<8x256xf32> to vector<1x1x8x256xf32>
    tpu.vector_store %arg6[%c0_353, %c0_354, %c0_355, %c0_356], %539 {strides = array<i32>} : memref<1x3x8x256xf32, #tpu.memory_space<vmem>>, vector<1x1x8x256xf32>,
    %c0_357 = arith.constant 0 : index
    %c1_358 = arith.constant 1 : index
    %c0_359 = arith.constant 0 : index
    %c0_360 = arith.constant 0 : index
    %540 = vector.load %arg6[%c0_357, %c1_358, %c0_359, %c0_360] : memref<1x3x8x256xf32, #tpu.memory_space<vmem>>, vector<1x1x8x256xf32>
    %541 = vector.shape_cast %540 : vector<1x1x8x256xf32> to vector<8x256xf32>
    %542 = arith.addf %541, %522 : vector<8x256xf32>
    %c0_361 = arith.constant 0 : index
    %c1_362 = arith.constant 1 : index
    %c0_363 = arith.constant 0 : index
    %c0_364 = arith.constant 0 : index
    %543 = vector.load %arg6[%c0_361, %c1_362, %c0_363, %c0_364] : memref<1x3x8x256xf32, #tpu.memory_space<vmem>>, vector<1x1x8x256xf32>
    %544 = vector.shape_cast %543 : vector<1x1x8x256xf32> to vector<8x256xf32>
    %545 = vector.shape_cast %542 : vector<8x256xf32> to vector<1x1x8x256xf32>
    tpu.vector_store %arg6[%c0_361, %c1_362, %c0_363, %c0_364], %545 {strides = array<i32>} : memref<1x3x8x256xf32, #tpu.memory_space<vmem>>, vector<1x1x8x256xf32>,
    %c0_365 = arith.constant 0 : index
    %c2_366 = arith.constant 2 : index
    %c0_367 = arith.constant 0 : index
    %c0_368 = arith.constant 0 : index
    %546 = vector.load %arg6[%c0_365, %c2_366, %c0_367, %c0_368] : memref<1x3x8x256xf32, #tpu.memory_space<vmem>>, vector<1x1x8x256xf32>
    %547 = vector.shape_cast %546 : vector<1x1x8x256xf32> to vector<8x256xf32>
    %548 = arith.addf %547, %533 : vector<8x256xf32>
    %c0_369 = arith.constant 0 : index
    %c2_370 = arith.constant 2 : index
    %c0_371 = arith.constant 0 : index
    %c0_372 = arith.constant 0 : index
    %549 = vector.load %arg6[%c0_369, %c2_370, %c0_371, %c0_372] : memref<1x3x8x256xf32, #tpu.memory_space<vmem>>, vector<1x1x8x256xf32>
    %550 = vector.shape_cast %549 : vector<1x1x8x256xf32> to vector<8x256xf32>
    %551 = vector.shape_cast %548 : vector<8x256xf32> to vector<1x1x8x256xf32>
    tpu.vector_store %arg6[%c0_369, %c2_370, %c0_371, %c0_372], %551 {strides = array<i32>} : memref<1x3x8x256xf32, #tpu.memory_space<vmem>>, vector<1x1x8x256xf32>,
    %c11_i32 = arith.constant 11 : i32
    %c8_i32_373 = arith.constant 8 : i32
    %552 = arith.muli %c11_i32, %c8_i32_373 : i32
    %553 = tpu.assume_multiple %552, 8 : i32
    %554 = arith.index_cast %553 : i32 to index
    %c0_374 = arith.constant 0 : index
    %555 = vector.load %arg7[%554, %c0_374] : memref<128x512xf32, #tpu.memory_space<vmem>>, vector<8x256xf32>
    %556 = arith.index_cast %553 : i32 to index
    %c256_375 = arith.constant 256 : index
    %557 = vector.load %arg7[%556, %c256_375] : memref<128x512xf32, #tpu.memory_space<vmem>>, vector<8x256xf32>
    %558 = arith.index_cast %553 : i32 to index
    %c0_376 = arith.constant 0 : index
    %559 = vector.load %arg8[%558, %c0_376] : memref<128x512xf32, #tpu.memory_space<vmem>>, vector<8x256xf32>
    %560 = arith.index_cast %553 : i32 to index
    %c256_377 = arith.constant 256 : index
    %561 = vector.load %arg8[%560, %c256_377] : memref<128x512xf32, #tpu.memory_space<vmem>>, vector<8x256xf32>
    %562 = arith.mulf %555, %555 : vector<8x256xf32>
    %563 = arith.mulf %557, %557 : vector<8x256xf32>
    %564 = arith.addf %562, %563 : vector<8x256xf32>
    %cst_378 = arith.constant 1.000000e-07 : f32
    %565 = vector.broadcast %cst_378 : f32 to vector<8x256xf32>
    %566 = arith.maximumf %564, %565 : vector<8x256xf32>
    %567 = arith.mulf %559, %559 : vector<8x256xf32>
    %568 = arith.mulf %561, %561 : vector<8x256xf32>
    %569 = arith.addf %567, %568 : vector<8x256xf32>
    %cst_379 = arith.constant 1.000000e-07 : f32
    %570 = vector.broadcast %cst_379 : f32 to vector<8x256xf32>
    %571 = arith.maximumf %569, %570 : vector<8x256xf32>
    %572 = arith.addf %566, %571 : vector<8x256xf32>
    %573 = arith.mulf %566, %571 : vector<8x256xf32>
    %574 = math.sqrt %573 : vector<8x256xf32>
    %cst_380 = arith.constant 2.000000e+00 : f32
    %575 = vector.broadcast %cst_380 : f32 to vector<8x256xf32>
    %576 = arith.mulf %575, %574 : vector<8x256xf32>
    %577 = arith.subf %572, %576 : vector<8x256xf32>
    %578 = arith.divf %571, %566 : vector<8x256xf32>
    %579 = math.log %578 : vector<8x256xf32>
    %580 = math.absf %579 : vector<8x256xf32>
    %cst_381 = arith.constant 5.000000e-01 : f32
    %581 = vector.broadcast %cst_381 : f32 to vector<8x256xf32>
    %582 = arith.mulf %581, %580 : vector<8x256xf32>
    %c0_382 = arith.constant 0 : index
    %c0_383 = arith.constant 0 : index
    %c0_384 = arith.constant 0 : index
    %c0_385 = arith.constant 0 : index
    %583 = vector.load %arg6[%c0_382, %c0_383, %c0_384, %c0_385] : memref<1x3x8x256xf32, #tpu.memory_space<vmem>>, vector<1x1x8x256xf32>
    %584 = vector.shape_cast %583 : vector<1x1x8x256xf32> to vector<8x256xf32>
    %585 = arith.addf %584, %577 : vector<8x256xf32>
    %c0_386 = arith.constant 0 : index
    %c0_387 = arith.constant 0 : index
    %c0_388 = arith.constant 0 : index
    %c0_389 = arith.constant 0 : index
    %586 = vector.load %arg6[%c0_386, %c0_387, %c0_388, %c0_389] : memref<1x3x8x256xf32, #tpu.memory_space<vmem>>, vector<1x1x8x256xf32>
    %587 = vector.shape_cast %586 : vector<1x1x8x256xf32> to vector<8x256xf32>
    %588 = vector.shape_cast %585 : vector<8x256xf32> to vector<1x1x8x256xf32>
    tpu.vector_store %arg6[%c0_386, %c0_387, %c0_388, %c0_389], %588 {strides = array<i32>} : memref<1x3x8x256xf32, #tpu.memory_space<vmem>>, vector<1x1x8x256xf32>,
    %c0_390 = arith.constant 0 : index
    %c1_391 = arith.constant 1 : index
    %c0_392 = arith.constant 0 : index
    %c0_393 = arith.constant 0 : index
    %589 = vector.load %arg6[%c0_390, %c1_391, %c0_392, %c0_393] : memref<1x3x8x256xf32, #tpu.memory_space<vmem>>, vector<1x1x8x256xf32>
    %590 = vector.shape_cast %589 : vector<1x1x8x256xf32> to vector<8x256xf32>
    %591 = arith.addf %590, %571 : vector<8x256xf32>
    %c0_394 = arith.constant 0 : index
    %c1_395 = arith.constant 1 : index
    %c0_396 = arith.constant 0 : index
    %c0_397 = arith.constant 0 : index
    %592 = vector.load %arg6[%c0_394, %c1_395, %c0_396, %c0_397] : memref<1x3x8x256xf32, #tpu.memory_space<vmem>>, vector<1x1x8x256xf32>
    %593 = vector.shape_cast %592 : vector<1x1x8x256xf32> to vector<8x256xf32>
    %594 = vector.shape_cast %591 : vector<8x256xf32> to vector<1x1x8x256xf32>
    tpu.vector_store %arg6[%c0_394, %c1_395, %c0_396, %c0_397], %594 {strides = array<i32>} : memref<1x3x8x256xf32, #tpu.memory_space<vmem>>, vector<1x1x8x256xf32>,
    %c0_398 = arith.constant 0 : index
    %c2_399 = arith.constant 2 : index
    %c0_400 = arith.constant 0 : index
    %c0_401 = arith.constant 0 : index
    %595 = vector.load %arg6[%c0_398, %c2_399, %c0_400, %c0_401] : memref<1x3x8x256xf32, #tpu.memory_space<vmem>>, vector<1x1x8x256xf32>
    %596 = vector.shape_cast %595 : vector<1x1x8x256xf32> to vector<8x256xf32>
    %597 = arith.addf %596, %582 : vector<8x256xf32>
    %c0_402 = arith.constant 0 : index
    %c2_403 = arith.constant 2 : index
    %c0_404 = arith.constant 0 : index
    %c0_405 = arith.constant 0 : index
    %598 = vector.load %arg6[%c0_402, %c2_403, %c0_404, %c0_405] : memref<1x3x8x256xf32, #tpu.memory_space<vmem>>, vector<1x1x8x256xf32>
    %599 = vector.shape_cast %598 : vector<1x1x8x256xf32> to vector<8x256xf32>
    %600 = vector.shape_cast %597 : vector<8x256xf32> to vector<1x1x8x256xf32>
    tpu.vector_store %arg6[%c0_402, %c2_403, %c0_404, %c0_405], %600 {strides = array<i32>} : memref<1x3x8x256xf32, #tpu.memory_space<vmem>>, vector<1x1x8x256xf32>,
    %c12_i32 = arith.constant 12 : i32
    %c8_i32_406 = arith.constant 8 : i32
    %601 = arith.muli %c12_i32, %c8_i32_406 : i32
    %602 = tpu.assume_multiple %601, 8 : i32
    %603 = arith.index_cast %602 : i32 to index
    %c0_407 = arith.constant 0 : index
    %604 = vector.load %arg7[%603, %c0_407] : memref<128x512xf32, #tpu.memory_space<vmem>>, vector<8x256xf32>
    %605 = arith.index_cast %602 : i32 to index
    %c256_408 = arith.constant 256 : index
    %606 = vector.load %arg7[%605, %c256_408] : memref<128x512xf32, #tpu.memory_space<vmem>>, vector<8x256xf32>
    %607 = arith.index_cast %602 : i32 to index
    %c0_409 = arith.constant 0 : index
    %608 = vector.load %arg8[%607, %c0_409] : memref<128x512xf32, #tpu.memory_space<vmem>>, vector<8x256xf32>
    %609 = arith.index_cast %602 : i32 to index
    %c256_410 = arith.constant 256 : index
    %610 = vector.load %arg8[%609, %c256_410] : memref<128x512xf32, #tpu.memory_space<vmem>>, vector<8x256xf32>
    %611 = arith.mulf %604, %604 : vector<8x256xf32>
    %612 = arith.mulf %606, %606 : vector<8x256xf32>
    %613 = arith.addf %611, %612 : vector<8x256xf32>
    %cst_411 = arith.constant 1.000000e-07 : f32
    %614 = vector.broadcast %cst_411 : f32 to vector<8x256xf32>
    %615 = arith.maximumf %613, %614 : vector<8x256xf32>
    %616 = arith.mulf %608, %608 : vector<8x256xf32>
    %617 = arith.mulf %610, %610 : vector<8x256xf32>
    %618 = arith.addf %616, %617 : vector<8x256xf32>
    %cst_412 = arith.constant 1.000000e-07 : f32
    %619 = vector.broadcast %cst_412 : f32 to vector<8x256xf32>
    %620 = arith.maximumf %618, %619 : vector<8x256xf32>
    %621 = arith.addf %615, %620 : vector<8x256xf32>
    %622 = arith.mulf %615, %620 : vector<8x256xf32>
    %623 = math.sqrt %622 : vector<8x256xf32>
    %cst_413 = arith.constant 2.000000e+00 : f32
    %624 = vector.broadcast %cst_413 : f32 to vector<8x256xf32>
    %625 = arith.mulf %624, %623 : vector<8x256xf32>
    %626 = arith.subf %621, %625 : vector<8x256xf32>
    %627 = arith.divf %620, %615 : vector<8x256xf32>
    %628 = math.log %627 : vector<8x256xf32>
    %629 = math.absf %628 : vector<8x256xf32>
    %cst_414 = arith.constant 5.000000e-01 : f32
    %630 = vector.broadcast %cst_414 : f32 to vector<8x256xf32>
    %631 = arith.mulf %630, %629 : vector<8x256xf32>
    %c0_415 = arith.constant 0 : index
    %c0_416 = arith.constant 0 : index
    %c0_417 = arith.constant 0 : index
    %c0_418 = arith.constant 0 : index
    %632 = vector.load %arg6[%c0_415, %c0_416, %c0_417, %c0_418] : memref<1x3x8x256xf32, #tpu.memory_space<vmem>>, vector<1x1x8x256xf32>
    %633 = vector.shape_cast %632 : vector<1x1x8x256xf32> to vector<8x256xf32>
    %634 = arith.addf %633, %626 : vector<8x256xf32>
    %c0_419 = arith.constant 0 : index
    %c0_420 = arith.constant 0 : index
    %c0_421 = arith.constant 0 : index
    %c0_422 = arith.constant 0 : index
    %635 = vector.load %arg6[%c0_419, %c0_420, %c0_421, %c0_422] : memref<1x3x8x256xf32, #tpu.memory_space<vmem>>, vector<1x1x8x256xf32>
    %636 = vector.shape_cast %635 : vector<1x1x8x256xf32> to vector<8x256xf32>
    %637 = vector.shape_cast %634 : vector<8x256xf32> to vector<1x1x8x256xf32>
    tpu.vector_store %arg6[%c0_419, %c0_420, %c0_421, %c0_422], %637 {strides = array<i32>} : memref<1x3x8x256xf32, #tpu.memory_space<vmem>>, vector<1x1x8x256xf32>,
    %c0_423 = arith.constant 0 : index
    %c1_424 = arith.constant 1 : index
    %c0_425 = arith.constant 0 : index
    %c0_426 = arith.constant 0 : index
    %638 = vector.load %arg6[%c0_423, %c1_424, %c0_425, %c0_426] : memref<1x3x8x256xf32, #tpu.memory_space<vmem>>, vector<1x1x8x256xf32>
    %639 = vector.shape_cast %638 : vector<1x1x8x256xf32> to vector<8x256xf32>
    %640 = arith.addf %639, %620 : vector<8x256xf32>
    %c0_427 = arith.constant 0 : index
    %c1_428 = arith.constant 1 : index
    %c0_429 = arith.constant 0 : index
    %c0_430 = arith.constant 0 : index
    %641 = vector.load %arg6[%c0_427, %c1_428, %c0_429, %c0_430] : memref<1x3x8x256xf32, #tpu.memory_space<vmem>>, vector<1x1x8x256xf32>
    %642 = vector.shape_cast %641 : vector<1x1x8x256xf32> to vector<8x256xf32>
    %643 = vector.shape_cast %640 : vector<8x256xf32> to vector<1x1x8x256xf32>
    tpu.vector_store %arg6[%c0_427, %c1_428, %c0_429, %c0_430], %643 {strides = array<i32>} : memref<1x3x8x256xf32, #tpu.memory_space<vmem>>, vector<1x1x8x256xf32>,
    %c0_431 = arith.constant 0 : index
    %c2_432 = arith.constant 2 : index
    %c0_433 = arith.constant 0 : index
    %c0_434 = arith.constant 0 : index
    %644 = vector.load %arg6[%c0_431, %c2_432, %c0_433, %c0_434] : memref<1x3x8x256xf32, #tpu.memory_space<vmem>>, vector<1x1x8x256xf32>
    %645 = vector.shape_cast %644 : vector<1x1x8x256xf32> to vector<8x256xf32>
    %646 = arith.addf %645, %631 : vector<8x256xf32>
    %c0_435 = arith.constant 0 : index
    %c2_436 = arith.constant 2 : index
    %c0_437 = arith.constant 0 : index
    %c0_438 = arith.constant 0 : index
    %647 = vector.load %arg6[%c0_435, %c2_436, %c0_437, %c0_438] : memref<1x3x8x256xf32, #tpu.memory_space<vmem>>, vector<1x1x8x256xf32>
    %648 = vector.shape_cast %647 : vector<1x1x8x256xf32> to vector<8x256xf32>
    %649 = vector.shape_cast %646 : vector<8x256xf32> to vector<1x1x8x256xf32>
    tpu.vector_store %arg6[%c0_435, %c2_436, %c0_437, %c0_438], %649 {strides = array<i32>} : memref<1x3x8x256xf32, #tpu.memory_space<vmem>>, vector<1x1x8x256xf32>,
    %c13_i32 = arith.constant 13 : i32
    %c8_i32_439 = arith.constant 8 : i32
    %650 = arith.muli %c13_i32, %c8_i32_439 : i32
    %651 = tpu.assume_multiple %650, 8 : i32
    %652 = arith.index_cast %651 : i32 to index
    %c0_440 = arith.constant 0 : index
    %653 = vector.load %arg7[%652, %c0_440] : memref<128x512xf32, #tpu.memory_space<vmem>>, vector<8x256xf32>
    %654 = arith.index_cast %651 : i32 to index
    %c256_441 = arith.constant 256 : index
    %655 = vector.load %arg7[%654, %c256_441] : memref<128x512xf32, #tpu.memory_space<vmem>>, vector<8x256xf32>
    %656 = arith.index_cast %651 : i32 to index
    %c0_442 = arith.constant 0 : index
    %657 = vector.load %arg8[%656, %c0_442] : memref<128x512xf32, #tpu.memory_space<vmem>>, vector<8x256xf32>
    %658 = arith.index_cast %651 : i32 to index
    %c256_443 = arith.constant 256 : index
    %659 = vector.load %arg8[%658, %c256_443] : memref<128x512xf32, #tpu.memory_space<vmem>>, vector<8x256xf32>
    %660 = arith.mulf %653, %653 : vector<8x256xf32>
    %661 = arith.mulf %655, %655 : vector<8x256xf32>
    %662 = arith.addf %660, %661 : vector<8x256xf32>
    %cst_444 = arith.constant 1.000000e-07 : f32
    %663 = vector.broadcast %cst_444 : f32 to vector<8x256xf32>
    %664 = arith.maximumf %662, %663 : vector<8x256xf32>
    %665 = arith.mulf %657, %657 : vector<8x256xf32>
    %666 = arith.mulf %659, %659 : vector<8x256xf32>
    %667 = arith.addf %665, %666 : vector<8x256xf32>
    %cst_445 = arith.constant 1.000000e-07 : f32
    %668 = vector.broadcast %cst_445 : f32 to vector<8x256xf32>
    %669 = arith.maximumf %667, %668 : vector<8x256xf32>
    %670 = arith.addf %664, %669 : vector<8x256xf32>
    %671 = arith.mulf %664, %669 : vector<8x256xf32>
    %672 = math.sqrt %671 : vector<8x256xf32>
    %cst_446 = arith.constant 2.000000e+00 : f32
    %673 = vector.broadcast %cst_446 : f32 to vector<8x256xf32>
    %674 = arith.mulf %673, %672 : vector<8x256xf32>
    %675 = arith.subf %670, %674 : vector<8x256xf32>
    %676 = arith.divf %669, %664 : vector<8x256xf32>
    %677 = math.log %676 : vector<8x256xf32>
    %678 = math.absf %677 : vector<8x256xf32>
    %cst_447 = arith.constant 5.000000e-01 : f32
    %679 = vector.broadcast %cst_447 : f32 to vector<8x256xf32>
    %680 = arith.mulf %679, %678 : vector<8x256xf32>
    %c0_448 = arith.constant 0 : index
    %c0_449 = arith.constant 0 : index
    %c0_450 = arith.constant 0 : index
    %c0_451 = arith.constant 0 : index
    %681 = vector.load %arg6[%c0_448, %c0_449, %c0_450, %c0_451] : memref<1x3x8x256xf32, #tpu.memory_space<vmem>>, vector<1x1x8x256xf32>
    %682 = vector.shape_cast %681 : vector<1x1x8x256xf32> to vector<8x256xf32>
    %683 = arith.addf %682, %675 : vector<8x256xf32>
    %c0_452 = arith.constant 0 : index
    %c0_453 = arith.constant 0 : index
    %c0_454 = arith.constant 0 : index
    %c0_455 = arith.constant 0 : index
    %684 = vector.load %arg6[%c0_452, %c0_453, %c0_454, %c0_455] : memref<1x3x8x256xf32, #tpu.memory_space<vmem>>, vector<1x1x8x256xf32>
    %685 = vector.shape_cast %684 : vector<1x1x8x256xf32> to vector<8x256xf32>
    %686 = vector.shape_cast %683 : vector<8x256xf32> to vector<1x1x8x256xf32>
    tpu.vector_store %arg6[%c0_452, %c0_453, %c0_454, %c0_455], %686 {strides = array<i32>} : memref<1x3x8x256xf32, #tpu.memory_space<vmem>>, vector<1x1x8x256xf32>,
    %c0_456 = arith.constant 0 : index
    %c1_457 = arith.constant 1 : index
    %c0_458 = arith.constant 0 : index
    %c0_459 = arith.constant 0 : index
    %687 = vector.load %arg6[%c0_456, %c1_457, %c0_458, %c0_459] : memref<1x3x8x256xf32, #tpu.memory_space<vmem>>, vector<1x1x8x256xf32>
    %688 = vector.shape_cast %687 : vector<1x1x8x256xf32> to vector<8x256xf32>
    %689 = arith.addf %688, %669 : vector<8x256xf32>
    %c0_460 = arith.constant 0 : index
    %c1_461 = arith.constant 1 : index
    %c0_462 = arith.constant 0 : index
    %c0_463 = arith.constant 0 : index
    %690 = vector.load %arg6[%c0_460, %c1_461, %c0_462, %c0_463] : memref<1x3x8x256xf32, #tpu.memory_space<vmem>>, vector<1x1x8x256xf32>
    %691 = vector.shape_cast %690 : vector<1x1x8x256xf32> to vector<8x256xf32>
    %692 = vector.shape_cast %689 : vector<8x256xf32> to vector<1x1x8x256xf32>
    tpu.vector_store %arg6[%c0_460, %c1_461, %c0_462, %c0_463], %692 {strides = array<i32>} : memref<1x3x8x256xf32, #tpu.memory_space<vmem>>, vector<1x1x8x256xf32>,
    %c0_464 = arith.constant 0 : index
    %c2_465 = arith.constant 2 : index
    %c0_466 = arith.constant 0 : index
    %c0_467 = arith.constant 0 : index
    %693 = vector.load %arg6[%c0_464, %c2_465, %c0_466, %c0_467] : memref<1x3x8x256xf32, #tpu.memory_space<vmem>>, vector<1x1x8x256xf32>
    %694 = vector.shape_cast %693 : vector<1x1x8x256xf32> to vector<8x256xf32>
    %695 = arith.addf %694, %680 : vector<8x256xf32>
    %c0_468 = arith.constant 0 : index
    %c2_469 = arith.constant 2 : index
    %c0_470 = arith.constant 0 : index
    %c0_471 = arith.constant 0 : index
    %696 = vector.load %arg6[%c0_468, %c2_469, %c0_470, %c0_471] : memref<1x3x8x256xf32, #tpu.memory_space<vmem>>, vector<1x1x8x256xf32>
    %697 = vector.shape_cast %696 : vector<1x1x8x256xf32> to vector<8x256xf32>
    %698 = vector.shape_cast %695 : vector<8x256xf32> to vector<1x1x8x256xf32>
    tpu.vector_store %arg6[%c0_468, %c2_469, %c0_470, %c0_471], %698 {strides = array<i32>} : memref<1x3x8x256xf32, #tpu.memory_space<vmem>>, vector<1x1x8x256xf32>,
    %c14_i32 = arith.constant 14 : i32
    %c8_i32_472 = arith.constant 8 : i32
    %699 = arith.muli %c14_i32, %c8_i32_472 : i32
    %700 = tpu.assume_multiple %699, 8 : i32
    %701 = arith.index_cast %700 : i32 to index
    %c0_473 = arith.constant 0 : index
    %702 = vector.load %arg7[%701, %c0_473] : memref<128x512xf32, #tpu.memory_space<vmem>>, vector<8x256xf32>
    %703 = arith.index_cast %700 : i32 to index
    %c256_474 = arith.constant 256 : index
    %704 = vector.load %arg7[%703, %c256_474] : memref<128x512xf32, #tpu.memory_space<vmem>>, vector<8x256xf32>
    %705 = arith.index_cast %700 : i32 to index
    %c0_475 = arith.constant 0 : index
    %706 = vector.load %arg8[%705, %c0_475] : memref<128x512xf32, #tpu.memory_space<vmem>>, vector<8x256xf32>
    %707 = arith.index_cast %700 : i32 to index
    %c256_476 = arith.constant 256 : index
    %708 = vector.load %arg8[%707, %c256_476] : memref<128x512xf32, #tpu.memory_space<vmem>>, vector<8x256xf32>
    %709 = arith.mulf %702, %702 : vector<8x256xf32>
    %710 = arith.mulf %704, %704 : vector<8x256xf32>
    %711 = arith.addf %709, %710 : vector<8x256xf32>
    %cst_477 = arith.constant 1.000000e-07 : f32
    %712 = vector.broadcast %cst_477 : f32 to vector<8x256xf32>
    %713 = arith.maximumf %711, %712 : vector<8x256xf32>
    %714 = arith.mulf %706, %706 : vector<8x256xf32>
    %715 = arith.mulf %708, %708 : vector<8x256xf32>
    %716 = arith.addf %714, %715 : vector<8x256xf32>
    %cst_478 = arith.constant 1.000000e-07 : f32
    %717 = vector.broadcast %cst_478 : f32 to vector<8x256xf32>
    %718 = arith.maximumf %716, %717 : vector<8x256xf32>
    %719 = arith.addf %713, %718 : vector<8x256xf32>
    %720 = arith.mulf %713, %718 : vector<8x256xf32>
    %721 = math.sqrt %720 : vector<8x256xf32>
    %cst_479 = arith.constant 2.000000e+00 : f32
    %722 = vector.broadcast %cst_479 : f32 to vector<8x256xf32>
    %723 = arith.mulf %722, %721 : vector<8x256xf32>
    %724 = arith.subf %719, %723 : vector<8x256xf32>
    %725 = arith.divf %718, %713 : vector<8x256xf32>
    %726 = math.log %725 : vector<8x256xf32>
    %727 = math.absf %726 : vector<8x256xf32>
    %cst_480 = arith.constant 5.000000e-01 : f32
    %728 = vector.broadcast %cst_480 : f32 to vector<8x256xf32>
    %729 = arith.mulf %728, %727 : vector<8x256xf32>
    %c0_481 = arith.constant 0 : index
    %c0_482 = arith.constant 0 : index
    %c0_483 = arith.constant 0 : index
    %c0_484 = arith.constant 0 : index
    %730 = vector.load %arg6[%c0_481, %c0_482, %c0_483, %c0_484] : memref<1x3x8x256xf32, #tpu.memory_space<vmem>>, vector<1x1x8x256xf32>
    %731 = vector.shape_cast %730 : vector<1x1x8x256xf32> to vector<8x256xf32>
    %732 = arith.addf %731, %724 : vector<8x256xf32>
    %c0_485 = arith.constant 0 : index
    %c0_486 = arith.constant 0 : index
    %c0_487 = arith.constant 0 : index
    %c0_488 = arith.constant 0 : index
    %733 = vector.load %arg6[%c0_485, %c0_486, %c0_487, %c0_488] : memref<1x3x8x256xf32, #tpu.memory_space<vmem>>, vector<1x1x8x256xf32>
    %734 = vector.shape_cast %733 : vector<1x1x8x256xf32> to vector<8x256xf32>
    %735 = vector.shape_cast %732 : vector<8x256xf32> to vector<1x1x8x256xf32>
    tpu.vector_store %arg6[%c0_485, %c0_486, %c0_487, %c0_488], %735 {strides = array<i32>} : memref<1x3x8x256xf32, #tpu.memory_space<vmem>>, vector<1x1x8x256xf32>,
    %c0_489 = arith.constant 0 : index
    %c1_490 = arith.constant 1 : index
    %c0_491 = arith.constant 0 : index
    %c0_492 = arith.constant 0 : index
    %736 = vector.load %arg6[%c0_489, %c1_490, %c0_491, %c0_492] : memref<1x3x8x256xf32, #tpu.memory_space<vmem>>, vector<1x1x8x256xf32>
    %737 = vector.shape_cast %736 : vector<1x1x8x256xf32> to vector<8x256xf32>
    %738 = arith.addf %737, %718 : vector<8x256xf32>
    %c0_493 = arith.constant 0 : index
    %c1_494 = arith.constant 1 : index
    %c0_495 = arith.constant 0 : index
    %c0_496 = arith.constant 0 : index
    %739 = vector.load %arg6[%c0_493, %c1_494, %c0_495, %c0_496] : memref<1x3x8x256xf32, #tpu.memory_space<vmem>>, vector<1x1x8x256xf32>
    %740 = vector.shape_cast %739 : vector<1x1x8x256xf32> to vector<8x256xf32>
    %741 = vector.shape_cast %738 : vector<8x256xf32> to vector<1x1x8x256xf32>
    tpu.vector_store %arg6[%c0_493, %c1_494, %c0_495, %c0_496], %741 {strides = array<i32>} : memref<1x3x8x256xf32, #tpu.memory_space<vmem>>, vector<1x1x8x256xf32>,
    %c0_497 = arith.constant 0 : index
    %c2_498 = arith.constant 2 : index
    %c0_499 = arith.constant 0 : index
    %c0_500 = arith.constant 0 : index
    %742 = vector.load %arg6[%c0_497, %c2_498, %c0_499, %c0_500] : memref<1x3x8x256xf32, #tpu.memory_space<vmem>>, vector<1x1x8x256xf32>
    %743 = vector.shape_cast %742 : vector<1x1x8x256xf32> to vector<8x256xf32>
    %744 = arith.addf %743, %729 : vector<8x256xf32>
    %c0_501 = arith.constant 0 : index
    %c2_502 = arith.constant 2 : index
    %c0_503 = arith.constant 0 : index
    %c0_504 = arith.constant 0 : index
    %745 = vector.load %arg6[%c0_501, %c2_502, %c0_503, %c0_504] : memref<1x3x8x256xf32, #tpu.memory_space<vmem>>, vector<1x1x8x256xf32>
    %746 = vector.shape_cast %745 : vector<1x1x8x256xf32> to vector<8x256xf32>
    %747 = vector.shape_cast %744 : vector<8x256xf32> to vector<1x1x8x256xf32>
    tpu.vector_store %arg6[%c0_501, %c2_502, %c0_503, %c0_504], %747 {strides = array<i32>} : memref<1x3x8x256xf32, #tpu.memory_space<vmem>>, vector<1x1x8x256xf32>,
    %c15_i32 = arith.constant 15 : i32
    %c8_i32_505 = arith.constant 8 : i32
    %748 = arith.muli %c15_i32, %c8_i32_505 : i32
    %749 = tpu.assume_multiple %748, 8 : i32
    %750 = arith.index_cast %749 : i32 to index
    %c0_506 = arith.constant 0 : index
    %751 = vector.load %arg7[%750, %c0_506] : memref<128x512xf32, #tpu.memory_space<vmem>>, vector<8x256xf32>
    %752 = arith.index_cast %749 : i32 to index
    %c256_507 = arith.constant 256 : index
    %753 = vector.load %arg7[%752, %c256_507] : memref<128x512xf32, #tpu.memory_space<vmem>>, vector<8x256xf32>
    %754 = arith.index_cast %749 : i32 to index
    %c0_508 = arith.constant 0 : index
    %755 = vector.load %arg8[%754, %c0_508] : memref<128x512xf32, #tpu.memory_space<vmem>>, vector<8x256xf32>
    %756 = arith.index_cast %749 : i32 to index
    %c256_509 = arith.constant 256 : index
    %757 = vector.load %arg8[%756, %c256_509] : memref<128x512xf32, #tpu.memory_space<vmem>>, vector<8x256xf32>
    %758 = arith.mulf %751, %751 : vector<8x256xf32>
    %759 = arith.mulf %753, %753 : vector<8x256xf32>
    %760 = arith.addf %758, %759 : vector<8x256xf32>
    %cst_510 = arith.constant 1.000000e-07 : f32
    %761 = vector.broadcast %cst_510 : f32 to vector<8x256xf32>
    %762 = arith.maximumf %760, %761 : vector<8x256xf32>
    %763 = arith.mulf %755, %755 : vector<8x256xf32>
    %764 = arith.mulf %757, %757 : vector<8x256xf32>
    %765 = arith.addf %763, %764 : vector<8x256xf32>
    %cst_511 = arith.constant 1.000000e-07 : f32
    %766 = vector.broadcast %cst_511 : f32 to vector<8x256xf32>
    %767 = arith.maximumf %765, %766 : vector<8x256xf32>
    %768 = arith.addf %762, %767 : vector<8x256xf32>
    %769 = arith.mulf %762, %767 : vector<8x256xf32>
    %770 = math.sqrt %769 : vector<8x256xf32>
    %cst_512 = arith.constant 2.000000e+00 : f32
    %771 = vector.broadcast %cst_512 : f32 to vector<8x256xf32>
    %772 = arith.mulf %771, %770 : vector<8x256xf32>
    %773 = arith.subf %768, %772 : vector<8x256xf32>
    %774 = arith.divf %767, %762 : vector<8x256xf32>
    %775 = math.log %774 : vector<8x256xf32>
    %776 = math.absf %775 : vector<8x256xf32>
    %cst_513 = arith.constant 5.000000e-01 : f32
    %777 = vector.broadcast %cst_513 : f32 to vector<8x256xf32>
    %778 = arith.mulf %777, %776 : vector<8x256xf32>
    %c0_514 = arith.constant 0 : index
    %c0_515 = arith.constant 0 : index
    %c0_516 = arith.constant 0 : index
    %c0_517 = arith.constant 0 : index
    %779 = vector.load %arg6[%c0_514, %c0_515, %c0_516, %c0_517] : memref<1x3x8x256xf32, #tpu.memory_space<vmem>>, vector<1x1x8x256xf32>
    %780 = vector.shape_cast %779 : vector<1x1x8x256xf32> to vector<8x256xf32>
    %781 = arith.addf %780, %773 : vector<8x256xf32>
    %c0_518 = arith.constant 0 : index
    %c0_519 = arith.constant 0 : index
    %c0_520 = arith.constant 0 : index
    %c0_521 = arith.constant 0 : index
    %782 = vector.load %arg6[%c0_518, %c0_519, %c0_520, %c0_521] : memref<1x3x8x256xf32, #tpu.memory_space<vmem>>, vector<1x1x8x256xf32>
    %783 = vector.shape_cast %782 : vector<1x1x8x256xf32> to vector<8x256xf32>
    %784 = vector.shape_cast %781 : vector<8x256xf32> to vector<1x1x8x256xf32>
    tpu.vector_store %arg6[%c0_518, %c0_519, %c0_520, %c0_521], %784 {strides = array<i32>} : memref<1x3x8x256xf32, #tpu.memory_space<vmem>>, vector<1x1x8x256xf32>,
    %c0_522 = arith.constant 0 : index
    %c1_523 = arith.constant 1 : index
    %c0_524 = arith.constant 0 : index
    %c0_525 = arith.constant 0 : index
    %785 = vector.load %arg6[%c0_522, %c1_523, %c0_524, %c0_525] : memref<1x3x8x256xf32, #tpu.memory_space<vmem>>, vector<1x1x8x256xf32>
    %786 = vector.shape_cast %785 : vector<1x1x8x256xf32> to vector<8x256xf32>
    %787 = arith.addf %786, %767 : vector<8x256xf32>
    %c0_526 = arith.constant 0 : index
    %c1_527 = arith.constant 1 : index
    %c0_528 = arith.constant 0 : index
    %c0_529 = arith.constant 0 : index
    %788 = vector.load %arg6[%c0_526, %c1_527, %c0_528, %c0_529] : memref<1x3x8x256xf32, #tpu.memory_space<vmem>>, vector<1x1x8x256xf32>
    %789 = vector.shape_cast %788 : vector<1x1x8x256xf32> to vector<8x256xf32>
    %790 = vector.shape_cast %787 : vector<8x256xf32> to vector<1x1x8x256xf32>
    tpu.vector_store %arg6[%c0_526, %c1_527, %c0_528, %c0_529], %790 {strides = array<i32>} : memref<1x3x8x256xf32, #tpu.memory_space<vmem>>, vector<1x1x8x256xf32>,
    %c0_530 = arith.constant 0 : index
    %c2_531 = arith.constant 2 : index
    %c0_532 = arith.constant 0 : index
    %c0_533 = arith.constant 0 : index
    %791 = vector.load %arg6[%c0_530, %c2_531, %c0_532, %c0_533] : memref<1x3x8x256xf32, #tpu.memory_space<vmem>>, vector<1x1x8x256xf32>
    %792 = vector.shape_cast %791 : vector<1x1x8x256xf32> to vector<8x256xf32>
    %793 = arith.addf %792, %778 : vector<8x256xf32>
    %c0_534 = arith.constant 0 : index
    %c2_535 = arith.constant 2 : index
    %c0_536 = arith.constant 0 : index
    %c0_537 = arith.constant 0 : index
    %794 = vector.load %arg6[%c0_534, %c2_535, %c0_536, %c0_537] : memref<1x3x8x256xf32, #tpu.memory_space<vmem>>, vector<1x1x8x256xf32>
    %795 = vector.shape_cast %794 : vector<1x1x8x256xf32> to vector<8x256xf32>
    %796 = vector.shape_cast %793 : vector<8x256xf32> to vector<1x1x8x256xf32>
    tpu.vector_store %arg6[%c0_534, %c2_535, %c0_536, %c0_537], %796 {strides = array<i32>} : memref<1x3x8x256xf32, #tpu.memory_space<vmem>>, vector<1x1x8x256xf32>,
    %c16_i32 = arith.constant 16 : i32
    return
  }
  func.func @transform_0(%arg0: i32, %arg1: memref<3xi32, #tpu.memory_space<smem>>, %arg2: memref<3xi32, #tpu.memory_space<smem>>) -> (i32, i32) {
    %c0_i32 = arith.constant 0 : i32
    %c0_i32_0 = arith.constant 0 : i32
    return %arg0, %c0_i32 : i32, i32
  }
  func.func @transform_1(%arg0: i32, %arg1: memref<3xi32, #tpu.memory_space<smem>>, %arg2: memref<3xi32, #tpu.memory_space<smem>>) -> (i32, i32) {
    %c0_i32 = arith.constant 0 : i32
    %c0_i32_0 = arith.constant 0 : i32
    return %arg0, %c0_i32 : i32, i32
  }
  func.func @transform_2(%arg0: i32, %arg1: memref<3xi32, #tpu.memory_space<smem>>, %arg2: memref<3xi32, #tpu.memory_space<smem>>) -> (i32, i32, i32) {
    %0 = arith.index_cast %arg0 : i32 to index
    %1 = memref.load %arg1[%0] : memref<3xi32, #tpu.memory_space<smem>>
    %c0_i32 = arith.constant 0 : i32
    %c0_i32_0 = arith.constant 0 : i32
    %c0_i32_1 = arith.constant 0 : i32
    return %1, %c0_i32, %c0_i32_0 : i32, i32, i32
  }
  func.func @transform_3(%arg0: i32, %arg1: memref<3xi32, #tpu.memory_space<smem>>, %arg2: memref<3xi32, #tpu.memory_space<smem>>) -> (i32, i32, i32, i32) {
    %0 = arith.index_cast %arg0 : i32 to index
    %1 = memref.load %arg1[%0] : memref<3xi32, #tpu.memory_space<smem>>
    %c0_i32 = arith.constant 0 : i32
    %c0_i32_0 = arith.constant 0 : i32
    %c0_i32_1 = arith.constant 0 : i32
    %c0_i32_2 = arith.constant 0 : i32
    return %1, %c0_i32, %c0_i32_0, %c0_i32_1 : i32, i32, i32, i32
  }
}

</mosaic_0001>

<bundles_post_ra>
// kernel: loss_fn.1
= control target key start
LH: loop header
LB: loop body
LE: loop exit
PB: predicated region body
PF: predicated region fallthrough
CT: control target
= control target key end

     0   :  { %s4599_s24 = smov [#allocation5]   ;;  %s4600_s25 = smov [#allocation6]   ;;  %s7479_s0 = inlined_call_operand.vmem [shape: s32[3], index: 0, kind: input, shape index: {}]   ;;  %s7480_s2 = inlined_call_operand.vmem [shape: bf16[384,256], index: 2, kind: input, shape index: {}]   ;;  %s7481_s3 = inlined_call_operand.vmem [shape: bf16[384,256], index: 3, kind: input, shape index: {}]   ;;  %s7482_s4 = inlined_call_operand.vmem [shape: bf16[3,256,512], index: 4, kind: input, shape index: {}]   ;;  %s7483_s5 = inlined_call_operand.vmem [shape: f32[3,3,8,256], index: 5, kind: output, shape index: {}]   ;;  %s7484_s1 = inlined_call_operand.vmem [shape: s32[3], index: 1, kind: input, shape index: {}]  }
   0x1   :  { %s11_s20 = sshll.u32 %s7479_s0, 4  ;;  %s16_s23 = sshll.u32 %s7484_s1, 4  ;;  %s12_s20 = int_to_ptr.vmem [resolvable:$true] %s11_s20  ;;  %s17_s23 = int_to_ptr.vmem [resolvable:$true] %s16_s23 }
   0x2   :  { %14 = dma.vmem_to_smem %s12_s20, 16, %s4599_s24, [#allocation4] }
   0x3   :  { %19 = dma.vmem_to_smem %s17_s23, 16, %s4600_s25, [#allocation4] }
   0x4   :  { %4593 = dma.done.wait [#allocation4], 32 }
   0x5   :  { %4594 = vsyncadd [#allocation4], 4294967264 }
   0x6   :  { %22 = sfence }
   0x7   :  { %s4638_s26 = smov 0  }
   0x8 LB: > { %s3733_s0 = sadd.s32 4294967295, %s4597_s26   ;;  %p3737_p0 = scmp.ge.s32.totalorder %s4597_s26, 1  ;;  %s4597_s26 = sphi %s4638_s26, %s28_s26  }
   0x9   : > { %p182_p1 = scmp.lt.s32.totalorder %s4597_s26, 4 }
   0xb   : > { %p183_p2 = pnand %p3737_p0, %p182_p1 }
   0xd   : > { %186 = sbr.rel (%p183_p2) target bundleno = 838 (0x346), region = 32 }
  0x12   : > { %s3738_s1 = sshll.u32 %s3733_s0, 4  ;;  %s234_s27 = sld [smem:[#allocation5 + %s3733_s0]] }
  0x13   : > { %p221_p3 = scmp.lt.s32.totalorder %s3738_s1, 47  ;;  %s241_s28 = sld [smem:[#allocation5 + %s3733_s0]] }
  0x14   : > { %s248_s29 = sld [smem:[#allocation6 + %s3733_s0]] }
  0x15   : > { %s7923_s1 = smov (!%p221_p3, %s3738_s1), 47 }
  0x16   : > { %s4262_s30 = sshll.u32 %s7923_s1, 3 }
  0x17   : > { %s4649_s8 = scalar_lea.vmem %s7480_s2, %s4262_s30  ;;  %s4654_s11 = scalar_lea.vmem %s7481_s3, %s4262_s30 }
  0x18   : > { %p235_p4 = scmp.lt.s32.totalorder %s234_s27, 2 }
  0x19   : > { %p242_p5 = scmp.lt.s32.totalorder %s241_s28, 2 }
  0x1a   : > { %s7925_s27 = smov (!%p235_p4, %s234_s27), 2  ;;  %p3747_p6 = scmp.ne.s32.totalorder %s248_s29, 1 }
  0x1b   : > { %s7927_s28 = smov (!%p242_p5, %s241_s28), 2  ;;  %s4264_s12 = sshll.u32 %s7925_s27, 9 }
  0x1c   : > { %s4659_s15 = scalar_lea.vmem %s7482_s4, %s4264_s12  ;;  %s4361_s16 = smul.u32 48, %s7927_s28 }
  0x1d   : > { %252 = sbr.rel (%p3747_p6) target bundleno = 41 (0x29), region = 36 }
  0x1e   : > { %s4664_s19 = scalar_lea.vmem %s7483_s5, %s4361_s16 }
  0x22   : > { %v4601_v0 = vmov 0.0  }
  0x23   : > { %253 = vst [vmem:[%s4664_s19] sm:$0xff] %v4601_v0 }
  0x24   : > { %254 = vst [vmem:[%s4664_s19 + $0x8] sm:$0xff] %v4601_v0 }
  0x25   : > { %255 = vst [vmem:[%s4664_s19 + $0x10] sm:$0xff] %v4601_v0 }
  0x26   : > { %256 = vst [vmem:[%s4664_s19 + $0x18] sm:$0xff] %v4601_v0 }
  0x27   : > { %257 = vst [vmem:[%s4664_s19 + $0x20] sm:$0xff] %v4601_v0 }
  0x28   : > { %258 = vst [vmem:[%s4664_s19 + $0x28] sm:$0xff] %v4601_v0 }
  0x29 PF: > { %v3926_v1 = vld [vmem:[%s4659_s15 + $0xe0] sm:$0xf]  ;;  %v4295_v2 = vld [vmem:[%s4659_s15 + $0xec] sm:$0xf0]  ;;  %v4293_v6 = vld [vmem:[%s4659_s15 + $0xe4] sm:$0xf] }
  0x2a   : > { %v4054_v3 = vld [vmem:[%s4659_s15 + $0x1e0] sm:$0xf]  ;;  %v4675_v4 = vor.u32 %v4295_v2, %v3926_v1  ;;  %v4327_v5 = vld [vmem:[%s4659_s15 + $0x1ec] sm:$0xf0]  ;;  %v3928_v7 = vld [vmem:[%s4659_s15 + $0xf0] sm:$0xf0] }
  0x2b   : > { %v4680_v8 = vor.u32 %v4327_v5, %v4054_v3  ;;  %v4682_v9 = vor.u32 %v4293_v6, %v3928_v7  ;;  %v4325_v10 = vld [vmem:[%s4659_s15 + $0x1e4] sm:$0xf]  ;;  %v4056_v11 = vld [vmem:[%s4659_s15 + $0x1f0] sm:$0xf0]  ;;  %v3910_v12 = vld [vmem:[%s4659_s15 + $0xc0] sm:$0xf] }
  0x2c   : > { %739 = vmatpush.bf16.msra.mxu0 %v4675_v4  ;;  %v4688_v13 = vor.u32 %v4325_v10, %v4056_v11  ;;  %v4291_v14 = vld [vmem:[%s4659_s15 + $0xcc] sm:$0xf0]  ;;  %v4038_v15 = vld [vmem:[%s4659_s15 + $0x1c0] sm:$0xf]  ;;  %v4289_v19 = vld [vmem:[%s4659_s15 + $0xc4] sm:$0xf] }
  0x2d   : > { %v4323_v16 = vld [vmem:[%s4659_s15 + $0x1cc] sm:$0xf0]  ;;  %788 = vmatpush.bf16.msra.mxu1 %v4680_v8  ;;  %837 = vmatpush.bf16.msra.mxu2 %v4682_v9  ;;  %v4695_v17 = vor.u32 %v4291_v14, %v3910_v12  ;;  %v3912_v20 = vld [vmem:[%s4659_s15 + $0xd0] sm:$0xf0]  ;;  %v4321_v21 = vld [vmem:[%s4659_s15 + $0x1c4] sm:$0xf] }
  0x2e   : > { %v4697_v18 = vor.u32 %v4323_v16, %v4038_v15  ;;  %886 = vmatpush.bf16.msra.mxu3 %v4688_v13  ;;  %v4703_v22 = vor.u32 %v4289_v19, %v3912_v20  ;;  %v4040_v23 = vld [vmem:[%s4659_s15 + $0x1d0] sm:$0xf0]  ;;  %v3894_v24 = vld [vmem:[%s4659_s15 + $0xa0] sm:$0xf]  ;;  %v4287_v25 = vld [vmem:[%s4659_s15 + $0xac] sm:$0xf0] }
  0x2f   : > { %v4708_v26 = vor.u32 %v4321_v21, %v4040_v23  ;;  %v4022_v27 = vld [vmem:[%s4659_s15 + $0x1a0] sm:$0xf]  ;;  %v4319_v28 = vld [vmem:[%s4659_s15 + $0x1ac] sm:$0xf0]  ;;  %v4285_v29 = vld [vmem:[%s4659_s15 + $0xa4] sm:$0xf]  ;;  %v4714_v30 = vor.u32 %v4287_v25, %v3894_v24 }
  0x30   : > { %740 = vmatpush.bf16.msra.mxu0 %v4695_v17  ;;  %v3896_v31 = vld [vmem:[%s4659_s15 + $0xb0] sm:$0xf0]  ;;  %v4317_v32 = vld [vmem:[%s4659_s15 + $0x1a4] sm:$0xf]  ;;  %v4721_v34 = vor.u32 %v4319_v28, %v4022_v27  ;;  %v3878_v36 = vld [vmem:[%s4659_s15 + $0x80] sm:$0xf] }
  0x31   : > { %v4024_v33 = vld [vmem:[%s4659_s15 + $0x1b0] sm:$0xf0]  ;;  %789 = vmatpush.bf16.msra.mxu1 %v4697_v18  ;;  %838 = vmatpush.bf16.msra.mxu2 %v4703_v22  ;;  %v4723_v35 = vor.u32 %v4285_v29, %v3896_v31  ;;  %v4283_v37 = vld [vmem:[%s4659_s15 + $0x8c] sm:$0xf0]  ;;  %v4006_v38 = vld [vmem:[%s4659_s15 + $0x180] sm:$0xf] }
  0x32   : > { %887 = vmatpush.bf16.msra.mxu3 %v4708_v26  ;;  %v4729_v39 = vor.u32 %v4317_v32, %v4024_v33  ;;  %v4315_v40 = vld [vmem:[%s4659_s15 + $0x18c] sm:$0xf0]  ;;  %v4281_v41 = vld [vmem:[%s4659_s15 + $0x84] sm:$0xf]  ;;  %v3880_v42 = vld [vmem:[%s4659_s15 + $0x90] sm:$0xf0]  ;;  %v4737_v45 = vor.u32 %v4283_v37, %v3878_v36 }
  0x33   : > { %v4313_v43 = vld [vmem:[%s4659_s15 + $0x184] sm:$0xf]  ;;  %v4008_v44 = vld [vmem:[%s4659_s15 + $0x190] sm:$0xf0]  ;;  %v4741_v46 = vor.u32 %v4315_v40, %v4006_v38  ;;  %v4743_v47 = vor.u32 %v4281_v41, %v3880_v42  ;;  %v3862_v48 = vld [vmem:[%s4659_s15 + $0x60] sm:$0xf] }
  0x34   : > { %741 = vmatpush.bf16.msra.mxu0 %v4714_v30  ;;  %v4279_v49 = vld [vmem:[%s4659_s15 + $0x6c] sm:$0xf0]  ;;  %v3990_v50 = vld [vmem:[%s4659_s15 + $0x160] sm:$0xf]  ;;  %v4749_v51 = vor.u32 %v4313_v43, %v4008_v44  ;;  %v4277_v53 = vld [vmem:[%s4659_s15 + $0x64] sm:$0xf] }
  0x35   : > { %790 = vmatpush.bf16.msra.mxu1 %v4721_v34  ;;  %839 = vmatpush.bf16.msra.mxu2 %v4723_v35  ;;  %v4311_v52 = vld [vmem:[%s4659_s15 + $0x16c] sm:$0xf0]  ;;  %v3864_v54 = vld [vmem:[%s4659_s15 + $0x70] sm:$0xf0]  ;;  %v4309_v55 = vld [vmem:[%s4659_s15 + $0x164] sm:$0xf]  ;;  %v4757_v57 = vor.u32 %v4279_v49, %v3862_v48 }
  0x36   : > { %888 = vmatpush.bf16.msra.mxu3 %v4729_v39  ;;  %v3992_v56 = vld [vmem:[%s4659_s15 + $0x170] sm:$0xf0]  ;;  %v4761_v58 = vor.u32 %v4311_v52, %v3990_v50  ;;  %v4763_v59 = vor.u32 %v4277_v53, %v3864_v54  ;;  %v3846_v60 = vld [vmem:[%s4659_s15 + $0x40] sm:$0xf]  ;;  %v4275_v61 = vld [vmem:[%s4659_s15 + $0x4c] sm:$0xf0] }
  0x37   : > { %v3974_v62 = vld [vmem:[%s4659_s15 + $0x140] sm:$0xf]  ;;  %v4769_v63 = vor.u32 %v4309_v55, %v3992_v56  ;;  %v4307_v0 = vld [vmem:[%s4659_s15 + $0x14c] sm:$0xf0]  ;;  %v4273_v1 = vld [vmem:[%s4659_s15 + $0x44] sm:$0xf]  ;;  %v4777_v6 = vor.u32 %v4275_v61, %v3846_v60 }
  0x38   : > { %742 = vmatpush.bf16.msra.mxu0 %v4737_v45  ;;  %v3848_v2 = vld [vmem:[%s4659_s15 + $0x50] sm:$0xf0]  ;;  %v4305_v3 = vld [vmem:[%s4659_s15 + $0x144] sm:$0xf]  ;;  %v4781_v7 = vor.u32 %v4307_v0, %v3974_v62  ;;  %v3830_v11 = vld [vmem:[%s4659_s15 + $0x20] sm:$0xf] }
  0x39   : > { %791 = vmatpush.bf16.msra.mxu1 %v4741_v46  ;;  %840 = vmatpush.bf16.msra.mxu2 %v4743_v47  ;;  %v3976_v5 = vld [vmem:[%s4659_s15 + $0x150] sm:$0xf0]  ;;  %v4783_v10 = vor.u32 %v4273_v1, %v3848_v2  ;;  %v4271_v12 = vld [vmem:[%s4659_s15 + $0x2c] sm:$0xf0]  ;;  %v3958_v14 = vld [vmem:[%s4659_s15 + $0x120] sm:$0xf] }
  0x3a   : > { %889 = vmatpush.bf16.msra.mxu3 %v4749_v51  ;;  %v4789_v15 = vor.u32 %v4305_v3, %v3976_v5  ;;  %v4303_v16 = vld [vmem:[%s4659_s15 + $0x12c] sm:$0xf0]  ;;  %v4269_v19 = vld [vmem:[%s4659_s15 + $0x24] sm:$0xf]  ;;  %v3832_v20 = vld [vmem:[%s4659_s15 + $0x30] sm:$0xf0]  ;;  %v4797_v24 = vor.u32 %v4271_v12, %v3830_v11 }
  0x3b   : > { %v4301_v21 = vld [vmem:[%s4659_s15 + $0x124] sm:$0xf]  ;;  %v3960_v23 = vld [vmem:[%s4659_s15 + $0x130] sm:$0xf0]  ;;  %v3814_v25 = vld [vmem:[%s4659_s15] sm:$0xf]  ;;  %v4803_v28 = vor.u32 %v4303_v16, %v3958_v14  ;;  %v4805_v29 = vor.u32 %v4269_v19, %v3832_v20 }
  0x3c   : > { %743 = vmatpush.bf16.msra.mxu0 %v4757_v57  ;;  %v4267_v27 = vld [vmem:[%s4659_s15 + $0xc] sm:$0xf0]  ;;  %v3942_v31 = vld [vmem:[%s4659_s15 + $0x100] sm:$0xf]  ;;  %v4265_v33 = vld [vmem:[%s4659_s15 + $0x4] sm:$0xf]  ;;  %v4811_v36 = vor.u32 %v4301_v21, %v3960_v23 }
  0x3d   : > { %792 = vmatpush.bf16.msra.mxu1 %v4761_v58  ;;  %841 = vmatpush.bf16.msra.mxu2 %v4763_v59  ;;  %v4299_v32 = vld [vmem:[%s4659_s15 + $0x10c] sm:$0xf0]  ;;  %v3816_v37 = vld [vmem:[%s4659_s15 + $0x10] sm:$0xf0]  ;;  %v4297_v38 = vld [vmem:[%s4659_s15 + $0x104] sm:$0xf]  ;;  %v4820_v44 = vor.u32 %v4267_v27, %v3814_v25 }
  0x3e   : > { %890 = vmatpush.bf16.msra.mxu3 %v4769_v63  ;;  %v3944_v40 = vld [vmem:[%s4659_s15 + $0x110] sm:$0xf0]  ;;  %v3750_v41 = vld [vmem:[%s4649_s8] sm:$0xf]  ;;  %v4294_v42 = vld [vmem:[%s4659_s15 + $0xec] sm:$0xf]  ;;  %v4827_v52 = vor.u32 %v4299_v32, %v3942_v31  ;;  %v4829_v53 = vor.u32 %v4265_v33, %v3816_v37 }
  0x3f   : > { %v3936_v43 = vld [vmem:[%s4659_s15 + $0xf8] sm:$0xf0]  ;;  %v4330_v48 = vld [vmem:[%s4649_s8 + $0x4] sm:$0xf0]  ;;  %v4326_v49 = vld [vmem:[%s4659_s15 + $0x1ec] sm:$0xf]  ;;  %v4834_v56 = vor.u32 %v4297_v38, %v3944_v40 }
  0x40   : > { %744 = vmatpush.bf16.msra.mxu0 %v4777_v6  ;;  %v4064_v50 = vld [vmem:[%s4659_s15 + $0x1f8] sm:$0xf0]  ;;  %v4329_v54 = vld [vmem:[%s4649_s8 + $0x4] sm:$0xf]  ;;  %v3752_v55 = vld [vmem:[%s4649_s8 + $0x8] sm:$0xf0]  ;;  %v4836_v60 = vor.u32 %v4294_v42, %v3936_v43  ;;  %v4841_v1 = vor.u32 %v4330_v48, %v3750_v41 }
  0x41   : > { %793 = vmatpush.bf16.msra.mxu1 %v4781_v7  ;;  %842 = vmatpush.bf16.msra.mxu2 %v4783_v10  ;;  %v3934_v61 = vld [vmem:[%s4659_s15 + $0xe8] sm:$0xf]  ;;  %v4296_v62 = vld [vmem:[%s4659_s15 + $0xf4] sm:$0xf0]  ;;  %v4843_v2 = vor.u32 %v4326_v49, %v4064_v50  ;;  %v4290_v5 = vld [vmem:[%s4659_s15 + $0xcc] sm:$0xf]  ;;  %v4849_v12 = vor.u32 %v4329_v54, %v3752_v55 }
  0x42   : > { %891 = vmatpush.bf16.msra.mxu3 %v4789_v15  ;;  %v4062_v0 = vld [vmem:[%s4659_s15 + $0x1e8] sm:$0xf]  ;;  %v4328_v3 = vld [vmem:[%s4659_s15 + $0x1f4] sm:$0xf0]  ;;  %v3920_v11 = vld [vmem:[%s4659_s15 + $0xd8] sm:$0xf0]  ;;  %v4855_v19 = vor.u32 %v4296_v62, %v3934_v61 }
  0x43   : > { %v4322_v14 = vld [vmem:[%s4659_s15 + $0x1cc] sm:$0xf]  ;;  %v4048_v16 = vld [vmem:[%s4659_s15 + $0x1d8] sm:$0xf0]  ;;  %v4859_v20 = vor.u32 %v4328_v3, %v4062_v0  ;;  %v4861_v21 = vor.u32 %v4290_v5, %v3920_v11  ;;  %v3918_v23 = vld [vmem:[%s4659_s15 + $0xc8] sm:$0xf] }
  0x44   : > { %745 = vmatpush.bf16.msra.mxu0 %v4797_v24  ;;  %v4292_v25 = vld [vmem:[%s4659_s15 + $0xd4] sm:$0xf0]  ;;  %v4867_v27 = vor.u32 %v4322_v14, %v4048_v16  ;;  %v4046_v31 = vld [vmem:[%s4659_s15 + $0x1c8] sm:$0xf]  ;;  %v4286_v37 = vld [vmem:[%s4659_s15 + $0xac] sm:$0xf] }
  0x45   : > { %794 = vmatpush.bf16.msra.mxu1 %v4803_v28  ;;  %843 = vmatpush.bf16.msra.mxu2 %v4805_v29  ;;  %v4324_v32 = vld [vmem:[%s4659_s15 + $0x1d4] sm:$0xf0]  ;;  %v4875_v33 = vor.u32 %v4292_v25, %v3918_v23  ;;  %v3904_v38 = vld [vmem:[%s4659_s15 + $0xb8] sm:$0xf0]  ;;  %v4318_v40 = vld [vmem:[%s4659_s15 + $0x1ac] sm:$0xf] }
  0x46   : > { %892 = vmatpush.bf16.msra.mxu3 %v4811_v36  ;;  %v4882_v41 = vor.u32 %v4324_v32, %v4046_v31  ;;  %v4884_v42 = vor.u32 %v4286_v37, %v3904_v38  ;;  %v4032_v43 = vld [vmem:[%s4659_s15 + $0x1b8] sm:$0xf0]  ;;  %v3902_v48 = vld [vmem:[%s4659_s15 + $0xa8] sm:$0xf]  ;;  %v4288_v49 = vld [vmem:[%s4659_s15 + $0xb4] sm:$0xf0] }
  0x47   : > { %v4890_v50 = vor.u32 %v4318_v40, %v4032_v43  ;;  %v4030_v54 = vld [vmem:[%s4659_s15 + $0x1a8] sm:$0xf]  ;;  %v4320_v55 = vld [vmem:[%s4659_s15 + $0x1b4] sm:$0xf0]  ;;  %v4895_v61 = vor.u32 %v4288_v49, %v3902_v48  ;;  %v3758_v0 = vld [vmem:[%s4649_s8 + $0x10] sm:$0xf] }
  0x48   : > { %746 = vmatpush.bf16.msra.mxu0 %v4820_v44  ;;  %v4899_v62 = vor.u32 %v4320_v55, %v4030_v54  ;;  %v4332_v3 = vld [vmem:[%s4649_s8 + $0x14] sm:$0xf0]  ;;  %v4331_v5 = vld [vmem:[%s4649_s8 + $0x14] sm:$0xf]  ;;  %v3760_v11 = vld [vmem:[%s4649_s8 + $0x18] sm:$0xf0] }
  0x49   : > { %795 = vmatpush.bf16.msra.mxu1 %v4827_v52  ;;  %844 = vmatpush.bf16.msra.mxu2 %v4829_v53  ;;  %v4908_v14 = vor.u32 %v4332_v3, %v3758_v0  ;;  %v4910_v16 = vor.u32 %v4331_v5, %v3760_v11  ;;  %v4282_v23 = vld [vmem:[%s4659_s15 + $0x8c] sm:$0xf]  ;;  %v3888_v25 = vld [vmem:[%s4659_s15 + $0x98] sm:$0xf0]  ;;  %v3886_v38 = vld [vmem:[%s4659_s15 + $0x88] sm:$0xf] }
  0x4a   : > { %893 = vmatpush.bf16.msra.mxu3 %v4834_v56  ;;  %v4314_v31 = vld [vmem:[%s4659_s15 + $0x18c] sm:$0xf]  ;;  %v4919_v32 = vor.u32 %v4282_v23, %v3888_v25  ;;  %v4016_v37 = vld [vmem:[%s4659_s15 + $0x198] sm:$0xf0]  ;;  %v4284_v40 = vld [vmem:[%s4659_s15 + $0x94] sm:$0xf0] }
  0x4b   : > { %747 = vmatmul.bf16.vlgmr.msra.gmra.mxu0 %v4841_v1  ;;  %v4924_v43 = vor.u32 %v4314_v31, %v4016_v37  ;;  %v4926_v48 = vor.u32 %v4284_v40, %v3886_v38  ;;  %v4014_v49 = vld [vmem:[%s4659_s15 + $0x188] sm:$0xf]  ;;  %v4316_v54 = vld [vmem:[%s4659_s15 + $0x194] sm:$0xf0]  ;;  %v3766_v0 = vld [vmem:[%s4649_s8 + $0x20] sm:$0xf] }
  0x4c   : > { %796 = vmatmul.bf16.vlgmr.msra.gmra.mxu1 %v4849_v12  ;;  %845 = vmatmul.bf16.vlgmr.msra.gmra.mxu2 %v4841_v1  ;;  %v4931_v55 = vor.u32 %v4316_v54, %v4014_v49  ;;  %v4334_v3 = vld [vmem:[%s4649_s8 + $0x24] sm:$0xf0]  ;;  %v4333_v5 = vld [vmem:[%s4649_s8 + $0x24] sm:$0xf]  ;;  %v3768_v11 = vld [vmem:[%s4649_s8 + $0x28] sm:$0xf0] }
  0x4d   : > { %1033 = vmatpush.bf16.msrb.mxu2 %v4836_v60  ;;  %894 = vmatmul.bf16.vlgmr.msra.gmra.mxu3 %v4849_v12  ;;  %v4940_v23 = vor.u32 %v4334_v3, %v3766_v0  ;;  %v4942_v25 = vor.u32 %v4333_v5, %v3768_v11  ;;  %v4278_v31 = vld [vmem:[%s4659_s15 + $0x6c] sm:$0xf]  ;;  %v3872_v37 = vld [vmem:[%s4659_s15 + $0x78] sm:$0xf0]  ;;  %v3870_v54 = vld [vmem:[%s4659_s15 + $0x68] sm:$0xf] }
  0x4e   : > { %1082 = vmatpush.bf16.msrb.mxu3 %v4843_v2  ;;  %935 = vmatpush.bf16.msrb.mxu0 %v4855_v19  ;;  %v4310_v38 = vld [vmem:[%s4659_s15 + $0x16c] sm:$0xf]  ;;  %v4951_v40 = vor.u32 %v4278_v31, %v3872_v37  ;;  %v4000_v49 = vld [vmem:[%s4659_s15 + $0x178] sm:$0xf0]  ;;  %v4280_v0 = vld [vmem:[%s4659_s15 + $0x74] sm:$0xf0] }
  0x4f   : > { %984 = vmatpush.bf16.msrb.mxu1 %v4859_v20  ;;  %7584 = vst [vmem:[#allocation8_spill] sm:$0xff] %v4940_v23  ;;  %v4956_v3 = vor.u32 %v4310_v38, %v4000_v49  ;;  %v4958_v5 = vor.u32 %v4280_v0, %v3870_v54  ;;  %v3998_v11 = vld [vmem:[%s4659_s15 + $0x168] sm:$0xf]  ;;  %v3774_v31 = vld [vmem:[%s4649_s8 + $0x30] sm:$0xf] }
  0x50   : > { %7585 = vst [vmem:[#allocation9_spill] sm:$0xff] %v4942_v25  ;;  %v4336_v37 = vld [vmem:[%s4649_s8 + $0x34] sm:$0xf0]  ;;  %v4335_v38 = vld [vmem:[%s4649_s8 + $0x34] sm:$0xf] }
  0x51   : > { %1034 = vmatpush.bf16.msrb.mxu2 %v4861_v21  ;;  %7586 = vst [vmem:[#allocation10_spill] sm:$0xff] %v4951_v40  ;;  %v3776_v49 = vld [vmem:[%s4649_s8 + $0x38] sm:$0xf0]  ;;  %v4972_v54 = vor.u32 %v4336_v37, %v3774_v31  ;;  %v4274_v0 = vld [vmem:[%s4659_s15 + $0x4c] sm:$0xf] }
  0x52   : > { %1083 = vmatpush.bf16.msrb.mxu3 %v4867_v27  ;;  %936 = vmatpush.bf16.msrb.mxu0 %v4875_v33  ;;  %7587 = vst [vmem:[#allocation11_spill] sm:$0xff] %v4956_v3  ;;  %v3984_v31 = vld [vmem:[%s4659_s15 + $0x158] sm:$0xf0]  ;;  %v3854_v37 = vld [vmem:[%s4659_s15 + $0x48] sm:$0xf] }
  0x53   : > { %985 = vmatpush.bf16.msrb.mxu1 %v4882_v41  ;;  %7588 = vst [vmem:[#allocation12_spill] sm:$0xff] %v4958_v5 }
  0x54   : > { %7590 = vst [vmem:[#allocation14_spill] sm:$0xff] %v4972_v54 }
  0x55   : > { %1035 = vmatpush.bf16.msrb.mxu2 %v4884_v42 }
  0x56   : > { %1084 = vmatpush.bf16.msrb.mxu3 %v4890_v50  ;;  %937 = vmatpush.bf16.msrb.mxu0 %v4895_v61 }
  0x57   : > { %986 = vmatpush.bf16.msrb.mxu1 %v4899_v62 }
  0x59   : > { %1036 = vmatpush.bf16.msrb.mxu2 %v4919_v32 }
  0x5a   : > { %1085 = vmatpush.bf16.msrb.mxu3 %v4924_v43  ;;  %938 = vmatpush.bf16.msrb.mxu0 %v4926_v48 }
  0x5b   : > { %752 = vmatmul.bf16.gmra.mxu0 %v4908_v14  ;;  %987 = vmatpush.bf16.msrb.mxu1 %v4931_v55 }
  0x5c   : > { %801 = vmatmul.bf16.gmra.mxu1 %v4910_v16  ;;  %850 = vmatmul.bf16.gmra.mxu2 %v4908_v14 }
  0x5d   : > { %899 = vmatmul.bf16.gmra.mxu3 %v4910_v16  ;;  %1037 = vmatpush.bf16.msrb.mxu2 %v4951_v40  ;;  %v3982_v40 = vld [vmem:[%s4659_s15 + $0x148] sm:$0xf] }
  0x5e   : > { %1086 = vmatpush.bf16.msrb.mxu3 %v4956_v3  ;;  %939 = vmatpush.bf16.msrb.mxu0 %v4958_v5 }
  0x6b   : > { %757 = vmatmul.bf16.gmra.mxu0 %v4940_v23 }
  0x6c   : > { %806 = vmatmul.bf16.gmra.mxu1 %v4942_v25  ;;  %855 = vmatmul.bf16.gmra.mxu2 %v4940_v23  ;;  %v4312_v23 = vld [vmem:[%s4659_s15 + $0x174] sm:$0xf0] }
  0x6d   : > { %904 = vmatmul.bf16.gmra.mxu3 %v4942_v25  ;;  %v4963_v25 = vor.u32 %v4312_v23, %v3998_v11  ;;  %v4974_v23 = vor.u32 %v4335_v38, %v3776_v49  ;;  %v3856_v11 = vld [vmem:[%s4659_s15 + $0x58] sm:$0xf0]  ;;  %v4276_v38 = vld [vmem:[%s4659_s15 + $0x54] sm:$0xf0] }
  0x6e   : > { %v4983_v5 = vor.u32 %v4274_v0, %v3856_v11  ;;  %v4990_v3 = vor.u32 %v4276_v38, %v3854_v37  ;;  %v4338_v0 = vld [vmem:[%s4649_s8 + $0x44] sm:$0xf0]  ;;  %v4337_v11 = vld [vmem:[%s4649_s8 + $0x44] sm:$0xf]  ;;  %v3840_v38 = vld [vmem:[%s4659_s15 + $0x38] sm:$0xf0] }
  0x6f   : > { %7589 = vst [vmem:[#allocation13_spill] sm:$0xff] %v4963_v25  ;;  %988 = vmatpush.bf16.msrb.mxu1 %v4963_v25  ;;  %v4306_v25 = vld [vmem:[%s4659_s15 + $0x14c] sm:$0xf] }
  0x70   : > { %7591 = vst [vmem:[#allocation15_spill] sm:$0xff] %v4974_v23  ;;  %v4988_v49 = vor.u32 %v4306_v25, %v3984_v31  ;;  %1038 = vmatpush.bf16.msrb.mxu2 %v4983_v5  ;;  %940 = vmatpush.bf16.msrb.mxu0 %v4990_v3  ;;  %v3782_v25 = vld [vmem:[%s4649_s8 + $0x40] sm:$0xf]  ;;  %v3784_v31 = vld [vmem:[%s4649_s8 + $0x48] sm:$0xf0] }
  0x71   : > { %7592 = vst [vmem:[#allocation16_spill] sm:$0xff] %v4983_v5  ;;  %v5004_v37 = vor.u32 %v4338_v0, %v3782_v25  ;;  %v3968_v25 = vld [vmem:[%s4659_s15 + $0x138] sm:$0xf0]  ;;  %v3838_v0 = vld [vmem:[%s4659_s15 + $0x28] sm:$0xf] }
  0x72   : > { %7593 = vst [vmem:[#allocation17_spill] sm:$0xff] %v4988_v49  ;;  %1087 = vmatpush.bf16.msrb.mxu3 %v4988_v49  ;;  %v3966_v5 = vld [vmem:[%s4659_s15 + $0x128] sm:$0xf] }
  0x73   : > { %7594 = vst [vmem:[#allocation18_spill] sm:$0xff] %v4990_v3 }
  0x74   : > { %7596 = vst [vmem:[#allocation20_spill] sm:$0xff] %v5004_v37 }
  0x7b   : > { %762 = vmatmul.bf16.gmra.mxu0 %v4972_v54 }
  0x7c   : > { %811 = vmatmul.bf16.gmra.mxu1 %v4974_v23  ;;  %860 = vmatmul.bf16.gmra.mxu2 %v4972_v54  ;;  %v4308_v54 = vld [vmem:[%s4659_s15 + $0x154] sm:$0xf0] }
  0x7d   : > { %909 = vmatmul.bf16.gmra.mxu3 %v4974_v23  ;;  %v4995_v23 = vor.u32 %v4308_v54, %v3982_v40  ;;  %v5006_v40 = vor.u32 %v4337_v11, %v3784_v31  ;;  %v4270_v54 = vld [vmem:[%s4659_s15 + $0x2c] sm:$0xf]  ;;  %v4272_v11 = vld [vmem:[%s4659_s15 + $0x34] sm:$0xf0] }
  0x7e   : > { %v5015_v3 = vor.u32 %v4270_v54, %v3840_v38  ;;  %v5022_v49 = vor.u32 %v4272_v11, %v3838_v0  ;;  %v4340_v54 = vld [vmem:[%s4649_s8 + $0x54] sm:$0xf0]  ;;  %v4339_v38 = vld [vmem:[%s4649_s8 + $0x54] sm:$0xf]  ;;  %v3824_v11 = vld [vmem:[%s4659_s15 + $0x18] sm:$0xf0] }
  0x7f   : > { %7595 = vst [vmem:[#allocation19_spill] sm:$0xff] %v4995_v23  ;;  %989 = vmatpush.bf16.msrb.mxu1 %v4995_v23  ;;  %v4302_v23 = vld [vmem:[%s4659_s15 + $0x12c] sm:$0xf] }
  0x80   : > { %7597 = vst [vmem:[#allocation21_spill] sm:$0xff] %v5006_v40  ;;  %v5020_v31 = vor.u32 %v4302_v23, %v3968_v25  ;;  %1039 = vmatpush.bf16.msrb.mxu2 %v5015_v3  ;;  %941 = vmatpush.bf16.msrb.mxu0 %v5022_v49  ;;  %v3790_v23 = vld [vmem:[%s4649_s8 + $0x50] sm:$0xf]  ;;  %v3792_v25 = vld [vmem:[%s4649_s8 + $0x58] sm:$0xf0] }
  0x81   : > { %7598 = vst [vmem:[#allocation22_spill] sm:$0xff] %v5015_v3  ;;  %v5036_v0 = vor.u32 %v4340_v54, %v3790_v23  ;;  %v3822_v23 = vld [vmem:[%s4659_s15 + $0x8] sm:$0xf]  ;;  %v4268_v54 = vld [vmem:[%s4659_s15 + $0x14] sm:$0xf0] }
  0x82   : > { %7599 = vst [vmem:[#allocation23_spill] sm:$0xff] %v5020_v31  ;;  %1088 = vmatpush.bf16.msrb.mxu3 %v5020_v31  ;;  %v3952_v31 = vld [vmem:[%s4659_s15 + $0x118] sm:$0xf0]  ;;  %v3950_v3 = vld [vmem:[%s4659_s15 + $0x108] sm:$0xf] }
  0x83   : > { %7600 = vst [vmem:[#allocation24_spill] sm:$0xff] %v5022_v49 }
  0x84   : > { %7602 = vst [vmem:[#allocation26_spill] sm:$0xff] %v5036_v0 }
  0x8b   : > { %767 = vmatmul.bf16.gmra.mxu0 %v5004_v37 }
  0x8c   : > { %816 = vmatmul.bf16.gmra.mxu1 %v5006_v40  ;;  %865 = vmatmul.bf16.gmra.mxu2 %v5004_v37  ;;  %v4304_v37 = vld [vmem:[%s4659_s15 + $0x134] sm:$0xf0] }
  0x8d   : > { %914 = vmatmul.bf16.gmra.mxu3 %v5006_v40  ;;  %v5027_v40 = vor.u32 %v4304_v37, %v3966_v5  ;;  %v5038_v5 = vor.u32 %v4339_v38, %v3792_v25  ;;  %v4266_v37 = vld [vmem:[%s4659_s15 + $0xc] sm:$0xf]  ;;  %v5054_v25 = vor.u32 %v4268_v54, %v3822_v23 }
  0x8e   : > { %v5047_v49 = vor.u32 %v4266_v37, %v3824_v11  ;;  %v4341_v37 = vld [vmem:[%s4649_s8 + $0x64] sm:$0xf]  ;;  %v3800_v11 = vld [vmem:[%s4649_s8 + $0x68] sm:$0xf0] }
  0x8f   : > { %7601 = vst [vmem:[#allocation25_spill] sm:$0xff] %v5027_v40  ;;  %990 = vmatpush.bf16.msrb.mxu1 %v5027_v40  ;;  %v4298_v40 = vld [vmem:[%s4659_s15 + $0x10c] sm:$0xf]  ;;  %942 = vmatpush.bf16.msrb.mxu0 %v5054_v25 }
  0x90   : > { %7603 = vst [vmem:[#allocation27_spill] sm:$0xff] %v5038_v5  ;;  %v5052_v38 = vor.u32 %v4298_v40, %v3952_v31  ;;  %1040 = vmatpush.bf16.msrb.mxu2 %v5047_v49  ;;  %v3798_v40 = vld [vmem:[%s4649_s8 + $0x60] sm:$0xf]  ;;  %v4342_v31 = vld [vmem:[%s4649_s8 + $0x64] sm:$0xf0] }
  0x92   : > { %1089 = vmatpush.bf16.msrb.mxu3 %v5052_v38 }
  0x93   : > { %1291 = vmatpush.bf16.msra.mxu0 %v4675_v4  ;;  %v3806_v4 = vld [vmem:[%s4649_s8 + $0x70] sm:$0xf] }
  0x94   : > { %1389 = vmatpush.bf16.msra.mxu2 %v4682_v9  ;;  %v4343_v9 = vld [vmem:[%s4649_s8 + $0x74] sm:$0xf] }
  0x96   : > { %1438 = vmatpush.bf16.msra.mxu3 %v4688_v13  ;;  %v3808_v13 = vld [vmem:[%s4649_s8 + $0x78] sm:$0xf0] }
  0x97   : > { %1292 = vmatpush.bf16.msra.mxu0 %v4695_v17 }
  0x98   : > { %1390 = vmatpush.bf16.msra.mxu2 %v4703_v22 }
  0x9a   : > { %1439 = vmatpush.bf16.msra.mxu3 %v4708_v26 }
  0x9b   : > { %772 = vmatmul.bf16.gmra.mxu0 %v5036_v0 }
  0x9c   : > { %821 = vmatmul.bf16.gmra.mxu1 %v5038_v5  ;;  %870 = vmatmul.bf16.gmra.mxu2 %v5036_v0  ;;  %v4300_v0 = vld [vmem:[%s4659_s15 + $0x114] sm:$0xf0] }
  0x9d   : > { %919 = vmatmul.bf16.gmra.mxu3 %v5038_v5  ;;  %v5059_v5 = vor.u32 %v4300_v0, %v3950_v3  ;;  %v5073_v3 = vor.u32 %v4342_v31, %v3798_v40  ;;  %v5077_v0 = vor.u32 %v4341_v37, %v3800_v11  ;;  %1391 = vmatpush.bf16.msra.mxu2 %v4723_v35  ;;  %v7618_v31 = vld [vmem:[#allocation14_spill] sm:$0xff]  ;;  %v7619_v37 = vld [vmem:[#allocation15_spill] sm:$0xff] }
  0x9e   : > { %1440 = vmatpush.bf16.msra.mxu3 %v4729_v39  ;;  %1293 = vmatpush.bf16.msra.mxu0 %v4714_v30 }
  0x9f   : > { %991 = vmatpush.bf16.msrb.mxu1 %v5059_v5 }
  0xa1   : > { %1392 = vmatpush.bf16.msra.mxu2 %v4743_v47 }
  0xa2   : > { %1441 = vmatpush.bf16.msra.mxu3 %v4749_v51  ;;  %1294 = vmatpush.bf16.msra.mxu0 %v4737_v45 }
  0xa3   : > { %1340 = vmatpush.bf16.msra.mxu1 %v4680_v8  ;;  %v4344_v8 = vld [vmem:[%s4649_s8 + $0x74] sm:$0xf0] }
  0xa4   : > { %v5101_v17 = vor.u32 %v4344_v8, %v3806_v4 }
  0xa5   : > { %1393 = vmatpush.bf16.msra.mxu2 %v4763_v59 }
  0xa6   : > { %1442 = vmatpush.bf16.msra.mxu3 %v4769_v63  ;;  %1295 = vmatpush.bf16.msra.mxu0 %v4757_v57 }
  0xa7   : > { %1341 = vmatpush.bf16.msra.mxu1 %v4697_v18  ;;  %v5104_v18 = vor.u32 %v4343_v9, %v3808_v13 }
  0xa9   : > { %1394 = vmatpush.bf16.msra.mxu2 %v4783_v10  ;;  %v7605_v10 = vld [vmem:[#allocation11_spill] sm:$0xff] }
  0xaa   : > { %1443 = vmatpush.bf16.msra.mxu3 %v4789_v15  ;;  %1296 = vmatpush.bf16.msra.mxu0 %v4777_v6  ;;  %v7606_v15 = vld [vmem:[#allocation12_spill] sm:$0xff] }
  0xab   : > { %777 = vmatmul.bf16.gmra.mxu0 %v5073_v3  ;;  %1342 = vmatpush.bf16.msra.mxu1 %v4721_v34 }
  0xac   : > { %826 = vmatmul.bf16.gmra.mxu1 %v5077_v0  ;;  %875 = vmatmul.bf16.gmra.mxu2 %v5073_v3 }
  0xad   : > { %924 = vmatmul.bf16.gmra.mxu3 %v5077_v0  ;;  %1395 = vmatpush.bf16.msra.mxu2 %v4805_v29 }
  0xae   : > { %1444 = vmatpush.bf16.msra.mxu3 %v4811_v36  ;;  %1297 = vmatpush.bf16.msra.mxu0 %v4797_v24 }
  0xaf   : > { %1343 = vmatpush.bf16.msra.mxu1 %v4741_v46 }
  0xb1   : > { %1396 = vmatpush.bf16.msra.mxu2 %v4829_v53  ;;  %v7608_v53 = vld [vmem:[#allocation16_spill] sm:$0xff] }
  0xb2   : > { %1445 = vmatpush.bf16.msra.mxu3 %v4834_v56  ;;  %1298 = vmatpush.bf16.msra.mxu0 %v4820_v44 }
  0xb3   : > { %1344 = vmatpush.bf16.msra.mxu1 %v4761_v58 }
  0xb7   : > { %1345 = vmatpush.bf16.msra.mxu1 %v4781_v7  ;;  %v7604_v7 = vld [vmem:[#allocation10_spill] sm:$0xff] }
  0xbb   : > { %782 = vmatmul.bf16.gmra.mxu0 %v5101_v17  ;;  %1346 = vmatpush.bf16.msra.mxu1 %v4803_v28  ;;  %v7607_v28 = vld [vmem:[#allocation13_spill] sm:$0xff] }
  0xbc   : > { %831 = vmatmul.bf16.gmra.mxu1 %v5104_v18  ;;  %880 = vmatmul.bf16.gmra.mxu2 %v5101_v17 }
  0xbd   : > { %929 = vmatmul.bf16.gmra.mxu3 %v5104_v18 }
  0xbf   : > { %1347 = vmatpush.bf16.msra.mxu1 %v4827_v52 }
  0xc8   : > { %v748_v22 = vpop.f32.mrf.mxu0 }
  0xc9   : > { %v797_v26 = vpop.f32.mrf.mxu1 }
  0xca   : > { %v5120_v30 = vadd.f32 %v797_v26, %v748_v22 }
  0xcb   : > { %943 = vmatmul.bf16.vlgmr.msrb.gmra.mxu0 %v4841_v1 }
  0xcc   : > { %992 = vmatmul.bf16.vlgmr.msrb.gmra.mxu1 %v4849_v12  ;;  %1041 = vmatmul.bf16.vlgmr.msrb.gmra.mxu2 %v4841_v1  ;;  %v7610_v1 = vld [vmem:[#allocation18_spill] sm:$0xff] }
  0xcd   : > { %1090 = vmatmul.bf16.vlgmr.msrb.gmra.mxu3 %v4849_v12  ;;  %1585 = vmatpush.bf16.msrb.mxu2 %v4836_v60  ;;  %v7609_v60 = vld [vmem:[#allocation17_spill] sm:$0xff]  ;;  %v7612_v12 = vld [vmem:[#allocation22_spill] sm:$0xff] }
  0xce   : > { %1634 = vmatpush.bf16.msrb.mxu3 %v4843_v2  ;;  %1487 = vmatpush.bf16.msrb.mxu0 %v4855_v19  ;;  %v7611_v2 = vld [vmem:[#allocation19_spill] sm:$0xff] }
  0xcf   : > { %v846_v34 = vpop.f32.mrf.mxu2  ;;  %1536 = vmatpush.bf16.msrb.mxu1 %v4859_v20  ;;  %v7613_v19 = vld [vmem:[#allocation23_spill] sm:$0xff]  ;;  %v7614_v20 = vld [vmem:[#allocation24_spill] sm:$0xff] }
  0xd0   : > { %v895_v35 = vpop.f32.mrf.mxu3  ;;  %v750_v39 = vpop.f32.mrf.mxu0 }
  0xd1   : > { %v5130_v45 = vadd.f32 %v895_v35, %v846_v34  ;;  %v799_v46 = vpop.f32.mrf.mxu1  ;;  %1586 = vmatpush.bf16.msrb.mxu2 %v4861_v21 }
  0xd2   : > { %v5133_v47 = vadd.f32 %v799_v46, %v750_v39  ;;  %1635 = vmatpush.bf16.msrb.mxu3 %v4867_v27  ;;  %1488 = vmatpush.bf16.msrb.mxu0 %v4875_v33  ;;  %v7615_v27 = vld [vmem:[#allocation25_spill] sm:$0xff] }
  0xd3   : > { %1537 = vmatpush.bf16.msrb.mxu1 %v4882_v41 }
  0xd5   : > { %1587 = vmatpush.bf16.msrb.mxu2 %v4884_v42 }
  0xd6   : > { %1636 = vmatpush.bf16.msrb.mxu3 %v4890_v50  ;;  %1489 = vmatpush.bf16.msrb.mxu0 %v4895_v61 }
  0xd7   : > { %v848_v51 = vpop.f32.mrf.mxu2  ;;  %1538 = vmatpush.bf16.msrb.mxu1 %v4899_v62  ;;  %v7616_v62 = vld [vmem:[#allocation8_spill] sm:$0xff] }
  0xd8   : > { %v897_v57 = vpop.f32.mrf.mxu3  ;;  %v753_v58 = vpop.f32.mrf.mxu0 }
  0xd9   : > { %v5142_v59 = vadd.f32 %v897_v57, %v848_v51  ;;  %v802_v63 = vpop.f32.mrf.mxu1  ;;  %1588 = vmatpush.bf16.msrb.mxu2 %v4919_v32  ;;  %v7620_v57 = vld [vmem:[#allocation20_spill] sm:$0xff] }
  0xda   : > { %v5145_v6 = vadd.f32 %v802_v63, %v753_v58  ;;  %1637 = vmatpush.bf16.msrb.mxu3 %v4924_v43  ;;  %1490 = vmatpush.bf16.msrb.mxu0 %v4926_v48  ;;  %v7621_v58 = vld [vmem:[#allocation21_spill] sm:$0xff] }
  0xdb   : > { %948 = vmatmul.bf16.gmra.mxu0 %v4908_v14  ;;  %1539 = vmatpush.bf16.msrb.mxu1 %v4931_v55 }
  0xdc   : > { %997 = vmatmul.bf16.gmra.mxu1 %v4910_v16  ;;  %1046 = vmatmul.bf16.gmra.mxu2 %v4908_v14  ;;  %v7617_v14 = vld [vmem:[#allocation9_spill] sm:$0xff] }
  0xdd   : > { %1095 = vmatmul.bf16.gmra.mxu3 %v4910_v16  ;;  %1589 = vmatpush.bf16.msrb.mxu2 %v7604_v7 }
  0xde   : > { %1638 = vmatpush.bf16.msrb.mxu3 %v7605_v10  ;;  %1491 = vmatpush.bf16.msrb.mxu0 %v7606_v15 }
  0xdf   : > { %v851_v24 = vpop.f32.mrf.mxu2  ;;  %1540 = vmatpush.bf16.msrb.mxu1 %v7607_v28 }
  0xe0   : > { %v900_v29 = vpop.f32.mrf.mxu3  ;;  %v755_v36 = vpop.f32.mrf.mxu0 }
  0xe1   : > { %v5158_v44 = vadd.f32 %v900_v29, %v851_v24  ;;  %v804_v52 = vpop.f32.mrf.mxu1  ;;  %1590 = vmatpush.bf16.msrb.mxu2 %v7608_v53 }
  0xe2   : > { %v5161_v56 = vadd.f32 %v804_v52, %v755_v36  ;;  %1639 = vmatpush.bf16.msrb.mxu3 %v7609_v60  ;;  %1492 = vmatpush.bf16.msrb.mxu0 %v7610_v1 }
  0xe3   : > { %1541 = vmatpush.bf16.msrb.mxu1 %v7611_v2  ;;  %v7622_v2 = vld [vmem:[#allocation26_spill] sm:$0xff] }
  0xe5   : > { %1591 = vmatpush.bf16.msrb.mxu2 %v7612_v12  ;;  %v7623_v12 = vld [vmem:[#allocation27_spill] sm:$0xff] }
  0xe6   : > { %1640 = vmatpush.bf16.msrb.mxu3 %v7613_v19  ;;  %1493 = vmatpush.bf16.msrb.mxu0 %v7614_v20 }
  0xe7   : > { %v853_v21 = vpop.f32.mrf.mxu2  ;;  %1542 = vmatpush.bf16.msrb.mxu1 %v7615_v27 }
  0xe8   : > { %v902_v33 = vpop.f32.mrf.mxu3  ;;  %v758_v41 = vpop.f32.mrf.mxu0 }
  0xe9   : > { %v5170_v42 = vadd.f32 %v902_v33, %v853_v21  ;;  %v807_v50 = vpop.f32.mrf.mxu1  ;;  %1592 = vmatpush.bf16.msrb.mxu2 %v5047_v49 }
  0xea   : > { %v5173_v61 = vadd.f32 %v807_v50, %v758_v41  ;;  %1641 = vmatpush.bf16.msrb.mxu3 %v5052_v38  ;;  %1494 = vmatpush.bf16.msrb.mxu0 %v5054_v25 }
  0xeb   : > { %953 = vmatmul.bf16.gmra.mxu0 %v7616_v62  ;;  %1543 = vmatpush.bf16.msrb.mxu1 %v5059_v5 }
  0xec   : > { %1002 = vmatmul.bf16.gmra.mxu1 %v7617_v14  ;;  %1051 = vmatmul.bf16.gmra.mxu2 %v7616_v62 }
  0xed   : > { %1100 = vmatmul.bf16.gmra.mxu3 %v7617_v14 }
  0xef   : > { %v856_v16 = vpop.f32.mrf.mxu2 }
  0xf0   : > { %v905_v32 = vpop.f32.mrf.mxu3  ;;  %v760_v43 = vpop.f32.mrf.mxu0 }
  0xf1   : > { %v5182_v48 = vadd.f32 %v905_v32, %v856_v16  ;;  %v809_v55 = vpop.f32.mrf.mxu1 }
  0xf2   : > { %v5184_v49 = vadd.f32 %v809_v55, %v760_v43 }
  0xf7   : > { %v858_v23 = vpop.f32.mrf.mxu2 }
  0xf8   : > { %v907_v54 = vpop.f32.mrf.mxu3  ;;  %v763_v38 = vpop.f32.mrf.mxu0 }
  0xf9   : > { %v5186_v25 = vadd.f32 %v907_v54, %v858_v23  ;;  %v812_v5 = vpop.f32.mrf.mxu1 }
  0xfa   : > { %v5188_v40 = vadd.f32 %v812_v5, %v763_v38 }
  0xfb   : > { %958 = vmatmul.bf16.gmra.mxu0 %v7618_v31 }
  0xfc   : > { %1007 = vmatmul.bf16.gmra.mxu1 %v7619_v37  ;;  %1056 = vmatmul.bf16.gmra.mxu2 %v7618_v31 }
  0xfd   : > { %1105 = vmatmul.bf16.gmra.mxu3 %v7619_v37 }
  0xff   : > { %v861_v11 = vpop.f32.mrf.mxu2 }
 0x100   : > { %v910_v4 = vpop.f32.mrf.mxu3  ;;  %v765_v8 = vpop.f32.mrf.mxu0 }
 0x101   : > { %v5194_v9 = vadd.f32 %v910_v4, %v861_v11  ;;  %v814_v13 = vpop.f32.mrf.mxu1 }
 0x102   : > { %v5196_v22 = vadd.f32 %v814_v13, %v765_v8 }
 0x107   : > { %v863_v26 = vpop.f32.mrf.mxu2 }
 0x108   : > { %v912_v34 = vpop.f32.mrf.mxu3  ;;  %v768_v35 = vpop.f32.mrf.mxu0 }
 0x109   : > { %v5198_v39 = vadd.f32 %v912_v34, %v863_v26  ;;  %v817_v46 = vpop.f32.mrf.mxu1 }
 0x10a   : > { %v5200_v51 = vadd.f32 %v817_v46, %v768_v35 }
 0x10b   : > { %963 = vmatmul.bf16.gmra.mxu0 %v7620_v57 }
 0x10c   : > { %1012 = vmatmul.bf16.gmra.mxu1 %v7621_v58  ;;  %1061 = vmatmul.bf16.gmra.mxu2 %v7620_v57 }
 0x10d   : > { %1110 = vmatmul.bf16.gmra.mxu3 %v7621_v58  ;;  %v4070_v58 = vld [vmem:[%s4654_s11] sm:$0xf] }
 0x10f   : > { %v866_v63 = vpop.f32.mrf.mxu2 }
 0x110   : > { %v915_v7 = vpop.f32.mrf.mxu3  ;;  %v770_v10 = vpop.f32.mrf.mxu0 }
 0x111   : > { %v5206_v15 = vadd.f32 %v915_v7, %v866_v63  ;;  %v819_v24 = vpop.f32.mrf.mxu1  ;;  %v4346_v63 = vld [vmem:[%s4654_s11 + $0x4] sm:$0xf0]  ;;  %v4345_v7 = vld [vmem:[%s4654_s11 + $0x4] sm:$0xf] }
 0x112   : > { %v5208_v28 = vadd.f32 %v819_v24, %v770_v10  ;;  %v4072_v10 = vld [vmem:[%s4654_s11 + $0x8] sm:$0xf0] }
 0x117   : > { %v868_v29 = vpop.f32.mrf.mxu2 }
 0x118   : > { %v917_v36 = vpop.f32.mrf.mxu3  ;;  %v773_v52 = vpop.f32.mrf.mxu0 }
 0x119   : > { %v5210_v53 = vadd.f32 %v917_v36, %v868_v29  ;;  %v822_v60 = vpop.f32.mrf.mxu1  ;;  %v5250_v29 = vor.u32 %v4346_v63, %v4070_v58 }
 0x11a   : > { %v5212_v1 = vadd.f32 %v822_v60, %v773_v52 }
 0x11b   : > { %968 = vmatmul.bf16.gmra.mxu0 %v7622_v2 }
 0x11c   : > { %1017 = vmatmul.bf16.gmra.mxu1 %v7623_v12  ;;  %1066 = vmatmul.bf16.gmra.mxu2 %v7622_v2 }
 0x11d   : > { %1115 = vmatmul.bf16.gmra.mxu3 %v7623_v12  ;;  %v1760_v12 = vmul.f32 %v5120_v30, %v5120_v30  ;;  %v1761_v30 = vmul.f32 %v5130_v45, %v5130_v45 }
 0x11f   : > { %v871_v19 = vpop.f32.mrf.mxu2 }
 0x120   : > { %v920_v20 = vpop.f32.mrf.mxu3  ;;  %v775_v21 = vpop.f32.mrf.mxu0 }
 0x121   : > { %v5218_v27 = vadd.f32 %v920_v20, %v871_v19  ;;  %v824_v33 = vpop.f32.mrf.mxu1 }
 0x122   : > { %v5220_v41 = vadd.f32 %v824_v33, %v775_v21 }
 0x127   : > { %v873_v50 = vpop.f32.mrf.mxu2 }
 0x128   : > { %v922_v62 = vpop.f32.mrf.mxu3  ;;  %v778_v14 = vpop.f32.mrf.mxu0 }
 0x129   : > { %v5222_v16 = vadd.f32 %v922_v62, %v873_v50  ;;  %v827_v32 = vpop.f32.mrf.mxu1 }
 0x12a   : > { %v5224_v43 = vadd.f32 %v827_v32, %v778_v14 }
 0x12b   : > { %973 = vmatmul.bf16.gmra.mxu0 %v5073_v3 }
 0x12c   : > { %1022 = vmatmul.bf16.gmra.mxu1 %v5077_v0  ;;  %1071 = vmatmul.bf16.gmra.mxu2 %v5073_v3 }
 0x12d   : > { %1120 = vmatmul.bf16.gmra.mxu3 %v5077_v0 }
 0x12f   : > { %v876_v55 = vpop.f32.mrf.mxu2 }
 0x130   : > { %v925_v23 = vpop.f32.mrf.mxu3  ;;  %v780_v54 = vpop.f32.mrf.mxu0 }
 0x131   : > { %v5230_v38 = vadd.f32 %v925_v23, %v876_v55  ;;  %v829_v5 = vpop.f32.mrf.mxu1  ;;  %v1879_v23 = vmul.f32 %v5133_v47, %v5133_v47  ;;  %v1880_v47 = vmul.f32 %v5142_v59, %v5142_v59 }
 0x132   : > { %v5232_v31 = vadd.f32 %v829_v5, %v780_v54  ;;  %v4078_v5 = vld [vmem:[%s4654_s11 + $0x10] sm:$0xf] }
 0x137   : > { %v878_v37 = vpop.f32.mrf.mxu2 }
 0x138   : > { %v927_v11 = vpop.f32.mrf.mxu3  ;;  %v783_v4 = vpop.f32.mrf.mxu0 }
 0x139   : > { %v5234_v8 = vadd.f32 %v927_v11, %v878_v37  ;;  %v832_v3 = vpop.f32.mrf.mxu1  ;;  %v4348_v37 = vld [vmem:[%s4654_s11 + $0x14] sm:$0xf0] }
 0x13a   : > { %v5236_v13 = vadd.f32 %v832_v3, %v783_v4  ;;  %v4347_v4 = vld [vmem:[%s4654_s11 + $0x14] sm:$0xf]  ;;  %v4080_v3 = vld [vmem:[%s4654_s11 + $0x18] sm:$0xf0] }
 0x13b   : > { %978 = vmatmul.bf16.gmra.mxu0 %v5101_v17  ;;  %v5278_v63 = vor.u32 %v4347_v4, %v4080_v3 }
 0x13c   : > { %1027 = vmatmul.bf16.gmra.mxu1 %v5104_v18  ;;  %1076 = vmatmul.bf16.gmra.mxu2 %v5101_v17  ;;  %v5252_v17 = vor.u32 %v4345_v7, %v4072_v10 }
 0x13d   : > { %1125 = vmatmul.bf16.gmra.mxu3 %v5104_v18 }
 0x13f   : > { %v881_v0 = vpop.f32.mrf.mxu2 }
 0x140   : > { %v930_v26 = vpop.f32.mrf.mxu3  ;;  %v785_v34 = vpop.f32.mrf.mxu0 }
 0x141   : > { %v5242_v35 = vadd.f32 %v930_v26, %v881_v0  ;;  %v834_v46 = vpop.f32.mrf.mxu1 }
 0x142   : > { %v5244_v57 = vadd.f32 %v834_v46, %v785_v34  ;;  %v5276_v34 = vor.u32 %v4348_v37, %v4078_v5  ;;  %v4088_v5 = vld [vmem:[%s4654_s11 + $0x28] sm:$0xf0] }
 0x147   : > { %v883_v24 = vpop.f32.mrf.mxu2 }
 0x148   : > { %v932_v36 = vpop.f32.mrf.mxu3  ;;  %v944_v52 = vpop.f32.mrf.mxu0 }
 0x149   : > { %v5254_v18 = vadd.f32 %v932_v36, %v883_v24  ;;  %v993_v60 = vpop.f32.mrf.mxu1  ;;  %v1996_v36 = vmul.f32 %v5145_v6, %v5145_v6 }
 0x14a   : > { %v994_v2 = vadd.f32 %v993_v60, %v944_v52 }
 0x14b   : > { %1299 = vmatmul.bf16.vlgmr.msra.gmra.mxu0 %v5250_v29 }
 0x14c   : > { %v1762_v19 = vmul.f32 %v994_v2, %v994_v2  ;;  %1348 = vmatmul.bf16.vlgmr.msra.gmra.mxu1 %v5252_v17  ;;  %1397 = vmatmul.bf16.vlgmr.msra.gmra.mxu2 %v5250_v29 }
 0x14d   : > { %1446 = vmatmul.bf16.vlgmr.msra.gmra.mxu3 %v5252_v17 }
 0x14e   : > { %v5262_v20 = vadd.f32 %v1762_v19, %v1760_v12 }
 0x14f   : > { %v1042_v21 = vpop.f32.mrf.mxu2 }
 0x150   : > { %v1091_v33 = vpop.f32.mrf.mxu3  ;;  %v946_v50 = vpop.f32.mrf.mxu0 }
 0x151   : > { %v1092_v62 = vadd.f32 %v1091_v33, %v1042_v21  ;;  %v995_v14 = vpop.f32.mrf.mxu1 }
 0x152   : > { %v996_v32 = vadd.f32 %v995_v14, %v946_v50  ;;  %v1997_v50 = vmul.f32 %v5158_v44, %v5158_v44  ;;  %v2113_v14 = vmul.f32 %v5161_v56, %v5161_v56  ;;  %v2114_v56 = vmul.f32 %v5170_v42, %v5170_v42 }
 0x153   : > { %v1763_v55 = vmul.f32 %v1092_v62, %v1092_v62 }
 0x154   : > { %v1881_v54 = vmul.f32 %v996_v32, %v996_v32 }
 0x155   : > { %v5270_v11 = vadd.f32 %v1763_v55, %v1761_v30  ;;  %v4086_v30 = vld [vmem:[%s4654_s11 + $0x20] sm:$0xf]  ;;  %v4350_v55 = vld [vmem:[%s4654_s11 + $0x24] sm:$0xf0] }
 0x156   : > { %v5274_v0 = vadd.f32 %v1881_v54, %v1879_v23  ;;  %v4349_v54 = vld [vmem:[%s4654_s11 + $0x24] sm:$0xf]  ;;  %v5304_v3 = vor.u32 %v4350_v55, %v4086_v30  ;;  %v4351_v55 = vld [vmem:[%s4654_s11 + $0x34] sm:$0xf] }
 0x157   : > { %v1044_v26 = vpop.f32.mrf.mxu2 }
 0x158   : > { %v1093_v46 = vpop.f32.mrf.mxu3  ;;  %v949_v58 = vpop.f32.mrf.mxu0 }
 0x159   : > { %v1094_v45 = vadd.f32 %v1093_v46, %v1044_v26  ;;  %v998_v7 = vpop.f32.mrf.mxu1 }
 0x15a   : > { %v999_v10 = vadd.f32 %v998_v7, %v949_v58  ;;  %v5306_v58 = vor.u32 %v4349_v54, %v4088_v5  ;;  %v4096_v54 = vld [vmem:[%s4654_s11 + $0x38] sm:$0xf0] }
 0x15b   : > { %v1882_v24 = vmul.f32 %v1094_v45, %v1094_v45  ;;  %1304 = vmatmul.bf16.gmra.mxu0 %v5276_v34 }
 0x15c   : > { %v1998_v52 = vmul.f32 %v999_v10, %v999_v10  ;;  %1353 = vmatmul.bf16.gmra.mxu1 %v5278_v63  ;;  %1402 = vmatmul.bf16.gmra.mxu2 %v5276_v34 }
 0x15d   : > { %v5287_v60 = vadd.f32 %v1882_v24, %v1880_v47  ;;  %1451 = vmatmul.bf16.gmra.mxu3 %v5278_v63  ;;  %v2230_v47 = vmul.f32 %v5173_v61, %v5173_v61 }
 0x15e   : > { %v5290_v59 = vadd.f32 %v1998_v52, %v1996_v36 }
 0x15f   : > { %v1047_v2 = vpop.f32.mrf.mxu2 }
 0x160   : > { %v1096_v12 = vpop.f32.mrf.mxu3  ;;  %v951_v19 = vpop.f32.mrf.mxu0 }
 0x161   : > { %v1097_v21 = vadd.f32 %v1096_v12, %v1047_v2  ;;  %v1000_v6 = vpop.f32.mrf.mxu1 }
 0x162   : > { %v1001_v33 = vadd.f32 %v1000_v6, %v951_v19  ;;  %v2231_v6 = vmul.f32 %v5182_v48, %v5182_v48 }
 0x163   : > { %v1999_v62 = vmul.f32 %v1097_v21, %v1097_v21 }
 0x164   : > { %v2115_v32 = vmul.f32 %v1001_v33, %v1001_v33 }
 0x165   : > { %v5298_v23 = vadd.f32 %v1999_v62, %v1997_v50  ;;  %v2347_v50 = vmul.f32 %v5184_v49, %v5184_v49  ;;  %v2348_v49 = vmul.f32 %v5186_v25, %v5186_v25 }
 0x166   : > { %v5302_v37 = vadd.f32 %v2115_v32, %v2113_v14  ;;  %v4094_v14 = vld [vmem:[%s4654_s11 + $0x30] sm:$0xf]  ;;  %v4352_v32 = vld [vmem:[%s4654_s11 + $0x34] sm:$0xf0] }
 0x167   : > { %v1049_v4 = vpop.f32.mrf.mxu2 }
 0x168   : > { %v1098_v26 = vpop.f32.mrf.mxu3  ;;  %v954_v46 = vpop.f32.mrf.mxu0 }
 0x169   : > { %v1099_v44 = vadd.f32 %v1098_v26, %v1049_v4  ;;  %v1003_v45 = vpop.f32.mrf.mxu1  ;;  %v5332_v26 = vor.u32 %v4352_v32, %v4094_v14  ;;  %v4102_v14 = vld [vmem:[%s4654_s11 + $0x40] sm:$0xf]  ;;  %v4354_v32 = vld [vmem:[%s4654_s11 + $0x44] sm:$0xf0] }
 0x16a   : > { %v1004_v7 = vadd.f32 %v1003_v45, %v954_v46  ;;  %v5334_v45 = vor.u32 %v4351_v55, %v4096_v54  ;;  %v4353_v54 = vld [vmem:[%s4654_s11 + $0x44] sm:$0xf] }
 0x16b   : > { %v2116_v10 = vmul.f32 %v1099_v44, %v1099_v44  ;;  %1309 = vmatmul.bf16.gmra.mxu0 %v5304_v3 }
 0x16c   : > { %v2232_v24 = vmul.f32 %v1004_v7, %v1004_v7  ;;  %1358 = vmatmul.bf16.gmra.mxu1 %v5306_v58  ;;  %1407 = vmatmul.bf16.gmra.mxu2 %v5304_v3 }
 0x16d   : > { %v5315_v36 = vadd.f32 %v2116_v10, %v2114_v56  ;;  %1456 = vmatmul.bf16.gmra.mxu3 %v5306_v58 }
 0x16e   : > { %v5318_v42 = vadd.f32 %v2232_v24, %v2230_v47  ;;  %v2464_v47 = vmul.f32 %v5188_v40, %v5188_v40 }
 0x16f   : > { %v1052_v52 = vpop.f32.mrf.mxu2 }
 0x170   : > { %v1101_v2 = vpop.f32.mrf.mxu3  ;;  %v956_v12 = vpop.f32.mrf.mxu0 }
 0x171   : > { %v1102_v19 = vadd.f32 %v1101_v2, %v1052_v52  ;;  %v1005_v61 = vpop.f32.mrf.mxu1 }
 0x172   : > { %v1006_v21 = vadd.f32 %v1005_v61, %v956_v12 }
 0x173   : > { %v2233_v33 = vmul.f32 %v1102_v19, %v1102_v19 }
 0x174   : > { %v2349_v62 = vmul.f32 %v1006_v21, %v1006_v21 }
 0x175   : > { %v5326_v30 = vadd.f32 %v2233_v33, %v2231_v6  ;;  %v2465_v6 = vmul.f32 %v5194_v9, %v5194_v9 }
 0x176   : > { %v5330_v5 = vadd.f32 %v2349_v62, %v2347_v50  ;;  %v2581_v50 = vmul.f32 %v5196_v22, %v5196_v22  ;;  %v2582_v22 = vmul.f32 %v5198_v39, %v5198_v39 }
 0x177   : > { %v1054_v4 = vpop.f32.mrf.mxu2 }
 0x178   : > { %v1103_v46 = vpop.f32.mrf.mxu3  ;;  %v959_v44 = vpop.f32.mrf.mxu0 }
 0x179   : > { %v1104_v48 = vadd.f32 %v1103_v46, %v1054_v4  ;;  %v1008_v7 = vpop.f32.mrf.mxu1  ;;  %v4104_v4 = vld [vmem:[%s4654_s11 + $0x48] sm:$0xf0] }
 0x17a   : > { %v1009_v56 = vadd.f32 %v1008_v7, %v959_v44 }
 0x17b   : > { %v2350_v10 = vmul.f32 %v1104_v48, %v1104_v48  ;;  %1314 = vmatmul.bf16.gmra.mxu0 %v5332_v26  ;;  %v5360_v48 = vor.u32 %v4354_v32, %v4102_v14  ;;  %v2815_v14 = vmul.f32 %v5208_v28, %v5208_v28  ;;  %v2816_v28 = vmul.f32 %v5210_v53, %v5210_v53 }
 0x17c   : > { %v2466_v24 = vmul.f32 %v1009_v56, %v1009_v56  ;;  %1363 = vmatmul.bf16.gmra.mxu1 %v5334_v45  ;;  %1412 = vmatmul.bf16.gmra.mxu2 %v5332_v26 }
 0x17d   : > { %v5343_v52 = vadd.f32 %v2350_v10, %v2348_v49  ;;  %1461 = vmatmul.bf16.gmra.mxu3 %v5334_v45  ;;  %v5362_v49 = vor.u32 %v4353_v54, %v4104_v4  ;;  %v4110_v54 = vld [vmem:[%s4654_s11 + $0x50] sm:$0xf]  ;;  %v4356_v4 = vld [vmem:[%s4654_s11 + $0x54] sm:$0xf0] }
 0x17e   : > { %v5346_v25 = vadd.f32 %v2466_v24, %v2464_v47 }
 0x17f   : > { %v1057_v2 = vpop.f32.mrf.mxu2 }
 0x180   : > { %v1106_v12 = vpop.f32.mrf.mxu3  ;;  %v961_v19 = vpop.f32.mrf.mxu0 }
 0x181   : > { %v1107_v61 = vadd.f32 %v1106_v12, %v1057_v2  ;;  %v1010_v40 = vpop.f32.mrf.mxu1  ;;  %v2698_v2 = vmul.f32 %v5200_v51, %v5200_v51 }
 0x182   : > { %v1011_v21 = vadd.f32 %v1010_v40, %v961_v19 }
 0x183   : > { %v2467_v33 = vmul.f32 %v1107_v61, %v1107_v61 }
 0x184   : > { %v2583_v62 = vmul.f32 %v1011_v21, %v1011_v21 }
 0x185   : > { %v5354_v55 = vadd.f32 %v2467_v33, %v2465_v6 }
 0x186   : > { %v5358_v46 = vadd.f32 %v2583_v62, %v2581_v50  ;;  %v2699_v50 = vmul.f32 %v5206_v15, %v5206_v15 }
 0x187   : > { %v1059_v44 = vpop.f32.mrf.mxu2 }
 0x188   : > { %v1108_v7 = vpop.f32.mrf.mxu3  ;;  %v964_v56 = vpop.f32.mrf.mxu0 }
 0x189   : > { %v1109_v9 = vadd.f32 %v1108_v7, %v1059_v44  ;;  %v1013_v10 = vpop.f32.mrf.mxu1  ;;  %v4355_v7 = vld [vmem:[%s4654_s11 + $0x54] sm:$0xf] }
 0x18a   : > { %v1014_v47 = vadd.f32 %v1013_v10, %v964_v56  ;;  %v4112_v56 = vld [vmem:[%s4654_s11 + $0x58] sm:$0xf0] }
 0x18b   : > { %v2584_v24 = vmul.f32 %v1109_v9, %v1109_v9  ;;  %1319 = vmatmul.bf16.gmra.mxu0 %v5360_v48 }
 0x18c   : > { %v2700_v12 = vmul.f32 %v1014_v47, %v1014_v47  ;;  %1368 = vmatmul.bf16.gmra.mxu1 %v5362_v49  ;;  %1417 = vmatmul.bf16.gmra.mxu2 %v5360_v48  ;;  %v5388_v47 = vor.u32 %v4356_v4, %v4110_v54  ;;  %v2933_v54 = vmul.f32 %v5218_v27, %v5218_v27 }
 0x18d   : > { %v5371_v19 = vadd.f32 %v2584_v24, %v2582_v22  ;;  %1466 = vmatmul.bf16.gmra.mxu3 %v5362_v49 }
 0x18e   : > { %v5374_v39 = vadd.f32 %v2700_v12, %v2698_v2  ;;  %v5390_v2 = vor.u32 %v4355_v7, %v4112_v56  ;;  %v3049_v7 = vmul.f32 %v5220_v41, %v5220_v41  ;;  %v3050_v41 = vmul.f32 %v5222_v16, %v5222_v16 }
 0x18f   : > { %v1062_v61 = vpop.f32.mrf.mxu2 }
 0x190   : > { %v1111_v40 = vpop.f32.mrf.mxu3  ;;  %v966_v21 = vpop.f32.mrf.mxu0 }
 0x191   : > { %v1112_v6 = vadd.f32 %v1111_v40, %v1062_v61  ;;  %v1015_v51 = vpop.f32.mrf.mxu1 }
 0x192   : > { %v1016_v33 = vadd.f32 %v1015_v51, %v966_v21  ;;  %v2932_v21 = vmul.f32 %v5212_v1, %v5212_v1 }
 0x193   : > { %v2701_v62 = vmul.f32 %v1112_v6, %v1112_v6 }
 0x194   : > { %v2817_v32 = vmul.f32 %v1016_v33, %v1016_v33 }
 0x195   : > { %v5382_v44 = vadd.f32 %v2701_v62, %v2699_v50 }
 0x196   : > { %v5386_v9 = vadd.f32 %v2817_v32, %v2815_v14 }
 0x197   : > { %v1064_v10 = vpop.f32.mrf.mxu2 }
 0x198   : > { %v1113_v22 = vpop.f32.mrf.mxu3  ;;  %v969_v24 = vpop.f32.mrf.mxu0 }
 0x199   : > { %v1114_v15 = vadd.f32 %v1113_v22, %v1064_v10  ;;  %v1018_v12 = vpop.f32.mrf.mxu1  ;;  %v4118_v10 = vld [vmem:[%s4654_s11 + $0x60] sm:$0xf]  ;;  %v4358_v22 = vld [vmem:[%s4654_s11 + $0x64] sm:$0xf0] }
 0x19a   : > { %v1019_v61 = vadd.f32 %v1018_v12, %v969_v24  ;;  %v4120_v12 = vld [vmem:[%s4654_s11 + $0x68] sm:$0xf0] }
 0x19b   : > { %v2818_v40 = vmul.f32 %v1114_v15, %v1114_v15  ;;  %1324 = vmatmul.bf16.gmra.mxu0 %v5388_v47  ;;  %v4357_v15 = vld [vmem:[%s4654_s11 + $0x64] sm:$0xf] }
 0x19c   : > { %v2934_v6 = vmul.f32 %v1019_v61, %v1019_v61  ;;  %1373 = vmatmul.bf16.gmra.mxu1 %v5390_v2  ;;  %1422 = vmatmul.bf16.gmra.mxu2 %v5388_v47 }
 0x19d   : > { %v5399_v51 = vadd.f32 %v2818_v40, %v2816_v28  ;;  %1471 = vmatmul.bf16.gmra.mxu3 %v5390_v2  ;;  %v5416_v40 = vor.u32 %v4358_v22, %v4118_v10 }
 0x19e   : > { %v5402_v53 = vadd.f32 %v2934_v6, %v2932_v21 }
 0x19f   : > { %v1067_v33 = vpop.f32.mrf.mxu2  ;;  %7624 = vst [vmem:[#allocation10_spill] sm:$0xff] %v5416_v40 }
 0x1a0   : > { %v1116_v50 = vpop.f32.mrf.mxu3  ;;  %v971_v62 = vpop.f32.mrf.mxu0 }
 0x1a1   : > { %v1117_v14 = vadd.f32 %v1116_v50, %v1067_v33  ;;  %v1020_v1 = vpop.f32.mrf.mxu1  ;;  %v5418_v33 = vor.u32 %v4357_v15, %v4120_v12  ;;  %v3167_v15 = vmul.f32 %v5230_v38, %v5230_v38 }
 0x1a2   : > { %v1021_v32 = vadd.f32 %v1020_v1, %v971_v62  ;;  %v3166_v1 = vmul.f32 %v5224_v43, %v5224_v43 }
 0x1a3   : > { %v2935_v4 = vmul.f32 %v1117_v14, %v1117_v14  ;;  %7625 = vst [vmem:[#allocation11_spill] sm:$0xff] %v5418_v33 }
 0x1a4   : > { %v3051_v56 = vmul.f32 %v1021_v32, %v1021_v32 }
 0x1a5   : > { %v5410_v24 = vadd.f32 %v2935_v4, %v2933_v54 }
 0x1a6   : > { %v5414_v61 = vadd.f32 %v3051_v56, %v3049_v7 }
 0x1a7   : > { %v1069_v28 = vpop.f32.mrf.mxu2 }
 0x1a8   : > { %v1118_v21 = vpop.f32.mrf.mxu3  ;;  %v974_v6 = vpop.f32.mrf.mxu0 }
 0x1a9   : > { %v1119_v27 = vadd.f32 %v1118_v21, %v1069_v28  ;;  %v1023_v50 = vpop.f32.mrf.mxu1  ;;  %v3283_v28 = vmul.f32 %v5232_v31, %v5232_v31  ;;  %v3284_v31 = vmul.f32 %v5234_v8, %v5234_v8 }
 0x1aa   : > { %v1024_v62 = vadd.f32 %v1023_v50, %v974_v6  ;;  %v4126_v6 = vld [vmem:[%s4654_s11 + $0x70] sm:$0xf] }
 0x1ab   : > { %v3052_v14 = vmul.f32 %v1119_v27, %v1119_v27  ;;  %1329 = vmatmul.bf16.gmra.mxu0 %v5416_v40  ;;  %v4360_v27 = vld [vmem:[%s4654_s11 + $0x74] sm:$0xf0] }
 0x1ac   : > { %v3168_v32 = vmul.f32 %v1024_v62, %v1024_v62  ;;  %1378 = vmatmul.bf16.gmra.mxu1 %v5418_v33  ;;  %1427 = vmatmul.bf16.gmra.mxu2 %v5416_v40  ;;  %v4359_v62 = vld [vmem:[%s4654_s11 + $0x74] sm:$0xf] }
 0x1ad   : > { %v5427_v54 = vadd.f32 %v3052_v14, %v3050_v41  ;;  %1476 = vmatmul.bf16.gmra.mxu3 %v5418_v33  ;;  %v4128_v41 = vld [vmem:[%s4654_s11 + $0x78] sm:$0xf0] }
 0x1ae   : > { %v5430_v16 = vadd.f32 %v3168_v32, %v3166_v1  ;;  %v5444_v32 = vor.u32 %v4360_v27, %v4126_v6 }
 0x1af   : > { %v1072_v4 = vpop.f32.mrf.mxu2 }
 0x1b0   : > { %v1121_v7 = vpop.f32.mrf.mxu3  ;;  %v976_v56 = vpop.f32.mrf.mxu0  ;;  %7626 = vst [vmem:[#allocation12_spill] sm:$0xff] %v5444_v32 }
 0x1b1   : > { %v1122_v10 = vadd.f32 %v1121_v7, %v1072_v4  ;;  %v1025_v43 = vpop.f32.mrf.mxu1 }
 0x1b2   : > { %v1026_v22 = vadd.f32 %v1025_v43, %v976_v56  ;;  %v5446_v56 = vor.u32 %v4359_v62, %v4128_v41 }
 0x1b3   : > { %v3169_v12 = vmul.f32 %v1122_v10, %v1122_v10 }
 0x1b4   : > { %v3285_v21 = vmul.f32 %v1026_v22, %v1026_v22  ;;  %7627 = vst [vmem:[#allocation13_spill] sm:$0xff] %v5446_v56 }
 0x1b5   : > { %v5438_v50 = vadd.f32 %v3169_v12, %v3167_v15  ;;  %v3400_v15 = vmul.f32 %v5236_v13, %v5236_v13  ;;  %v3401_v13 = vmul.f32 %v5242_v35, %v5242_v35  ;;  %v5473_v35 = vmax.f32 %v5262_v20, 1e-07 }
 0x1b6   : > { %v5442_v14 = vadd.f32 %v3285_v21, %v3283_v28 }
 0x1b7   : > { %v1074_v1 = vpop.f32.mrf.mxu2  ;;  %7633 = vst [vmem:[#allocation23_spill] sm:$0xff] %v5473_v35  ;;  %4373 = vrcp.f32 %v5473_v35  ;;  %vm1813_vm0 = vweird.f32 %v5473_v35 }
 0x1b8   : > { %v1123_v4 = vpop.f32.mrf.mxu3  ;;  %v979_v7 = vpop.f32.mrf.mxu0 }
 0x1b9   : > { %v1124_v38 = vadd.f32 %v1123_v4, %v1074_v1  ;;  %v1028_v10 = vpop.f32.mrf.mxu1 }
 0x1ba   : > { %v1029_v43 = vadd.f32 %v1028_v10, %v979_v7  ;;  %v3517_v7 = vmul.f32 %v5244_v57, %v5244_v57  ;;  %v5477_v57 = vmax.f32 %v5270_v11, 1e-07 }
 0x1bb   : > { %v3286_v22 = vmul.f32 %v1124_v38, %v1124_v38  ;;  %1334 = vmatmul.bf16.gmra.mxu0 %v5444_v32 }
 0x1bc   : > { %v3402_v12 = vmul.f32 %v1029_v43, %v1029_v43  ;;  %1383 = vmatmul.bf16.gmra.mxu1 %v5446_v56  ;;  %1432 = vmatmul.bf16.gmra.mxu2 %v5444_v32  ;;  %4375 = vrcp.f32 %v5477_v57  ;;  %vm1828_vm3 = vweird.f32 %v5477_v57 }
 0x1bd   : > { %v5455_v28 = vadd.f32 %v3286_v22, %v3284_v31  ;;  %1481 = vmatmul.bf16.gmra.mxu3 %v5446_v56 }
 0x1be   : > { %v5458_v21 = vadd.f32 %v3402_v12, %v3400_v15 }
 0x1bf   : > { %7628 = vst [vmem:[#allocation16_spill] sm:$0xff] %v5455_v28  ;;  %v1077_v6 = vpop.f32.mrf.mxu2 }
 0x1c0   : > { %7629 = vst [vmem:[#allocation17_spill] sm:$0xff] %v5458_v21  ;;  %v1126_v27 = vpop.f32.mrf.mxu3  ;;  %v981_v8 = vpop.f32.mrf.mxu0 }
 0x1c1   : > { %v1127_v62 = vadd.f32 %v1126_v27, %v1077_v6  ;;  %v1030_v41 = vpop.f32.mrf.mxu1  ;;  %v3518_v27 = vmul.f32 %v5254_v18, %v5254_v18 }
 0x1c2   : > { %v1031_v1 = vadd.f32 %v1030_v41, %v981_v8 }
 0x1c3   : > { %v3403_v4 = vmul.f32 %v1127_v62, %v1127_v62  ;;  %v5482_v62 = vmax.f32 %v5274_v0, 1e-07  ;;  %v5494_v0 = vpop.eup %4373 }
 0x1c4   : > { %v3519_v38 = vmul.f32 %v1031_v1, %v1031_v1  ;;  %vm1814_vm1 = vweird.f32 %v5494_v0 }
 0x1c5   : > { %v5464_v10 = vadd.f32 %v3403_v4, %v3401_v13  ;;  %7634 = vst [vmem:[#allocation24_spill] sm:$0xff] %v5482_v62  ;;  %4377 = vrcp.f32 %v5482_v62  ;;  %v5497_v13 = vmax.f32 %v5287_v60, 1e-07  ;;  %v5502_v4 = vmax.f32 %v5290_v59, 1e-07  ;;  %vm5590_vm9 = vmor %vm1813_vm0, %vm1814_vm1 }
 0x1c6   : > { %v5466_v43 = vadd.f32 %v3519_v38, %v3517_v7  ;;  %vm1932_vm5 = vweird.f32 %v5482_v62 }
 0x1c7   : > { %7630 = vst [vmem:[#allocation18_spill] sm:$0xff] %v5464_v10  ;;  %v1079_v31 = vpop.f32.mrf.mxu2  ;;  %4379 = vrcp.f32 %v5497_v13  ;;  %v1951_v10 = vand.u32 2147483647, %v5497_v13  ;;  %v2053_v28 = vand.u32 2147483647, %v5502_v4  ;;  %vm1947_vm12 = vweird.f32 %v5497_v13 }
 0x1c8   : > { %7631 = vst [vmem:[#allocation19_spill] sm:$0xff] %v5466_v43  ;;  %v1128_v22 = vpop.f32.mrf.mxu3  ;;  %v1300_v15 = vpop.f32.mrf.mxu0  ;;  %4381 = vrcp.f32 %v5502_v4  ;;  %vm2049_vm13 = vweird.f32 %v5502_v4 }
 0x1c9   : > { %v1129_v12 = vadd.f32 %v1128_v22, %v1079_v31  ;;  %v1349_v56 = vpop.f32.mrf.mxu1  ;;  %7638 = vst [vmem:[#allocation14_spill] sm:$0xff] %v5497_v13  ;;  %vm5651_vm15 = vcmp.eq.f32.partialorder %v1951_v10, 8.507059e+37  ;;  %vm5655_vm0 = vcmp.eq.f32.partialorder %v2053_v28, 8.507059e+37 }
 0x1ca   : > { %v5468_v6 = vadd.f32 %v1349_v56, %v1300_v15  ;;  %7639 = vst [vmem:[#allocation15_spill] sm:$0xff] %v5502_v4  ;;  %v1809_v15 = vmul.f32 %v5494_v0, %v5473_v35 }
 0x1cb   : > { %v3520_v8 = vmul.f32 %v1129_v12, %v1129_v12  ;;  %1495 = vmatmul.bf16.vlgmr.msrb.gmra.mxu0 %v5250_v29 }
 0x1cc   : > { %7632 = vst [vmem:[#allocation22_spill] sm:$0xff] %v5468_v6  ;;  %1544 = vmatmul.bf16.vlgmr.msrb.gmra.mxu1 %v5252_v17  ;;  %1593 = vmatmul.bf16.vlgmr.msrb.gmra.mxu2 %v5250_v29 }
 0x1cd   : > { %v5484_v56 = vadd.f32 %v3520_v8, %v3518_v27  ;;  %1642 = vmatmul.bf16.vlgmr.msrb.gmra.mxu3 %v5252_v17  ;;  %v5499_v17 = vpop.eup %4375 }
 0x1ce   : > { %v5504_v7 = vpop.eup %4377  ;;  %v1824_v59 = vmul.f32 %v5499_v17, %v5477_v57  ;;  %vm1829_vm7 = vweird.f32 %v5499_v17 }
 0x1cf   : > { %7635 = vst [vmem:[#allocation25_spill] sm:$0xff] %v5484_v56  ;;  %v1398_v18 = vpop.f32.mrf.mxu2  ;;  %v1928_v8 = vmul.f32 %v5504_v7, %v5482_v62  ;;  %v5548_v56 = vmax.f32 %v5315_v36, 1e-07  ;;  %v1938_v36 = vand.u32 2147483648, %v5482_v62  ;;  %vm1933_vm8 = vweird.f32 %v5504_v7  ;;  %vm5605_vm10 = vmor %vm1828_vm3, %vm1829_vm7 }
 0x1d0   : > { %v1447_v20 = vpop.f32.mrf.mxu3  ;;  %v1302_v41 = vpop.f32.mrf.mxu0  ;;  %vm5622_vm11 = vmor %vm1932_vm5, %vm1933_vm8 }
 0x1d1   : > { %v5490_v11 = vadd.f32 %v1447_v20, %v1398_v18  ;;  %v1351_v1 = vpop.f32.mrf.mxu1  ;;  %v5520_v18 = vmax.f32 %v5298_v23, 1e-07  ;;  %v1810_v20 = vsub.f32 1.0, %v1809_v15  ;;  %v1817_v23 = vand.u32 2147483647, %v5473_v35  ;;  %7646 = vst [vmem:[#allocation30_spill] sm:$0xff] %v5548_v56 }
 0x1d2   : > { %v5492_v29 = vadd.f32 %v1351_v1, %v1302_v41  ;;  %v5525_v41 = vmax.f32 %v5302_v37, 1e-07  ;;  %v1819_v1 = vand.u32 2147483648, %v5473_v35  ;;  %v1939_v40 = vor.u32 1.1754944e-38, %v1938_v36 }
 0x1d3   : > { %7636 = vst [vmem:[#allocation8_spill] sm:$0xff] %v5490_v11  ;;  %4383 = vrcp.f32 %v5520_v18  ;;  %v1811_v37 = vmul.f32 %v5494_v0, %v1810_v20  ;;  %vm5551_vm2 = vcmp.eq.f32.partialorder %v1817_v23, 8.507059e+37 }
 0x1d4   : > { %7637 = vst [vmem:[#allocation9_spill] sm:$0xff] %v5492_v29  ;;  %4385 = vrcp.f32 %v5525_v41  ;;  %v1820_v11 = vor.u32 1.1754944e-38, %v1819_v1  ;;  %v5560_v1 = vmax.f32 %v5318_v42, 1e-07  ;;  %vm2166_vm5 = vweird.f32 %v5525_v41 }
 0x1d5   : > { %7642 = vst [vmem:[#allocation26_spill] sm:$0xff] %v5520_v18  ;;  %4387 = vrcp.f32 %v5548_v56 }
 0x1d6   : > { %7643 = vst [vmem:[#allocation27_spill] sm:$0xff] %v5525_v41  ;;  %4389 = vrcp.f32 %v5560_v1 }
 0x1d7   : > { %v1400_v38 = vpop.f32.mrf.mxu2  ;;  %7649 = vst [vmem:[#allocation31_spill] sm:$0xff] %v5560_v1 }
 0x1d8   : > { %v1449_v31 = vpop.f32.mrf.mxu3  ;;  %v1305_v22 = vpop.f32.mrf.mxu0 }
 0x1d9   : > { %v5509_v12 = vadd.f32 %v1449_v31, %v1400_v38  ;;  %v1354_v27 = vpop.f32.mrf.mxu1  ;;  %v1825_v38 = vsub.f32 1.0, %v1824_v59  ;;  %v1929_v31 = vsub.f32 1.0, %v1928_v8 }
 0x1da   : > { %v5512_v60 = vadd.f32 %v1354_v27, %v1305_v22  ;;  %v5529_v22 = vpop.eup %4379 }
 0x1db   : > { %7640 = vst [vmem:[#allocation20_spill] sm:$0xff] %v5509_v12  ;;  %1500 = vmatmul.bf16.gmra.mxu0 %v5276_v34  ;;  %v5532_v32 = vpop.eup %4381  ;;  %v1936_v12 = vand.u32 2147483647, %v5482_v62  ;;  %v1826_v6 = vmul.f32 %v5499_v17, %v1825_v38  ;;  %v1930_v20 = vmul.f32 %v5504_v7, %v1929_v31  ;;  %v1812_v38 = vadd.f32 %v5494_v0, %v1811_v37 }
 0x1dc   : > { %7641 = vst [vmem:[#allocation21_spill] sm:$0xff] %v5512_v60  ;;  %1549 = vmatmul.bf16.gmra.mxu1 %v5278_v63  ;;  %1598 = vmatmul.bf16.gmra.mxu2 %v5276_v34  ;;  %v1834_v60 = vand.u32 2147483648, %v5477_v57  ;;  %vm1948_vm14 = vweird.f32 %v5529_v22  ;;  %vm2050_vm1 = vweird.f32 %v5532_v32  ;;  %v2068_v31 = vand.u32 2147483647, %v5520_v18 }
 0x1dd   : > { %1647 = vmatmul.bf16.gmra.mxu3 %v5278_v63  ;;  %v1832_v63 = vand.u32 2147483647, %v5477_v57  ;;  %vm5570_vm6 = vcmp.eq.f32.partialorder %v1936_v12, 8.507059e+37  ;;  %v1827_v42 = vadd.f32 %v5499_v17, %v1826_v6  ;;  %v1931_v37 = vadd.f32 %v5504_v7, %v1930_v20  ;;  %vm5688_vm3 = vmor %vm1947_vm12, %vm1948_vm14 }
 0x1de   : > { %v1835_v23 = vor.u32 1.1754944e-38, %v1834_v60  ;;  %v5584_v60 = vmax.f32 %v5326_v30, 1e-07  ;;  %v1816_v30 = vsel %vm5590_vm9, %v5494_v0, %v1812_v38 }
 0x1df   : > { %v1403_v27 = vpop.f32.mrf.mxu2  ;;  %vm5565_vm4 = vcmp.eq.f32.partialorder %v1832_v63, 8.507059e+37 }
 0x1e0   : > { %v1452_v34 = vpop.f32.mrf.mxu3  ;;  %v1307_v15 = vpop.f32.mrf.mxu0  ;;  %7654 = vst [vmem:[#allocation32_spill] sm:$0xff] %v5584_v60  ;;  %4391 = vrcp.f32 %v5584_v60 }
 0x1e1   : > { %v5539_v59 = vadd.f32 %v1452_v34, %v1403_v27  ;;  %v1356_v8 = vpop.f32.mrf.mxu1  ;;  %v1943_v34 = vmul.f32 %v5529_v22, %v5497_v13 }
 0x1e2   : > { %v5543_v29 = vadd.f32 %v1356_v8, %v1307_v15  ;;  %v2045_v15 = vmul.f32 %v5532_v32, %v5502_v4 }
 0x1e3   : > { %7644 = vst [vmem:[#allocation28_spill] sm:$0xff] %v5539_v59  ;;  %v1944_v59 = vsub.f32 1.0, %v1943_v34  ;;  %v5643_v34 = vsel %vm5551_vm2, %v1820_v11, %v1816_v30  ;;  %vm2064_vm2 = vweird.f32 %v5520_v18 }
 0x1e4   : > { %7645 = vst [vmem:[#allocation29_spill] sm:$0xff] %v5543_v29  ;;  %v5574_v29 = vpop.eup %4383  ;;  %v2046_v20 = vsub.f32 1.0, %v2045_v15  ;;  %v1953_v15 = vand.u32 2147483648, %v5497_v13  ;;  %v5814_v13 = vmax.f32 %v5371_v19, 1e-07 }
 0x1e5   : > { %v5580_v63 = vpop.eup %4385  ;;  %v2060_v0 = vmul.f32 %v5574_v29, %v5520_v18  ;;  %vm2065_vm7 = vweird.f32 %v5574_v29  ;;  %v2302_v19 = vand.u32 2147483647, %v5584_v60 }
 0x1e6   : > { %v2162_v6 = vmul.f32 %v5580_v63, %v5525_v41  ;;  %vm2167_vm8 = vweird.f32 %v5580_v63  ;;  %7689 = vst [vmem:[#allocation43_spill] sm:$0xff] %v5814_v13 }
 0x1e7   : > { %v1405_v12 = vpop.f32.mrf.mxu2  ;;  %v2061_v11 = vsub.f32 1.0, %v2060_v0  ;;  %vm5770_vm12 = vmor %vm2166_vm5, %vm2167_vm8 }
 0x1e8   : > { %v1454_v43 = vpop.f32.mrf.mxu3  ;;  %v1310_v33 = vpop.f32.mrf.mxu0 }
 0x1e9   : > { %v5599_v21 = vadd.f32 %v1454_v43, %v1405_v12  ;;  %v1359_v35 = vpop.f32.mrf.mxu1  ;;  %v1831_v43 = vsel %vm5605_vm10, %v5499_v17, %v1827_v42  ;;  %v2055_v12 = vand.u32 2147483648, %v5502_v4  ;;  %v2047_v17 = vmul.f32 %v5532_v32, %v2046_v20 }
 0x1ea   : > { %v5613_v38 = vadd.f32 %v1359_v35, %v1310_v33  ;;  %v1935_v33 = vsel %vm5622_vm11, %v5504_v7, %v1931_v37  ;;  %v1945_v35 = vmul.f32 %v5529_v22, %v1944_v59  ;;  %v5637_v42 = vmax.f32 %v5330_v5, 1e-07  ;;  %v5647_v7 = vpop.eup %4387  ;;  %vm5756_vm11 = vmor %vm2064_vm2, %vm2065_vm7 }
 0x1eb   : > { %1505 = vmatmul.bf16.gmra.mxu0 %v5304_v3  ;;  %v1954_v59 = vor.u32 1.1754944e-38, %v1953_v15  ;;  %v5659_v27 = vpop.eup %4389  ;;  %v5662_v37 = vmax.f32 %v5343_v52, 1e-07  ;;  %v5670_v10 = vsel %vm5570_vm6, %v1939_v40, %v1935_v33  ;;  %v2163_v20 = vsub.f32 1.0, %v2162_v6 }
 0x1ec   : > { %7661 = vst [vmem:[#allocation33_spill] sm:$0xff] %v5637_v42  ;;  %1554 = vmatmul.bf16.gmra.mxu1 %v5306_v58  ;;  %1603 = vmatmul.bf16.gmra.mxu2 %v5304_v3  ;;  %v1946_v28 = vadd.f32 %v5529_v22, %v1945_v35  ;;  %v2048_v15 = vadd.f32 %v5532_v32, %v2047_v17  ;;  %v2056_v0 = vor.u32 1.1754944e-38, %v2055_v12  ;;  %4393 = vrcp.f32 %v5637_v42 }
 0x1ed   : > { %1652 = vmatmul.bf16.gmra.mxu3 %v5306_v58  ;;  %7666 = vst [vmem:[#allocation34_spill] sm:$0xff] %v5662_v37  ;;  %v5666_v58 = vsel %vm5565_vm4, %v1835_v23, %v1831_v43  ;;  %v2177_v40 = vmul.f32 %v5647_v7, %v5548_v56  ;;  %v5680_v23 = vpop.eup %4391  ;;  %v2062_v6 = vmul.f32 %v5574_v29, %v2061_v11  ;;  %v2070_v33 = vand.u32 2147483648, %v5520_v18  ;;  %vm5703_vm4 = vmor %vm2049_vm13, %vm2050_vm1 }
 0x1ee   : > { %7667 = vst [vmem:[#allocation35_spill] sm:$0xff] %v5670_v10  ;;  %v2279_v35 = vmul.f32 %v5659_v27, %v5560_v1  ;;  %4395 = vrcp.f32 %v5662_v37  ;;  %v5710_v11 = vmax.f32 %v5346_v25, 1e-07  ;;  %v2170_v4 = vand.u32 2147483647, %v5525_v41 }
 0x1ef   : > { %v1408_v30 = vpop.f32.mrf.mxu2  ;;  %vm5719_vm6 = vcmp.eq.f32.partialorder %v2068_v31, 8.507059e+37  ;;  %v2178_v10 = vsub.f32 1.0, %v2177_v40  ;;  %v2294_v25 = vmul.f32 %v5680_v23, %v5584_v60  ;;  %v2063_v62 = vadd.f32 %v5574_v29, %v2062_v6 }
 0x1f0   : > { %v1457_v52 = vpop.f32.mrf.mxu3  ;;  %v1312_v36 = vpop.f32.mrf.mxu0  ;;  %7672 = vst [vmem:[#allocation36_spill] sm:$0xff] %v5710_v11  ;;  %4397 = vrcp.f32 %v5710_v11  ;;  %vm5741_vm9 = vcmp.eq.f32.partialorder %v2170_v4, 8.507059e+37  ;;  %vm2181_vm10 = vweird.f32 %v5548_v56  ;;  %v2185_v5 = vand.u32 2147483647, %v5548_v56 }
 0x1f1   : > { %v5682_v8 = vadd.f32 %v1457_v52, %v1408_v30  ;;  %v1361_v43 = vpop.f32.mrf.mxu1  ;;  %v2164_v52 = vmul.f32 %v5580_v63, %v2163_v20  ;;  %v2172_v20 = vand.u32 2147483648, %v5525_v41  ;;  %v5750_v3 = vmax.f32 %v5354_v55, 1e-07 }
 0x1f2   : > { %v5697_v17 = vadd.f32 %v1361_v43, %v1312_v36  ;;  %v1950_v36 = vsel %vm5688_vm3, %v5529_v22, %v1946_v28  ;;  %v2052_v43 = vsel %vm5703_vm4, %v5532_v32, %v2048_v15  ;;  %v2071_v22 = vor.u32 1.1754944e-38, %v2070_v33  ;;  %v5728_v12 = vpop.eup %4393 }
 0x1f3   : > { %v2280_v28 = vsub.f32 1.0, %v2279_v35  ;;  %v5732_v32 = vsel %vm5651_vm15, %v1954_v59, %v1950_v36  ;;  %v5736_v15 = vsel %vm5655_vm0, %v2056_v0, %v2052_v43  ;;  %v2165_v31 = vadd.f32 %v5580_v63, %v2164_v52  ;;  %7679 = vst [vmem:[#allocation39_spill] sm:$0xff] %v5750_v3 }
 0x1f4   : > { %7675 = vst [vmem:[#allocation37_spill] sm:$0xff] %v5732_v32  ;;  %v5747_v59 = vpop.eup %4395  ;;  %v2173_v35 = vor.u32 1.1754944e-38, %v2172_v20  ;;  %v2179_v30 = vmul.f32 %v5647_v7, %v2178_v10  ;;  %v2295_v52 = vsub.f32 1.0, %v2294_v25  ;;  %v2067_v55 = vsel %vm5756_vm11, %v5574_v29, %v2063_v62  ;;  %v7794_v32 = vld [vmem:[#allocation20_spill] sm:$0xff] }
 0x1f5   : > { %7676 = vst [vmem:[#allocation38_spill] sm:$0xff] %v5736_v15  ;;  %v2281_v20 = vmul.f32 %v5659_v27, %v2280_v28  ;;  %v2396_v10 = vmul.f32 %v5728_v12, %v5637_v42  ;;  %v2187_v62 = vand.u32 2147483648, %v5548_v56  ;;  %vm2283_vm13 = vweird.f32 %v5560_v1 }
 0x1f6   : > { %v5785_v29 = vmax.f32 %v5358_v46, 1e-07  ;;  %vm2182_vm14 = vweird.f32 %v5647_v7  ;;  %vm5789_vm15 = vcmp.eq.f32.partialorder %v2185_v5, 8.507059e+37  ;;  %4399 = vrcp.f32 %v5750_v3 }
 0x1f7   : > { %v1410_v40 = vpop.f32.mrf.mxu2  ;;  %v5800_v46 = vsel %vm5719_vm6, %v2071_v22, %v2067_v55  ;;  %v2180_v18 = vadd.f32 %v5647_v7, %v2179_v30  ;;  %vm2284_vm0 = vweird.f32 %v5659_v27  ;;  %v2188_v22 = vor.u32 1.1754944e-38, %v2187_v62  ;;  %vm5823_vm1 = vmor %vm2181_vm10, %vm2182_vm14 }
 0x1f8   : > { %v1459_v0 = vpop.f32.mrf.mxu3  ;;  %v1315_v33 = vpop.f32.mrf.mxu0  ;;  %7684 = vst [vmem:[#allocation40_spill] sm:$0xff] %v5785_v29  ;;  %v2287_v4 = vand.u32 2147483647, %v5560_v1  ;;  %v2289_v30 = vand.u32 2147483648, %v5560_v1  ;;  %4401 = vrcp.f32 %v5785_v29  ;;  %vm2298_vm2 = vweird.f32 %v5584_v60  ;;  %vm5836_vm3 = vmor %vm2283_vm13, %vm2284_vm0 }
 0x1f9   : > { %v5761_v36 = vadd.f32 %v1459_v0, %v1410_v40  ;;  %v1364_v43 = vpop.f32.mrf.mxu1  ;;  %v2169_v40 = vsel %vm5770_vm12, %v5580_v63, %v2165_v31  ;;  %v2411_v0 = vmul.f32 %v5747_v59, %v5662_v37  ;;  %7687 = vst [vmem:[#allocation41_spill] sm:$0xff] %v5800_v46  ;;  %v2296_v63 = vmul.f32 %v5680_v23, %v2295_v52  ;;  %v5804_v31 = vpop.eup %4397 }
 0x1fa   : > { %v5777_v25 = vadd.f32 %v1364_v43, %v1315_v33  ;;  %v5809_v5 = vsel %vm5741_vm9, %v2173_v35, %v2169_v40  ;;  %v2282_v33 = vadd.f32 %v5659_v27, %v2281_v20  ;;  %v2184_v55 = vsel %vm5823_vm1, %v5647_v7, %v2180_v18 }
 0x1fb   : > { %1510 = vmatmul.bf16.gmra.mxu0 %v5332_v26  ;;  %7688 = vst [vmem:[#allocation42_spill] sm:$0xff] %v5809_v5  ;;  %v2412_v35 = vsub.f32 1.0, %v2411_v0  ;;  %vm2299_vm4 = vweird.f32 %v5680_v23  ;;  %v2513_v40 = vmul.f32 %v5804_v31, %v5710_v11  ;;  %v2304_v18 = vand.u32 2147483648, %v5584_v60  ;;  %v7780_v5 = vld [vmem:[#allocation22_spill] sm:$0xff] }
 0x1fc   : > { %1559 = vmatmul.bf16.gmra.mxu1 %v5334_v45  ;;  %1608 = vmatmul.bf16.gmra.mxu2 %v5332_v26  ;;  %v2397_v26 = vsub.f32 1.0, %v2396_v10  ;;  %v2297_v10 = vadd.f32 %v5680_v23, %v2296_v63  ;;  %v2286_v7 = vsel %vm5836_vm3, %v5659_v27, %v2282_v33  ;;  %v5851_v1 = vpop.eup %4399  ;;  %4403 = vrcp.f32 %v5814_v13  ;;  %vm5862_vm6 = vmor %vm2298_vm2, %vm2299_vm4 }
 0x1fd   : > { %1657 = vmatmul.bf16.gmra.mxu3 %v5334_v45  ;;  %vm2288_vm5 = vcmp.eq.f32.partialorder %v2287_v4, 8.507059e+37  ;;  %v2290_v56 = vor.u32 1.1754944e-38, %v2289_v30  ;;  %vm5866_vm7 = vcmp.eq.f32.partialorder %v2302_v19, 8.507059e+37  ;;  %v5873_v4 = vmax.f32 %v5374_v39, 1e-07 }
 0x1fe   : > { %v2398_v6 = vmul.f32 %v5728_v12, %v2397_v26  ;;  %v2404_v26 = vand.u32 2147483647, %v5637_v42  ;;  %v2514_v30 = vsub.f32 1.0, %v2513_v40  ;;  %v2305_v19 = vor.u32 1.1754944e-38, %v2304_v18 }
 0x1ff   : > { %v1413_v45 = vpop.f32.mrf.mxu2  ;;  %7699 = vst [vmem:[#allocation45_spill] sm:$0xff] %v5873_v4  ;;  %v5875_v28 = vsel %vm2288_vm5, %v2290_v56, %v2286_v7  ;;  %vm2401_vm8 = vweird.f32 %v5728_v12  ;;  %v5887_v39 = vmax.f32 %v5382_v44, 1e-07  ;;  %vm2400_vm9 = vweird.f32 %v5637_v42 }
 0x200   : > { %v1462_v52 = vpop.f32.mrf.mxu3  ;;  %v1317_v43 = vpop.f32.mrf.mxu0  ;;  %7700 = vst [vmem:[#allocation46_spill] sm:$0xff] %v5875_v28  ;;  %v2406_v56 = vand.u32 2147483648, %v5637_v42  ;;  %vm2415_vm10 = vweird.f32 %v5662_v37  ;;  %vm5896_vm11 = vcmp.eq.f32.partialorder %v2404_v26, 8.507059e+37  ;;  %vm2416_vm12 = vweird.f32 %v5747_v59  ;;  %vm5907_vm13 = vmor %vm2400_vm9, %vm2401_vm8  ;;  %v7762_v28 = vld [vmem:[#allocation10_spill] sm:$0xff] }
 0x201   : > { %v5844_v62 = vadd.f32 %v1462_v52, %v1413_v45  ;;  %v1366_v0 = vpop.f32.mrf.mxu1  ;;  %v5858_v45 = vsel %vm5789_vm15, %v2188_v22, %v2184_v55  ;;  %v2413_v52 = vmul.f32 %v5747_v59, %v2412_v35  ;;  %v2301_v22 = vsel %vm5862_vm6, %v5680_v23, %v2297_v10  ;;  %7701 = vst [vmem:[#allocation47_spill] sm:$0xff] %v5887_v39  ;;  %vm5928_vm14 = vmor %vm2415_vm10, %vm2416_vm12 }
 0x202   : > { %v5854_v63 = vadd.f32 %v1366_v0, %v1317_v43  ;;  %7694 = vst [vmem:[#allocation44_spill] sm:$0xff] %v5858_v45  ;;  %v5880_v43 = vpop.eup %4401  ;;  %v2399_v55 = vadd.f32 %v5728_v12, %v2398_v6  ;;  %v2528_v35 = vmul.f32 %v5851_v1, %v5750_v3  ;;  %v5894_v20 = vsel %vm5866_vm7, %v2305_v19, %v2301_v22 }
 0x203   : > { %7702 = vst [vmem:[#allocation48_spill] sm:$0xff] %v5894_v20  ;;  %v2414_v40 = vadd.f32 %v5747_v59, %v2413_v52  ;;  %v5902_v44 = vpop.eup %4403  ;;  %4405 = vrcp.f32 %v5873_v4  ;;  %v2421_v6 = vand.u32 2147483648, %v5662_v37  ;;  %v2515_v27 = vmul.f32 %v5804_v31, %v2514_v30 }
 0x204   : > { %v2630_v33 = vmul.f32 %v5880_v43, %v5785_v29  ;;  %v2403_v22 = vsel %vm5907_vm13, %v5728_v12, %v2399_v55  ;;  %v2419_v19 = vand.u32 2147483647, %v5662_v37  ;;  %v2529_v42 = vsub.f32 1.0, %v2528_v35 }
 0x205   : > { %4407 = vrcp.f32 %v5887_v39  ;;  %v2407_v12 = vor.u32 1.1754944e-38, %v2406_v56  ;;  %v2418_v55 = vsel %vm5928_vm14, %v5747_v59, %v2414_v40  ;;  %vm2517_vm15 = vweird.f32 %v5710_v11 }
 0x206   : > { %v2645_v35 = vmul.f32 %v5902_v44, %v5814_v13  ;;  %v2516_v18 = vadd.f32 %v5804_v31, %v2515_v27  ;;  %vm2518_vm0 = vweird.f32 %v5804_v31  ;;  %v5946_v56 = vmax.f32 %v5386_v9, 1e-07 }
 0x207   : > { %v1415_v23 = vpop.f32.mrf.mxu2  ;;  %v5951_v59 = vsel %vm5896_vm11, %v2407_v12, %v2403_v22  ;;  %vm2420_vm1 = vcmp.eq.f32.partialorder %v2419_v19, 8.507059e+37  ;;  %v2530_v40 = vmul.f32 %v5851_v1, %v2529_v42  ;;  %vm2532_vm3 = vweird.f32 %v5750_v3  ;;  %vm5968_vm4 = vmor %vm2517_vm15, %vm2518_vm0 }
 0x208   : > { %v1464_v0 = vpop.f32.mrf.mxu3  ;;  %v1320_v7 = vpop.f32.mrf.mxu0  ;;  %7709 = vst [vmem:[#allocation49_spill] sm:$0xff] %v5946_v56  ;;  %v2536_v42 = vand.u32 2147483647, %v5750_v3  ;;  %v2646_v22 = vsub.f32 1.0, %v2645_v35  ;;  %vm2533_vm5 = vweird.f32 %v5851_v1  ;;  %4409 = vrcp.f32 %v5946_v56 }
 0x209   : > { %v5915_v26 = vadd.f32 %v1464_v0, %v1415_v23  ;;  %v1369_v52 = vpop.f32.mrf.mxu1  ;;  %v2521_v23 = vand.u32 2147483647, %v5710_v11  ;;  %v2523_v0 = vand.u32 2147483648, %v5710_v11  ;;  %7710 = vst [vmem:[#allocation50_spill] sm:$0xff] %v5951_v59  ;;  %v5954_v30 = vpop.eup %4405  ;;  %v2531_v35 = vadd.f32 %v5851_v1, %v2530_v40  ;;  %vm6007_vm7 = vmor %vm2532_vm3, %vm2533_vm5 }
 0x20a   : > { %v5922_v20 = vadd.f32 %v1369_v52, %v1320_v7  ;;  %v2422_v7 = vor.u32 1.1754944e-38, %v2421_v6  ;;  %v2631_v52 = vsub.f32 1.0, %v2630_v33  ;;  %v2538_v33 = vand.u32 2147483648, %v5750_v3 }
 0x20b   : > { %1515 = vmatmul.bf16.gmra.mxu0 %v5360_v48  ;;  %vm5958_vm2 = vcmp.eq.f32.partialorder %v2521_v23, 8.507059e+37  ;;  %v2524_v27 = vor.u32 1.1754944e-38, %v2523_v0  ;;  %v5974_v19 = vpop.eup %4407  ;;  %v5989_v37 = vmax.f32 %v5402_v53, 1e-07  ;;  %vm2634_vm6 = vweird.f32 %v5785_v29 }
 0x20c   : > { %1564 = vmatmul.bf16.gmra.mxu1 %v5362_v49  ;;  %1613 = vmatmul.bf16.gmra.mxu2 %v5360_v48  ;;  %v5956_v48 = vsel %vm2420_vm1, %v2422_v7, %v2418_v55  ;;  %v2632_v12 = vmul.f32 %v5880_v43, %v2631_v52  ;;  %v2638_v55 = vand.u32 2147483647, %v5785_v29  ;;  %v2647_v40 = vmul.f32 %v5902_v44, %v2646_v22 }
 0x20d   : > { %1662 = vmatmul.bf16.gmra.mxu3 %v5362_v49  ;;  %7711 = vst [vmem:[#allocation51_spill] sm:$0xff] %v5956_v48  ;;  %v5964_v49 = vmax.f32 %v5399_v51, 1e-07  ;;  %v2520_v51 = vsel %vm5968_vm4, %v5804_v31, %v2516_v18  ;;  %v2747_v48 = vmul.f32 %v5954_v30, %v5873_v4  ;;  %v2640_v18 = vand.u32 2147483648, %v5785_v29 }
 0x20e   : > { %7717 = vst [vmem:[#allocation53_spill] sm:$0xff] %v5989_v37  ;;  %v5998_v52 = vsel %vm5958_vm2, %v2524_v27, %v2520_v51  ;;  %vm6011_vm8 = vcmp.eq.f32.partialorder %v2536_v42, 8.507059e+37  ;;  %v2633_v6 = vadd.f32 %v5880_v43, %v2632_v12  ;;  %vm2635_vm9 = vweird.f32 %v5880_v43  ;;  %v6028_v12 = vpop.eup %4409 }
 0x20f   : > { %7714 = vst [vmem:[#allocation52_spill] sm:$0xff] %v5964_v49  ;;  %v1418_v9 = vpop.f32.mrf.mxu2  ;;  %4411 = vrcp.f32 %v5964_v49  ;;  %v2653_v27 = vand.u32 2147483647, %v5814_v13  ;;  %v2535_v10 = vsel %vm6007_vm7, %v5851_v1, %v2531_v35  ;;  %v2539_v22 = vor.u32 1.1754944e-38, %v2538_v33  ;;  %vm6035_vm12 = vmor %vm2634_vm6, %vm2635_vm9 }
 0x210   : > { %v1467_v23 = vpop.f32.mrf.mxu3  ;;  %v1322_v0 = vpop.f32.mrf.mxu0  ;;  %7718 = vst [vmem:[#allocation54_spill] sm:$0xff] %v5998_v52  ;;  %vm6021_vm10 = vcmp.eq.f32.partialorder %v2638_v55, 8.507059e+37  ;;  %4413 = vrcp.f32 %v5989_v37  ;;  %v2641_v42 = vor.u32 1.1754944e-38, %v2640_v18  ;;  %vm2649_vm11 = vweird.f32 %v5814_v13 }
 0x211   : > { %v5983_v7 = vadd.f32 %v1467_v23, %v1418_v9  ;;  %v1371_v11 = vpop.f32.mrf.mxu1  ;;  %v2762_v9 = vmul.f32 %v5974_v19, %v5887_v39  ;;  %v2655_v51 = vand.u32 2147483648, %v5814_v13  ;;  %v6031_v3 = vmax.f32 %v5410_v24, 1e-07 }
 0x212   : > { %v5991_v31 = vadd.f32 %v1371_v11, %v1322_v0  ;;  %v2748_v0 = vsub.f32 1.0, %v2747_v48  ;;  %v2648_v48 = vadd.f32 %v5902_v44, %v2647_v40  ;;  %vm2650_vm13 = vweird.f32 %v5902_v44 }
 0x213   : > { %7725 = vst [vmem:[#allocation55_spill] sm:$0xff] %v6031_v3  ;;  %v2763_v33 = vsub.f32 1.0, %v2762_v9  ;;  %v6043_v18 = vsel %vm6011_vm8, %v2539_v22, %v2535_v10  ;;  %v2637_v24 = vsel %vm6035_vm12, %v5880_v43, %v2633_v6  ;;  %vm6048_vm14 = vcmp.eq.f32.partialorder %v2653_v27, 8.507059e+37  ;;  %vm6068_vm15 = vmor %vm2649_vm11, %vm2650_vm13 }
 0x214   : > { %7728 = vst [vmem:[#allocation56_spill] sm:$0xff] %v6043_v18  ;;  %v2755_v52 = vand.u32 2147483647, %v5873_v4  ;;  %v6056_v9 = vmax.f32 %v5414_v61, 1e-07  ;;  %v2749_v10 = vmul.f32 %v5954_v30, %v2748_v0  ;;  %v2757_v22 = vand.u32 2147483648, %v5873_v4 }
 0x215   : > { %v6053_v40 = vpop.eup %4411  ;;  %v2656_v6 = vor.u32 1.1754944e-38, %v2655_v51  ;;  %vm2751_vm0 = vweird.f32 %v5873_v4  ;;  %v2864_v61 = vmul.f32 %v6028_v12, %v5946_v56  ;;  %4415 = vrcp.f32 %v6031_v3  ;;  %v7757_v18 = vld [vmem:[#allocation17_spill] sm:$0xff] }
 0x216   : > { %7731 = vst [vmem:[#allocation57_spill] sm:$0xff] %v6056_v9  ;;  %v2652_v27 = vsel %vm6068_vm15, %v5902_v44, %v2648_v48  ;;  %v2764_v0 = vmul.f32 %v5974_v19, %v2763_v33  ;;  %v6088_v51 = vsel %vm6021_vm10, %v2641_v42, %v2637_v24  ;;  %vm6090_vm1 = vcmp.eq.f32.partialorder %v2755_v52, 8.507059e+37 }
 0x217   : > { %v1420_v53 = vpop.f32.mrf.mxu2  ;;  %7734 = vst [vmem:[#allocation58_spill] sm:$0xff] %v6088_v51  ;;  %v2772_v44 = vand.u32 2147483648, %v5887_v39  ;;  %v2879_v48 = vmul.f32 %v6053_v40, %v5964_v49  ;;  %4417 = vrcp.f32 %v6056_v9  ;;  %v2750_v33 = vadd.f32 %v5954_v30, %v2749_v10 }
 0x218   : > { %v1469_v55 = vpop.f32.mrf.mxu3  ;;  %v1325_v35 = vpop.f32.mrf.mxu0  ;;  %vm2752_vm2 = vweird.f32 %v5954_v30  ;;  %v6102_v23 = vmax.f32 %v5427_v54, 1e-07  ;;  %v6106_v52 = vsel %vm6048_vm14, %v2656_v6, %v2652_v27  ;;  %vm2766_vm3 = vweird.f32 %v5887_v39 }
 0x219   : > { %v6058_v59 = vadd.f32 %v1469_v55, %v1420_v53  ;;  %v1374_v11 = vpop.f32.mrf.mxu1  ;;  %v2770_v53 = vand.u32 2147483647, %v5887_v39  ;;  %v6082_v55 = vpop.eup %4413  ;;  %7738 = vst [vmem:[#allocation60_spill] sm:$0xff] %v6106_v52  ;;  %v2865_v42 = vsub.f32 1.0, %v2864_v61  ;;  %vm2767_vm4 = vweird.f32 %v5974_v19  ;;  %vm6122_vm6 = vmor %vm2751_vm0, %vm2752_vm2 }
 0x21a   : > { %v6062_v1 = vadd.f32 %v1374_v11, %v1325_v35  ;;  %7737 = vst [vmem:[#allocation59_spill] sm:$0xff] %v6102_v23  ;;  %v2765_v11 = vadd.f32 %v5974_v19, %v2764_v0  ;;  %v2981_v54 = vmul.f32 %v6082_v55, %v5989_v37  ;;  %v6118_v10 = vmax.f32 %v5430_v16, 1e-07  ;;  %vm6146_vm8 = vmor %vm2766_vm3, %vm2767_vm4 }
 0x21b   : > { %1520 = vmatmul.bf16.gmra.mxu0 %v5388_v47  ;;  %vm6111_vm5 = vcmp.eq.f32.partialorder %v2770_v53, 8.507059e+37  ;;  %v2773_v6 = vor.u32 1.1754944e-38, %v2772_v44  ;;  %vm2868_vm7 = vweird.f32 %v5946_v56  ;;  %v2880_v61 = vsub.f32 1.0, %v2879_v48  ;;  %v6127_v27 = vpop.eup %4415 }
 0x21c   : > { %1569 = vmatmul.bf16.gmra.mxu1 %v5390_v2  ;;  %1618 = vmatmul.bf16.gmra.mxu2 %v5388_v47  ;;  %v2758_v47 = vor.u32 1.1754944e-38, %v2757_v22  ;;  %v2754_v16 = vsel %vm6122_vm6, %v5954_v30, %v2750_v33  ;;  %v2872_v52 = vand.u32 2147483647, %v5946_v56  ;;  %v2874_v4 = vand.u32 2147483648, %v5946_v56 }
 0x21d   : > { %1667 = vmatmul.bf16.gmra.mxu3 %v5390_v2  ;;  %4419 = vrcp.f32 %v6102_v23  ;;  %v6138_v44 = vmax.f32 %v5438_v50, 1e-07  ;;  %v2866_v30 = vmul.f32 %v6028_v12, %v2865_v42  ;;  %v6151_v33 = vpop.eup %4417  ;;  %v2769_v50 = vsel %vm6146_vm8, %v5974_v19, %v2765_v11 }
 0x21e   : > { %4421 = vrcp.f32 %v6118_v10  ;;  %v6163_v43 = vsel %vm6090_vm1, %v2758_v47, %v2754_v16  ;;  %v2881_v42 = vmul.f32 %v6053_v40, %v2880_v61  ;;  %vm2869_vm9 = vweird.f32 %v6028_v12 }
 0x21f   : > { %v1423_v24 = vpop.f32.mrf.mxu2  ;;  %7743 = vst [vmem:[#allocation61_spill] sm:$0xff] %v6138_v44  ;;  %vm6169_vm10 = vcmp.eq.f32.partialorder %v2872_v52, 8.507059e+37  ;;  %v2875_v19 = vor.u32 1.1754944e-38, %v2874_v4  ;;  %v2889_v11 = vand.u32 2147483648, %v5964_v49  ;;  %4423 = vrcp.f32 %v6138_v44  ;;  %vm6203_vm14 = vmor %vm2868_vm7, %vm2869_vm9 }
 0x220   : > { %v1472_v29 = vpop.f32.mrf.mxu3  ;;  %v1327_v22 = vpop.f32.mrf.mxu0  ;;  %7747 = vst [vmem:[#allocation63_spill] sm:$0xff] %v6163_v43  ;;  %v6177_v35 = vsel %vm6111_vm5, %v2773_v6, %v2769_v50  ;;  %v2867_v47 = vadd.f32 %v6028_v12, %v2866_v30  ;;  %vm2883_vm11 = vweird.f32 %v5964_v49  ;;  %v2989_v61 = vand.u32 2147483647, %v5989_v37 }
 0x221   : > { %v6129_v0 = vadd.f32 %v1472_v29, %v1423_v24  ;;  %v1376_v53 = vpop.f32.mrf.mxu1  ;;  %v6154_v24 = vmax.f32 %v5442_v14, 1e-07  ;;  %v2887_v29 = vand.u32 2147483647, %v5964_v49  ;;  %7750 = vst [vmem:[#allocation64_spill] sm:$0xff] %v6177_v35  ;;  %v2882_v48 = vadd.f32 %v6053_v40, %v2881_v42 }
 0x222   : > { %v6140_v13 = vadd.f32 %v1376_v53, %v1327_v22  ;;  %v2982_v22 = vsub.f32 1.0, %v2981_v54  ;;  %v2996_v53 = vmul.f32 %v6127_v27, %v6031_v3  ;;  %vm2884_vm13 = vweird.f32 %v6053_v40 }
 0x223   : > { %7746 = vst [vmem:[#allocation62_spill] sm:$0xff] %v6154_v24  ;;  %4425 = vrcp.f32 %v6154_v24  ;;  %vm6182_vm12 = vcmp.eq.f32.partialorder %v2887_v29, 8.507059e+37  ;;  %v6188_v16 = vpop.eup %4419  ;;  %v3098_v50 = vmul.f32 %v6151_v33, %v6056_v9  ;;  %v7753_v29 = vld [vmem:[#allocation16_spill] sm:$0xff]  ;;  %v2890_v42 = vor.u32 1.1754944e-38, %v2889_v11  ;;  %vm6227_vm0 = vmor %vm2883_vm11, %vm2884_vm13 }
 0x224   : > { %v2983_v4 = vmul.f32 %v6082_v55, %v2982_v22  ;;  %v2997_v30 = vsub.f32 1.0, %v2996_v53  ;;  %v6195_v35 = vmax.f32 %v7753_v29, 1e-07  ;;  %v2991_v53 = vand.u32 2147483648, %v5989_v37  ;;  %v6208_v51 = vpop.eup %4421 }
 0x225   : > { %v6211_v60 = vmax.f32 %v7757_v18, 1e-07  ;;  %vm2985_vm15 = vweird.f32 %v5989_v37  ;;  %vm2986_vm1 = vweird.f32 %v6082_v55  ;;  %v6234_v43 = vpop.eup %4423  ;;  %vm6241_vm2 = vcmp.eq.f32.partialorder %v2989_v61, 8.507059e+37  ;;  %v7769_v61 = vld [vmem:[#allocation19_spill] sm:$0xff] }
 0x226   : > { %7754 = vst [vmem:[#allocation16_spill] sm:$0xff] %v6195_v35  ;;  %v2984_v11 = vadd.f32 %v6082_v55, %v2983_v4  ;;  %v2998_v4 = vmul.f32 %v6127_v27, %v2997_v30  ;;  %4427 = vrcp.f32 %v6195_v35  ;;  %v2992_v45 = vor.u32 1.1754944e-38, %v2991_v53  ;;  %vm6264_vm3 = vmor %vm2985_vm15, %vm2986_vm1 }
 0x227   : > { %v1425_v54 = vpop.f32.mrf.mxu2  ;;  %7758 = vst [vmem:[#allocation17_spill] sm:$0xff] %v6211_v60  ;;  %4429 = vrcp.f32 %v6211_v60  ;;  %vm3000_vm4 = vweird.f32 %v6031_v3  ;;  %v3006_v14 = vand.u32 2147483648, %v6031_v3  ;;  %vm3001_vm6 = vweird.f32 %v6127_v27 }
 0x228   : > { %v1474_v2 = vpop.f32.mrf.mxu3  ;;  %v1330_v6 = vpop.f32.mrf.mxu0  ;;  %v2988_v53 = vsel %vm6264_vm3, %v6082_v55, %v2984_v11  ;;  %v3106_v52 = vand.u32 2147483647, %v6056_v9  ;;  %v3108_v30 = vand.u32 2147483648, %v6056_v9  ;;  %v3215_v11 = vmul.f32 %v6208_v51, %v6118_v10  ;;  %vm6311_vm7 = vmor %vm3000_vm4, %vm3001_vm6 }
 0x229   : > { %v6197_v39 = vadd.f32 %v1474_v2, %v1425_v54  ;;  %v1379_v22 = vpop.f32.mrf.mxu1  ;;  %v2871_v54 = vsel %vm6203_vm14, %v6028_v12, %v2867_v47  ;;  %v7760_v2 = vld [vmem:[#allocation18_spill] sm:$0xff]  ;;  %v3004_v12 = vand.u32 2147483647, %v6031_v3  ;;  %v7765_v47 = vld [vmem:[#allocation11_spill] sm:$0xff]  ;;  %v6246_v49 = vpop.eup %4425  ;;  %vm3102_vm8 = vweird.f32 %v6056_v9 }
 0x22a   : > { %v6213_v29 = vadd.f32 %v1379_v22, %v1330_v6  ;;  %v6220_v56 = vmax.f32 %v7760_v2, 1e-07  ;;  %v2886_v6 = vsel %vm6227_vm0, %v6053_v40, %v2882_v48  ;;  %v3099_v2 = vsub.f32 1.0, %v3098_v50 }
 0x22b   : > { %1525 = vmatmul.bf16.gmra.mxu0 %v7762_v28  ;;  %v3113_v40 = vmul.f32 %v6188_v16, %v6102_v23  ;;  %v6258_v48 = vmax.f32 %v7769_v61, 1e-07  ;;  %v6273_v50 = vsel %vm6182_vm12, %v2890_v42, %v2886_v6  ;;  %vm6278_vm5 = vcmp.eq.f32.partialorder %v3004_v12, 8.507059e+37  ;;  %v7777_v12 = vld [vmem:[#allocation25_spill] sm:$0xff] }
 0x22c   : > { %7759 = vst [vmem:[#allocation65_spill] sm:$0xff] %v6213_v29  ;;  %1574 = vmatmul.bf16.gmra.mxu1 %v7765_v47  ;;  %1623 = vmatmul.bf16.gmra.mxu2 %v7762_v28  ;;  %v6252_v28 = vsel %vm6169_vm10, %v2875_v19, %v2871_v54  ;;  %4431 = vrcp.f32 %v6220_v56  ;;  %v2999_v61 = vadd.f32 %v6127_v27, %v2998_v4  ;;  %vm3103_vm9 = vweird.f32 %v6151_v33 }
 0x22d   : > { %7761 = vst [vmem:[#allocation18_spill] sm:$0xff] %v6220_v56  ;;  %1672 = vmatmul.bf16.gmra.mxu3 %v7765_v47  ;;  %v3100_v37 = vmul.f32 %v6151_v33, %v3099_v2  ;;  %v3114_v55 = vsub.f32 1.0, %v3113_v40  ;;  %4433 = vrcp.f32 %v6258_v48  ;;  %v6297_v2 = vpop.eup %4427  ;;  %v6305_v40 = vsel %vm6241_vm2, %v2992_v45, %v2988_v53  ;;  %vm6347_vm11 = vmor %vm3102_vm8, %vm3103_vm9 }
 0x22e   : > { %7768 = vst [vmem:[#allocation10_spill] sm:$0xff] %v6252_v28  ;;  %v3007_v28 = vor.u32 1.1754944e-38, %v3006_v14  ;;  %v3121_v14 = vand.u32 2147483647, %v6102_v23  ;;  %vm6328_vm10 = vcmp.eq.f32.partialorder %v3106_v52, 8.507059e+37  ;;  %v3123_v9 = vand.u32 2147483648, %v6102_v23 }
 0x22f   : > { %7770 = vst [vmem:[#allocation11_spill] sm:$0xff] %v6258_v48  ;;  %v1428_v19 = vpop.f32.mrf.mxu2  ;;  %v3101_v45 = vadd.f32 %v6151_v33, %v3100_v37  ;;  %v3115_v3 = vmul.f32 %v6188_v16, %v3114_v55  ;;  %v7787_v37 = vld [vmem:[#allocation9_spill] sm:$0xff]  ;;  %vm3117_vm12 = vweird.f32 %v6102_v23  ;;  %v3223_v54 = vand.u32 2147483647, %v6118_v10 }
 0x230   : > { %7773 = vst [vmem:[#allocation19_spill] sm:$0xff] %v6273_v50  ;;  %v1477_v18 = vpop.f32.mrf.mxu3  ;;  %v1332_v47 = vpop.f32.mrf.mxu0  ;;  %v6293_v50 = vmax.f32 %v7777_v12, 1e-07  ;;  %v3109_v12 = vor.u32 1.1754944e-38, %v3108_v30  ;;  %vm6352_vm13 = vcmp.eq.f32.partialorder %v3121_v14, 8.507059e+37  ;;  %vm3118_vm14 = vweird.f32 %v6188_v16 }
 0x231   : > { %v6286_v42 = vadd.f32 %v1477_v18, %v1428_v19  ;;  %v1381_v6 = vpop.f32.mrf.mxu1  ;;  %v6301_v19 = vmul.f32 %v7780_v5, %v7780_v5  ;;  %7781 = vst [vmem:[#allocation22_spill] sm:$0xff] %v6305_v40  ;;  %v3003_v5 = vsel %vm6311_vm7, %v6127_v27, %v2999_v61  ;;  %v3216_v40 = vsub.f32 1.0, %v3215_v11  ;;  %v7786_v18 = vld [vmem:[#allocation8_spill] sm:$0xff]  ;;  %vm6395_vm0 = vmor %vm3117_vm12, %vm3118_vm14 }
 0x232   : > { %7778 = vst [vmem:[#allocation25_spill] sm:$0xff] %v6293_v50  ;;  %v6295_v4 = vadd.f32 %v1381_v6, %v1332_v47  ;;  %v3230_v47 = vmul.f32 %v6234_v43, %v6138_v44  ;;  %v6318_v6 = vpop.eup %4429  ;;  %4435 = vrcp.f32 %v6293_v50  ;;  %v6336_v27 = vmul.f32 %v7786_v18, %v7786_v18 }
 0x233   : > { %7776 = vst [vmem:[#allocation66_spill] sm:$0xff] %v6286_v42  ;;  %v6326_v22 = vpop.eup %4431  ;;  %v6340_v61 = vmul.f32 %v7787_v37, %v7787_v37  ;;  %v3217_v15 = vmul.f32 %v6208_v51, %v3216_v40  ;;  %v6372_v30 = vmul.f32 %v7794_v32, %v7794_v32  ;;  %v3124_v29 = vor.u32 1.1754944e-38, %v3123_v9 }
 0x234   : > { %7779 = vst [vmem:[#allocation67_spill] sm:$0xff] %v6295_v4  ;;  %v6345_v4 = vsel %vm6278_vm5, %v3007_v28, %v3003_v5  ;;  %v3231_v11 = vsub.f32 1.0, %v3230_v47  ;;  %v6356_v18 = vpop.eup %4433  ;;  %v3105_v28 = vsel %vm6347_vm11, %v6151_v33, %v3101_v45  ;;  %v3225_v5 = vand.u32 2147483648, %v6118_v10  ;;  %v7795_v33 = vld [vmem:[#allocation21_spill] sm:$0xff] }
 0x235   : > { %7788 = vst [vmem:[#allocation8_spill] sm:$0xff] %v6345_v4  ;;  %v3332_v4 = vmul.f32 %v6246_v49, %v6154_v24  ;;  %v3116_v47 = vadd.f32 %v6188_v16, %v3115_v3  ;;  %v6376_v45 = vmul.f32 %v7795_v33, %v7795_v33  ;;  %v6383_v3 = vsel %vm6328_vm10, %v3109_v12, %v3105_v28  ;;  %v7800_v33 = vld [vmem:[#allocation13_spill] sm:$0xff] }
 0x236   : > { %7798 = vst [vmem:[#allocation21_spill] sm:$0xff] %v6383_v3  ;;  %vm3219_vm15 = vweird.f32 %v6118_v10  ;;  %v3232_v40 = vmul.f32 %v6234_v43, %v3231_v11  ;;  %v3347_v32 = vmul.f32 %v6297_v2, %v6195_v35  ;;  %vm6399_vm1 = vcmp.eq.f32.partialorder %v3223_v54, 8.507059e+37  ;;  %v7805_v54 = vld [vmem:[#allocation28_spill] sm:$0xff] }
 0x237   : > { %v1430_v52 = vpop.f32.mrf.mxu2  ;;  %v3226_v9 = vor.u32 1.1754944e-38, %v3225_v5  ;;  %v3238_v53 = vand.u32 2147483647, %v6138_v44  ;;  %v3333_v12 = vsub.f32 1.0, %v3332_v4  ;;  %v3120_v11 = vsel %vm6395_vm0, %v6188_v16, %v3116_v47 }
 0x238   : > { %v1479_v37 = vpop.f32.mrf.mxu3  ;;  %v1335_v41 = vpop.f32.mrf.mxu0  ;;  %v3218_v28 = vadd.f32 %v6208_v51, %v3217_v15  ;;  %vm3220_vm2 = vweird.f32 %v6208_v51  ;;  %v6413_v23 = vmul.f32 %v7805_v54, %v7805_v54  ;;  %vm3234_vm3 = vweird.f32 %v6138_v44 }
 0x239   : > { %v6365_v14 = vadd.f32 %v1479_v37, %v1430_v52  ;;  %v1384_v46 = vpop.f32.mrf.mxu1  ;;  %v7797_v52 = vld [vmem:[#allocation12_spill] sm:$0xff]  ;;  %v6389_v37 = vpop.eup %4435  ;;  %v3340_v4 = vand.u32 2147483647, %v6154_v24  ;;  %v3449_v5 = vmul.f32 %v6318_v6, %v6211_v60  ;;  %v3233_v16 = vadd.f32 %v6234_v43, %v3232_v40  ;;  %vm6434_vm5 = vmor %vm3219_vm15, %vm3220_vm2 }
 0x23a   : > { %v6378_v42 = vadd.f32 %v1384_v46, %v1335_v41  ;;  %7799 = vst [vmem:[#allocation12_spill] sm:$0xff] %v6389_v37  ;;  %vm3235_vm4 = vweird.f32 %v6234_v43  ;;  %v3342_v15 = vand.u32 2147483648, %v6154_v24  ;;  %v3348_v47 = vsub.f32 1.0, %v3347_v32  ;;  %v7807_v41 = vld [vmem:[#allocation29_spill] sm:$0xff] }
 0x23b   : > { %7793 = vst [vmem:[#allocation9_spill] sm:$0xff] %v6365_v14  ;;  %1530 = vmatmul.bf16.gmra.mxu0 %v7797_v52  ;;  %v6424_v3 = vmul.f32 %v7807_v41, %v7807_v41  ;;  %v6428_v14 = vsel %vm6352_vm13, %v3124_v29, %v3120_v11  ;;  %vm6438_vm6 = vcmp.eq.f32.partialorder %v3238_v53, 8.507059e+37  ;;  %v3334_v41 = vmul.f32 %v6246_v49, %v3333_v12  ;;  %vm6455_vm8 = vmor %vm3234_vm3, %vm3235_vm4 }
 0x23c   : > { %7796 = vst [vmem:[#allocation20_spill] sm:$0xff] %v6378_v42  ;;  %1579 = vmatmul.bf16.gmra.mxu1 %v7800_v33  ;;  %1628 = vmatmul.bf16.gmra.mxu2 %v7797_v52  ;;  %v3240_v52 = vand.u32 2147483648, %v6138_v44  ;;  %v3222_v29 = vsel %vm6434_vm5, %v6208_v51, %v3218_v28  ;;  %vm3336_vm7 = vweird.f32 %v6154_v24  ;;  %v3355_v12 = vand.u32 2147483647, %v6195_v35 }
 0x23d   : > { %1677 = vmatmul.bf16.gmra.mxu3 %v7800_v33  ;;  %7806 = vst [vmem:[#allocation13_spill] sm:$0xff] %v6413_v23  ;;  %v3237_v51 = vsel %vm6455_vm8, %v6234_v43, %v3233_v16  ;;  %vm6464_vm9 = vcmp.eq.f32.partialorder %v3340_v4, 8.507059e+37  ;;  %v3349_v28 = vmul.f32 %v6297_v2, %v3348_v47  ;;  %vm3337_vm10 = vweird.f32 %v6246_v49 }
 0x23e   : > { %7808 = vst [vmem:[#allocation28_spill] sm:$0xff] %v6424_v3  ;;  %v3241_v55 = vor.u32 1.1754944e-38, %v3240_v52  ;;  %v3335_v52 = vadd.f32 %v6246_v49, %v3334_v41  ;;  %v3464_v40 = vmul.f32 %v6326_v22, %v6220_v56  ;;  %v6477_v43 = vmul.f32 %v5599_v21, %v5599_v21  ;;  %vm6503_vm13 = vmor %vm3336_vm7, %vm3337_vm10 }
 0x23f   : > { %v1433_v33 = vpop.f32.mrf.mxu2  ;;  %v6481_v4 = vmul.f32 %v5613_v38, %v5613_v38  ;;  %v6485_v16 = vsel %vm6399_vm1, %v3226_v9, %v3222_v29  ;;  %vm3351_vm11 = vweird.f32 %v6195_v35  ;;  %vm6492_vm12 = vcmp.eq.f32.partialorder %v3355_v12, 8.507059e+37 }
 0x240   : > { %v1482_v54 = vpop.f32.mrf.mxu3  ;;  %v1337_v42 = vpop.f32.mrf.mxu0  ;;  %7818 = vst [vmem:[#allocation68_spill] sm:$0xff] %v6485_v16  ;;  %v6499_v38 = vmul.f32 %v5682_v8, %v5682_v8  ;;  %v3350_v32 = vadd.f32 %v6297_v2, %v3349_v28  ;;  %vm3352_vm14 = vweird.f32 %v6297_v2  ;;  %v3457_v29 = vand.u32 2147483647, %v6211_v60 }
 0x241   : > { %v6443_v3 = vadd.f32 %v1482_v54, %v1433_v33  ;;  %v1386_v23 = vpop.f32.mrf.mxu1  ;;  %v3357_v33 = vand.u32 2147483648, %v6195_v35  ;;  %v3450_v54 = vsub.f32 1.0, %v3449_v5  ;;  %v3566_v5 = vmul.f32 %v6356_v18, %v6258_v48  ;;  %vm6525_vm0 = vmor %vm3351_vm11, %vm3352_vm14 }
 0x242   : > { %v6449_v11 = vadd.f32 %v1386_v23, %v1337_v42  ;;  %v3343_v42 = vor.u32 1.1754944e-38, %v3342_v15  ;;  %v6490_v15 = vsel %vm6438_vm6, %v3241_v55, %v3237_v51  ;;  %v3339_v8 = vsel %vm6503_vm13, %v6246_v49, %v3335_v52 }
 0x243   : > { %7819 = vst [vmem:[#allocation69_spill] sm:$0xff] %v6490_v15  ;;  %v3358_v21 = vor.u32 1.1754944e-38, %v3357_v33  ;;  %v3451_v41 = vmul.f32 %v6318_v6, %v3450_v54  ;;  %v3459_v12 = vand.u32 2147483648, %v6211_v60  ;;  %v3465_v33 = vsub.f32 1.0, %v3464_v40 }
 0x244   : > { %7813 = vst [vmem:[#allocation29_spill] sm:$0xff] %v6449_v11  ;;  %v3567_v54 = vsub.f32 1.0, %v3566_v5  ;;  %v6516_v51 = vmul.f32 %v5697_v17, %v5697_v17  ;;  %vm3453_vm15 = vweird.f32 %v6211_v60  ;;  %v3581_v24 = vmul.f32 %v6389_v37, %v6293_v50 }
 0x245   : > { %v3452_v52 = vadd.f32 %v6318_v6, %v3451_v41  ;;  %vm3454_vm1 = vweird.f32 %v6318_v6  ;;  %v3474_v17 = vand.u32 2147483648, %v6220_v56  ;;  %v6534_v40 = vsel %vm6464_vm9, %v3343_v42, %v3339_v8 }
 0x246   : > { %7827 = vst [vmem:[#allocation71_spill] sm:$0xff] %v6534_v40  ;;  %v3354_v5 = vsel %vm6525_vm0, %v6297_v2, %v3350_v32  ;;  %vm6539_vm2 = vcmp.eq.f32.partialorder %v3457_v29, 8.507059e+37  ;;  %v3472_v9 = vand.u32 2147483647, %v6220_v56  ;;  %v3460_v41 = vor.u32 1.1754944e-38, %v3459_v12  ;;  %vm6556_vm3 = vmor %vm3453_vm15, %vm3454_vm1 }
 0x247   : > { %v1435_v46 = vpop.f32.mrf.mxu2  ;;  %v6548_v23 = vmul.f32 %v5761_v36, %v5761_v36  ;;  %v6552_v42 = vmul.f32 %v5777_v25, %v5777_v25  ;;  %vm3468_vm4 = vweird.f32 %v6220_v56  ;;  %v6564_v29 = vsel %vm6492_vm12, %v3358_v21, %v3354_v5 }
 0x248   : > { %v1484_v55 = vpop.f32.mrf.mxu3  ;;  %v1496_v53 = vpop.f32.mrf.mxu0  ;;  %7832 = vst [vmem:[#allocation72_spill] sm:$0xff] %v6564_v29  ;;  %v3456_v36 = vsel %vm6556_vm3, %v6318_v6, %v3452_v52  ;;  %v3475_v25 = vor.u32 1.1754944e-38, %v3474_v17  ;;  %v6571_v8 = vmul.f32 %v5844_v62, %v5844_v62  ;;  %vm3469_vm5 = vweird.f32 %v6326_v22 }
 0x249   : > { %v6518_v11 = vadd.f32 %v1484_v55, %v1435_v46  ;;  %v1545_v28 = vpop.f32.mrf.mxu1  ;;  %vm6574_vm6 = vcmp.eq.f32.partialorder %v3472_v9, 8.507059e+37  ;;  %vm3570_vm7 = vweird.f32 %v6258_v48  ;;  %vm3571_vm8 = vweird.f32 %v6356_v18  ;;  %v7836_v9 = vld [vmem:[#allocation23_spill] sm:$0xff]  ;;  %vm6603_vm9 = vmor %vm3468_vm4, %vm3469_vm5 }
 0x24a   : > { %v1546_v15 = vadd.f32 %v1545_v28, %v1496_v53  ;;  %v3466_v53 = vmul.f32 %v6326_v22, %v3465_v33  ;;  %v3568_v28 = vmul.f32 %v6356_v18, %v3567_v54  ;;  %v6585_v62 = vmul.f32 %v5854_v63, %v5854_v63  ;;  %vm6610_vm10 = vmor %vm3570_vm7, %vm3571_vm8 }
 0x24b   : > { %7824 = vst [vmem:[#allocation70_spill] sm:$0xff] %v6518_v11  ;;  %v6589_v17 = vsel %vm6539_vm2, %v3460_v41, %v3456_v36  ;;  %v3576_v46 = vand.u32 2147483648, %v6258_v48  ;;  %vm3586_vm12 = vweird.f32 %v6389_v37  ;;  %vm3585_vm13 = vweird.f32 %v6293_v50  ;;  %v7854_v11 = vld [vmem:[#allocation14_spill] sm:$0xff] }
 0x24c   : > { %v1770_v55 = vmul.f32 %v1546_v15, %v1546_v15  ;;  %v3582_v15 = vsub.f32 1.0, %v3581_v24  ;;  %v3467_v6 = vadd.f32 %v6326_v22, %v3466_v53  ;;  %v3569_v54 = vadd.f32 %v6356_v18, %v3568_v28  ;;  %7835 = vst [vmem:[#allocation73_spill] sm:$0xff] %v6589_v17  ;;  %vm6665_vm14 = vmor %vm3585_vm13, %vm3586_vm12  ;;  %v4136_v17 = vld [vmem:[%s4664_s19 + $0x20] sm:$0xff] }
 0x24e   : > { %v1772_v32 = vadd.f32 %v1770_v55, %v6301_v19  ;;  %v3574_v19 = vand.u32 2147483647, %v6258_v48  ;;  %v3583_v5 = vmul.f32 %v6389_v37, %v3582_v15  ;;  %v3471_v36 = vsel %vm6603_vm9, %v6326_v22, %v3467_v6 }
 0x24f   : > { %v1594_v12 = vpop.f32.mrf.mxu2 }
 0x250   : > { %v1774_v47 = vmax.f32 %v1772_v32, 1e-07  ;;  %v1643_v21 = vpop.f32.mrf.mxu3  ;;  %v1498_v33 = vpop.f32.mrf.mxu0  ;;  %vm6614_vm11 = vcmp.eq.f32.partialorder %v3574_v19, 8.507059e+37  ;;  %v3591_v32 = vand.u32 2147483648, %v6293_v50 }
 0x251   : > { %v1644_v49 = vadd.f32 %v1643_v21, %v1594_v12  ;;  %v1547_v52 = vpop.f32.mrf.mxu1  ;;  %v3573_v12 = vsel %vm6610_vm10, %v6356_v18, %v3569_v54  ;;  %v6639_v18 = vmul.f32 %v5922_v20, %v5922_v20  ;;  %v6657_v20 = vsel %vm6574_vm6, %v3475_v25, %v3471_v36 }
 0x252   : > { %v6593_v55 = vadd.f32 %v1774_v47, %v7836_v9  ;;  %v6596_v53 = vmul.f32 %v1774_v47, %v7836_v9  ;;  %v1822_v28 = vmul.f32 %v5643_v34, %v1774_v47  ;;  %v1548_v2 = vadd.f32 %v1547_v52, %v1498_v33  ;;  %7845 = vst [vmem:[#allocation75_spill] sm:$0xff] %v6657_v20 }
 0x253   : > { %v1771_v41 = vmul.f32 %v1644_v49, %v1644_v49  ;;  %v6629_v33 = vadd.f32 %v6389_v37, %v3583_v5  ;;  %v6633_v49 = vmul.f32 %v5915_v26, %v5915_v26  ;;  %v3577_v52 = vor.u32 1.1754944e-38, %v3576_v46 }
 0x254   : > { %4437 = vrsqrt.f32 %v6596_v53  ;;  %v1889_v21 = vmul.f32 %v1548_v2, %v1548_v2  ;;  %v6644_v5 = vor.u32 1.1754944e-38, %v3591_v32  ;;  %v6648_v26 = vmul.f32 %v5983_v7, %v5983_v7 }
 0x255   : > { %4439 = vlog2.f32 %v1822_v28  ;;  %v1773_v19 = vadd.f32 %v1771_v41, %v6336_v27  ;;  %7843 = vst [vmem:[#allocation23_spill] sm:$0xff] %v6629_v33  ;;  %v6652_v9 = vmul.f32 %v5991_v31, %v5991_v31  ;;  %v4132_v28 = vld [vmem:[%s4664_s19 + $0x10] sm:$0xff]  ;;  %v7847_v7 = vmov 0 }
 0x256   : > { %v1891_v27 = vadd.f32 %v1889_v21, %v6340_v61  ;;  %7844 = vst [vmem:[#allocation74_spill] sm:$0xff] %v6644_v5  ;;  %v6661_v61 = vsel %vm6614_vm11, %v3577_v52, %v3573_v12  ;;  %v7848_v7 = vsel %vm6665_vm14, 4294967295, %v7847_v7  ;;  %v6685_v34 = vmul.f32 %v6058_v59, %v6058_v59  ;;  %v7850_v59 = vld [vmem:[#allocation24_spill] sm:$0xff] }
 0x257   : > { %v6641_v6 = vmax.f32 %v1773_v19, 1e-07  ;;  %v1596_v54 = vpop.f32.mrf.mxu2  ;;  %7846 = vst [vmem:[#allocation76_spill] sm:$0xff] %v6661_v61  ;;  %v1855_v21 = vadd.f32 %v4132_v28, %v1774_v47  ;;  %v6695_v52 = vmul.f32 %v6129_v0, %v6129_v0  ;;  %v6708_v47 = vmul.f32 %v6140_v13, %v6140_v13  ;;  %v4133_v13 = vld [vmem:[%s4664_s19 + $0x18] sm:$0xff] }
 0x258   : > { %v1645_v63 = vpop.f32.mrf.mxu3  ;;  %v1501_v46 = vpop.f32.mrf.mxu0  ;;  %7849 = vst [vmem:[#allocation77_spill] sm:$0xff] %v7848_v7  ;;  %v1893_v32 = vmax.f32 %v1891_v27, 1e-07  ;;  %v6712_v0 = vmul.f32 %v6197_v39, %v6197_v39  ;;  %vm1787_vm15 = vcmp.eq.f32.partialorder %v6596_v53, inf  ;;  %vm1789_vm0 = vcmp.eq.f32.partialorder %v6596_v53, 0.0 }
 0x259   : > { %v6671_v31 = vadd.f32 %v6641_v6, %v5477_v57  ;;  %v6675_v41 = vmul.f32 %v6641_v6, %v5477_v57  ;;  %v1837_v25 = vmul.f32 %v5666_v58, %v6641_v6  ;;  %v1550_v24 = vpop.f32.mrf.mxu1  ;;  %v1646_v36 = vadd.f32 %v1645_v63, %v1596_v54 }
 0x25a   : > { %v4438_v15 = vpop.eup %4437  ;;  %v1551_v12 = vadd.f32 %v1550_v24, %v1501_v46  ;;  %v6689_v57 = vmul.f32 %v6062_v1, %v6062_v1  ;;  %v6698_v27 = vadd.f32 %v1893_v32, %v7850_v59  ;;  %v6701_v63 = vmul.f32 %v1893_v32, %v7850_v59  ;;  %v7851_v1 = vld [vmem:[#allocation35_spill] sm:$0xff] }
 0x25b   : > { %v4440_v19 = vpop.eup %4439  ;;  %v1781_v58 = vmul.f32 %v4438_v15, %v6596_v53  ;;  %4441 = vrsqrt.f32 %v6675_v41  ;;  %v1941_v46 = vmul.f32 %v7851_v1, %v1893_v32  ;;  %v6704_v24 = vadd.f32 %v1893_v32, %v1855_v21  ;;  %v7853_v21 = vld [vmem:[#allocation66_spill] sm:$0xff] }
 0x25c   : > { %v1839_v2 = vmul.f32 0.6931472, %v4440_v19  ;;  %4443 = vlog2.f32 %v1837_v25  ;;  %v1890_v28 = vmul.f32 %v1646_v36, %v1646_v36  ;;  %v2006_v25 = vmul.f32 %v1551_v12, %v1551_v12  ;;  %v7852_v19 = vld [vmem:[#allocation65_spill] sm:$0xff] }
 0x25d   : > { %v1782_v54 = vmul.f32 %v4438_v15, %v1781_v58  ;;  %v6716_v58 = vmul.f32 %v7852_v19, %v7852_v19  ;;  %4445 = vrsqrt.f32 %v6701_v63  ;;  %v6721_v1 = vmul.f32 %v7853_v21, %v7853_v21 }
 0x25e   : > { %v1842_v22 = vand.u32 2147483647, %v1839_v2  ;;  %4447 = vlog2.f32 %v1941_v46  ;;  %v1892_v39 = vadd.f32 %v1890_v28, %v6372_v30  ;;  %v2008_v2 = vadd.f32 %v2006_v25, %v6376_v45  ;;  %v7855_v25 = vld [vmem:[#allocation37_spill] sm:$0xff] }
 0x25f   : > { %v1783_v59 = vmul.f32 0.5, %v1782_v54  ;;  %v1599_v32 = vpop.f32.mrf.mxu2  ;;  %v1790_v21 = vand.u32 2147483648, %v6596_v53  ;;  %v1856_v28 = vadd.f32 %v4133_v13, %v6641_v6  ;;  %vm1799_vm1 = vcmp.eq.f32.partialorder %v6675_v41, inf }
 0x260   : > { %v1648_v36 = vpop.f32.mrf.mxu3  ;;  %v1503_v12 = vpop.f32.mrf.mxu0  ;;  %v1894_v50 = vmax.f32 %v1892_v39, 1e-07  ;;  %v1844_v30 = vmul.f32 0.5, %v1842_v22  ;;  %v2010_v48 = vmax.f32 %v2008_v2, 1e-07  ;;  %vm1801_vm2 = vcmp.eq.f32.partialorder %v6675_v41, 0.0 }
 0x261   : > { %v4442_v5 = vpop.eup %4441  ;;  %v1784_v19 = vsub.f32 1.5, %v1783_v59  ;;  %v1649_v54 = vadd.f32 %v1648_v36, %v1599_v32  ;;  %v1552_v33 = vpop.f32.mrf.mxu1  ;;  %v1802_v39 = vand.u32 2147483648, %v6675_v41  ;;  %vm1906_vm3 = vcmp.eq.f32.partialorder %v6701_v63, inf }
 0x262   : > { %v4444_v37 = vpop.eup %4443  ;;  %v1793_v7 = vmul.f32 %v4442_v5, %v6675_v41  ;;  %v1553_v46 = vadd.f32 %v1552_v33, %v1503_v12  ;;  %v6732_v20 = vadd.f32 %v1894_v50, %v7854_v11  ;;  %v6735_v45 = vmul.f32 %v1894_v50, %v7854_v11 }
 0x263   : > { %v1785_v61 = vmul.f32 %v4438_v15, %v1784_v19  ;;  %v1956_v32 = vmul.f32 %v7855_v25, %v1894_v50  ;;  %v4446_v36 = vpop.eup %4445  ;;  %v1841_v33 = vmul.f32 0.6931472, %v4444_v37  ;;  %v1974_v22 = vadd.f32 %v1894_v50, %v1856_v28  ;;  %v7856_v15 = vld [vmem:[#allocation15_spill] sm:$0xff] }
 0x264   : > { %v1794_v59 = vmul.f32 %v4442_v5, %v1793_v7  ;;  %v6742_v6 = vadd.f32 %v2010_v48, %v7856_v15  ;;  %v4448_v7 = vpop.eup %4447  ;;  %v1900_v11 = vmul.f32 %v4446_v36, %v6701_v63  ;;  %4449 = vrsqrt.f32 %v6735_v45 }
 0x265   : > { %v1786_v56 = vmul.f32 %v1785_v61, %v6596_v53  ;;  %v1958_v12 = vmul.f32 0.6931472, %v4448_v7  ;;  %v2007_v37 = vmul.f32 %v1649_v54, %v1649_v54  ;;  %v1862_v19 = vadd.f32 %v4136_v17, %v1844_v30 }
 0x266   : > { %v1795_v13 = vmul.f32 0.5, %v1794_v59  ;;  %v1901_v28 = vmul.f32 %v4446_v36, %v1900_v11  ;;  %v1843_v25 = vand.u32 2147483647, %v1841_v33  ;;  %4451 = vlog2.f32 %v1956_v32 }
 0x267   : > { %v1788_v61 = vsel %vm1787_vm15, %v6596_v53, %v1786_v56  ;;  %v1961_v60 = vand.u32 2147483647, %v1958_v12  ;;  %v6756_v40 = vmul.f32 %v2010_v48, %v7856_v15  ;;  %v7857_v56 = vld [vmem:[#allocation38_spill] sm:$0xff]  ;;  %v6762_v17 = vadd.f32 %v2010_v48, %v6704_v24  ;;  %v1601_v7 = vpop.f32.mrf.mxu2 }
 0x268   : > { %v1791_v50 = vsel %vm1789_vm0, %v1790_v21, %v1788_v61  ;;  %v1796_v2 = vsub.f32 1.5, %v1795_v13  ;;  %v1902_v35 = vmul.f32 0.5, %v1901_v28  ;;  %v2058_v44 = vmul.f32 %v7857_v56, %v2010_v48  ;;  %v7858_v21 = vld [vmem:[#allocation13_spill] sm:$0xff]  ;;  %v1650_v33 = vpop.f32.mrf.mxu3 }
 0x269   : > { %v6753_v59 = vmul.f32 2.0, %v1791_v50  ;;  %v1963_v53 = vmul.f32 0.5, %v1961_v60  ;;  %v2009_v30 = vadd.f32 %v2007_v37, %v7858_v21  ;;  %4453 = vrsqrt.f32 %v6756_v40 }
 0x26a   : > { %v1797_v29 = vmul.f32 %v4442_v5, %v1796_v2  ;;  %v4450_v13 = vpop.eup %4449  ;;  %v1903_v32 = vsub.f32 1.5, %v1902_v35  ;;  %vm1908_vm4 = vcmp.eq.f32.partialorder %v6701_v63, 0.0  ;;  %v1845_v15 = vmul.f32 0.5, %v1843_v25  ;;  %v7859_v25 = vld [vmem:[#allocation26_spill] sm:$0xff] }
 0x26b   : > { %v1806_v54 = vsub.f32 %v6593_v55, %v6753_v59  ;;  %v1909_v55 = vand.u32 2147483648, %v6701_v63  ;;  %v6770_v60 = vadd.f32 %v1963_v53, %v1862_v19  ;;  %v1912_v48 = vmul.f32 %v4450_v13, %v6735_v45  ;;  %v4137_v59 = vld [vmem:[%s4664_s19 + $0x28] sm:$0xff] }
 0x26c   : > { %v1798_v5 = vmul.f32 %v1797_v29, %v6675_v41  ;;  %v1904_v29 = vmul.f32 %v4446_v36, %v1903_v32  ;;  %4455 = vlog2.f32 %v2058_v44  ;;  %v4452_v35 = vpop.eup %4451  ;;  %v2011_v12 = vmax.f32 %v2009_v30, 1e-07 }
 0x26d   : > { %v1913_v61 = vmul.f32 %v4450_v13, %v1912_v48  ;;  %v2123_v37 = vmul.f32 %v1553_v46, %v1553_v46  ;;  %vm1918_vm5 = vcmp.eq.f32.partialorder %v6735_v45, inf  ;;  %v1960_v2 = vmul.f32 0.6931472, %v4452_v35 }
 0x26e   : > { %v1800_v24 = vsel %vm1799_vm1, %v6675_v41, %v1798_v5  ;;  %v1905_v19 = vmul.f32 %v1904_v29, %v6701_v63  ;;  %v1651_v28 = vadd.f32 %v1650_v33, %v1601_v7  ;;  %v6782_v36 = vadd.f32 %v2011_v12, %v7859_v25  ;;  %v7860_v41 = vld [vmem:[#allocation41_spill] sm:$0xff]  ;;  %v1846_v7 = vld [vmem:[%s4664_s19] sm:$0xff] }
 0x26f   : > { %v1803_v11 = vsel %vm1801_vm2, %v1802_v39, %v1800_v24  ;;  %v1914_v56 = vmul.f32 0.5, %v1913_v61  ;;  %v6785_v44 = vmul.f32 %v2011_v12, %v7859_v25  ;;  %v2073_v39 = vmul.f32 %v7860_v41, %v2011_v12  ;;  %v4454_v53 = vpop.eup %4453  ;;  %v1555_v61 = vpop.f32.mrf.mxu1 }
 0x270   : > { %v1805_v50 = vmul.f32 2.0, %v1803_v11  ;;  %v1907_v21 = vsel %vm1906_vm3, %v6701_v63, %v1905_v19  ;;  %v1962_v30 = vand.u32 2147483647, %v1960_v2  ;;  %v6792_v5 = vadd.f32 %v2011_v12, %v1974_v22  ;;  %v1506_v11 = vpop.f32.mrf.mxu0  ;;  %v1653_v19 = vpop.f32.mrf.mxu3 }
 0x271   : > { %v1910_v33 = vsel %vm1908_vm4, %v1909_v55, %v1907_v21  ;;  %v1915_v32 = vsub.f32 1.5, %v1914_v56  ;;  %v2017_v48 = vmul.f32 %v4454_v53, %v6756_v40  ;;  %4457 = vrsqrt.f32 %v6785_v44  ;;  %v1604_v55 = vpop.f32.mrf.mxu2 }
 0x272   : > { %v1807_v46 = vsub.f32 %v6671_v31, %v1805_v50  ;;  %v4456_v24 = vpop.eup %4455  ;;  %v1863_v29 = vadd.f32 %v4137_v59, %v1845_v15  ;;  %v1923_v35 = vmul.f32 2.0, %v1910_v33  ;;  %vm1920_vm6 = vcmp.eq.f32.partialorder %v6735_v45, 0.0  ;;  %v1847_v15 = vld [vmem:[%s4664_s19 + $0x8] sm:$0xff] }
 0x273   : > { %v1964_v31 = vmul.f32 0.5, %v1962_v30  ;;  %v1916_v22 = vmul.f32 %v4450_v13, %v1915_v32  ;;  %v1921_v12 = vand.u32 2147483648, %v6735_v45  ;;  %v2018_v50 = vmul.f32 %v4454_v53, %v2017_v48  ;;  %v7861_v30 = vld [vmem:[#allocation28_spill] sm:$0xff] }
 0x274   : > { %v2075_v63 = vmul.f32 0.6931472, %v4456_v24  ;;  %v1848_v2 = vadd.f32 %v1846_v7, %v1806_v54  ;;  %v1925_v56 = vsub.f32 %v6698_v27, %v1923_v35  ;;  %vm2023_vm7 = vcmp.eq.f32.partialorder %v6756_v40, inf }
 0x275   : > { %v1980_v25 = vadd.f32 %v1964_v31, %v1863_v29  ;;  %4459 = vlog2.f32 %v2073_v39  ;;  %v1917_v59 = vmul.f32 %v1916_v22, %v6735_v45  ;;  %v2019_v41 = vmul.f32 0.5, %v2018_v50 }
 0x276   : > { %v2078_v21 = vand.u32 2147483647, %v2075_v63  ;;  %v2125_v13 = vadd.f32 %v2123_v37, %v7861_v30  ;;  %v1967_v33 = vadd.f32 %v1925_v56, %v1848_v2  ;;  %v2124_v32 = vmul.f32 %v1651_v28, %v1651_v28 }
 0x277   : > { %v1556_v48 = vadd.f32 %v1555_v61, %v1506_v11  ;;  %v1654_v24 = vadd.f32 %v1653_v19, %v1604_v55  ;;  %v4458_v16 = vpop.eup %4457  ;;  %v1919_v27 = vsel %vm1918_vm5, %v6735_v45, %v1917_v59  ;;  %v2020_v54 = vsub.f32 1.5, %v2019_v41  ;;  %v7862_v61 = vld [vmem:[#allocation27_spill] sm:$0xff] }
 0x278   : > { %v2080_v7 = vmul.f32 0.5, %v2078_v21  ;;  %v2127_v29 = vmax.f32 %v2125_v13, 1e-07  ;;  %v1849_v39 = vadd.f32 %v1847_v15, %v1807_v46  ;;  %v1922_v35 = vsel %vm1920_vm6, %v1921_v12, %v1919_v27  ;;  %v7863_v46 = vld [vmem:[#allocation42_spill] sm:$0xff] }
 0x279   : > { %v2029_v31 = vmul.f32 %v4458_v16, %v6785_v44  ;;  %v2126_v37 = vadd.f32 %v2124_v32, %v6477_v43  ;;  %v1924_v22 = vmul.f32 2.0, %v1922_v35  ;;  %v2021_v28 = vmul.f32 %v4454_v53, %v2020_v54  ;;  %v7864_v13 = vld [vmem:[#allocation30_spill] sm:$0xff] }
 0x27a   : > { %v6814_v11 = vadd.f32 %v2080_v7, %v6770_v60  ;;  %v6817_v50 = vadd.f32 %v2127_v29, %v7862_v61  ;;  %v6820_v19 = vmul.f32 %v2127_v29, %v7862_v61  ;;  %v2175_v45 = vmul.f32 %v7863_v46, %v2127_v29 }
 0x27b   : > { %v4460_v63 = vpop.eup %4459  ;;  %v2030_v55 = vmul.f32 %v4458_v16, %v2029_v31  ;;  %v2207_v12 = vadd.f32 %v2127_v29, %v6762_v17  ;;  %v1926_v2 = vsub.f32 %v6732_v20, %v1924_v22  ;;  %v2022_v43 = vmul.f32 %v2021_v28, %v6756_v40 }
 0x27c   : > { %v2077_v53 = vmul.f32 0.6931472, %v4460_v63  ;;  %v2128_v56 = vmax.f32 %v2126_v37, 1e-07  ;;  %v2026_v60 = vand.u32 2147483648, %v6756_v40  ;;  %4461 = vrsqrt.f32 %v6820_v19  ;;  %v7866_v37 = vld [vmem:[#allocation67_spill] sm:$0xff]  ;;  %v1508_v63 = vpop.f32.mrf.mxu0 }
 0x27d   : > { %v2031_v15 = vmul.f32 0.5, %v2030_v55  ;;  %v2240_v59 = vmul.f32 %v1556_v48, %v1556_v48  ;;  %v1968_v41 = vadd.f32 %v1926_v2, %v1849_v39  ;;  %v2024_v21 = vsel %vm2023_vm7, %v6756_v40, %v2022_v43  ;;  %v7865_v48 = vld [vmem:[#allocation44_spill] sm:$0xff]  ;;  %v1557_v55 = vpop.f32.mrf.mxu1  ;;  %v7867_v2 = vld [vmem:[#allocation9_spill] sm:$0xff] }
 0x27e   : > { %vm2025_vm8 = vcmp.eq.f32.partialorder %v6756_v40, 0.0  ;;  %v2079_v17 = vand.u32 2147483647, %v2077_v53  ;;  %4463 = vlog2.f32 %v2175_v45  ;;  %v6833_v32 = vadd.f32 %v2128_v56, %v7864_v13 }
 0x27f   : > { %v2027_v30 = vsel %vm2025_vm8, %v2026_v60, %v2024_v21  ;;  %v2032_v20 = vsub.f32 1.5, %v2031_v15  ;;  %v6836_v7 = vmul.f32 %v2128_v56, %v7864_v13  ;;  %v2190_v29 = vmul.f32 %v7865_v48, %v2128_v56  ;;  %v7869_v13 = vld [vmem:[#allocation46_spill] sm:$0xff] }
 0x280   : > { %v2040_v27 = vmul.f32 2.0, %v2027_v30  ;;  %v2081_v54 = vmul.f32 0.5, %v2079_v17  ;;  %v2208_v35 = vadd.f32 %v2128_v56, %v6792_v5  ;;  %v2242_v31 = vadd.f32 %v2240_v59, %v6481_v4  ;;  %v1606_v17 = vpop.f32.mrf.mxu2  ;;  %v1655_v30 = vpop.f32.mrf.mxu3 }
 0x281   : > { %v2033_v39 = vmul.f32 %v4458_v16, %v2032_v20  ;;  %v2241_v40 = vmul.f32 %v1654_v24, %v1654_v24  ;;  %v6843_v22 = vmul.f32 %v7866_v37, %v7866_v37  ;;  %4465 = vrsqrt.f32 %v6836_v7 }
 0x282   : > { %v2042_v28 = vsub.f32 %v6742_v6, %v2040_v27  ;;  %v6846_v61 = vadd.f32 %v2081_v54, %v1980_v25  ;;  %v4462_v46 = vpop.eup %4461  ;;  %vm2035_vm9 = vcmp.eq.f32.partialorder %v6785_v44, inf  ;;  %v2038_v4 = vand.u32 2147483648, %v6785_v44 }
 0x283   : > { %v2034_v16 = vmul.f32 %v2033_v39, %v6785_v44  ;;  %4467 = vlog2.f32 %v2190_v29  ;;  %v2134_v24 = vmul.f32 %v4462_v46, %v6820_v19  ;;  %v2244_v45 = vmax.f32 %v2242_v31, 1e-07 }
 0x284   : > { %v6852_v5 = vadd.f32 %v2042_v28, %v1967_v33  ;;  %v2243_v6 = vadd.f32 %v2241_v40, %v6499_v38  ;;  %v4464_v25 = vpop.eup %4463  ;;  %v6858_v43 = vmul.f32 %v7867_v2, %v7867_v2  ;;  %vm2037_vm10 = vcmp.eq.f32.partialorder %v6785_v44, 0.0  ;;  %v7868_v33 = vld [vmem:[#allocation31_spill] sm:$0xff]  ;;  %v7870_v2 = vld [vmem:[#allocation32_spill] sm:$0xff] }
 0x285   : > { %v2036_v53 = vsel %vm2035_vm9, %v6785_v44, %v2034_v16  ;;  %v1558_v56 = vadd.f32 %v1557_v55, %v1508_v63  ;;  %v2135_v15 = vmul.f32 %v4462_v46, %v2134_v24  ;;  %v2192_v59 = vmul.f32 0.6931472, %v4464_v25 }
 0x286   : > { %v2039_v60 = vsel %vm2037_vm10, %v2038_v4, %v2036_v53  ;;  %v6863_v21 = vadd.f32 %v2244_v45, %v7868_v33  ;;  %vm2140_vm11 = vcmp.eq.f32.partialorder %v6820_v19, inf  ;;  %v6867_v38 = vmul.f32 %v2244_v45, %v7868_v33  ;;  %v1511_v33 = vpop.f32.mrf.mxu0 }
 0x287   : > { %v2041_v20 = vmul.f32 2.0, %v2039_v60  ;;  %v2292_v27 = vmul.f32 %v7869_v13, %v2244_v45  ;;  %v2324_v54 = vadd.f32 %v2244_v45, %v2207_v12  ;;  %v4466_v48 = vpop.eup %4465  ;;  %v2136_v44 = vmul.f32 0.5, %v2135_v15 }
 0x288   : > { %vm2142_vm12 = vcmp.eq.f32.partialorder %v6820_v19, 0.0  ;;  %v2195_v29 = vand.u32 2147483647, %v2192_v59  ;;  %v2245_v39 = vmax.f32 %v2243_v6, 1e-07  ;;  %v2146_v37 = vmul.f32 %v4466_v48, %v6836_v7 }
 0x289   : > { %v4468_v31 = vpop.eup %4467  ;;  %v2043_v40 = vsub.f32 %v6782_v36, %v2041_v20  ;;  %4469 = vrsqrt.f32 %v6867_v38  ;;  %v1656_v28 = vadd.f32 %v1655_v30, %v1606_v17  ;;  %v2137_v63 = vsub.f32 1.5, %v2136_v44  ;;  %v1560_v17 = vpop.f32.mrf.mxu1 }
 0x28a   : > { %v2197_v55 = vmul.f32 0.5, %v2195_v29  ;;  %v2194_v16 = vmul.f32 0.6931472, %v4468_v31  ;;  %v2357_v4 = vmul.f32 %v1558_v56, %v1558_v56  ;;  %v2143_v12 = vand.u32 2147483648, %v6820_v19  ;;  %v7871_v56 = vld [vmem:[#allocation48_spill] sm:$0xff] }
 0x28b   : > { %v6874_v24 = vadd.f32 %v2043_v40, %v1968_v41  ;;  %v2147_v45 = vmul.f32 %v4466_v48, %v2146_v37  ;;  %4471 = vlog2.f32 %v2292_v27  ;;  %v2138_v25 = vmul.f32 %v4462_v46, %v2137_v63 }
 0x28c   : > { %v2213_v6 = vadd.f32 %v2197_v55, %v6814_v11  ;;  %vm2152_vm13 = vcmp.eq.f32.partialorder %v6836_v7, inf  ;;  %v2196_v36 = vand.u32 2147483647, %v2194_v16  ;;  %v6880_v53 = vadd.f32 %v2245_v39, %v7870_v2 }
 0x28d   : > { %v2148_v60 = vmul.f32 0.5, %v2147_v45  ;;  %v6883_v15 = vmul.f32 %v2245_v39, %v7870_v2  ;;  %v2307_v41 = vmul.f32 %v7871_v56, %v2245_v39  ;;  %v6886_v59 = vadd.f32 %v2245_v39, %v2208_v35  ;;  %v7873_v2 = vld [vmem:[#allocation50_spill] sm:$0xff] }
 0x28e   : > { %v2139_v46 = vmul.f32 %v2138_v25, %v6820_v19  ;;  %v2198_v30 = vmul.f32 0.5, %v2196_v36  ;;  %v2359_v11 = vadd.f32 %v2357_v4, %v6516_v51  ;;  %v2358_v20 = vmul.f32 %v1656_v28, %v1656_v28  ;;  %v7872_v25 = vld [vmem:[#allocation33_spill] sm:$0xff] }
 0x28f   : > { %v4470_v13 = vpop.eup %4469  ;;  %v2149_v27 = vsub.f32 1.5, %v2148_v60  ;;  %vm2154_vm15 = vcmp.eq.f32.partialorder %v6836_v7, 0.0  ;;  %v2155_v44 = vand.u32 2147483648, %v6836_v7  ;;  %4473 = vrsqrt.f32 %v6883_v15 }
 0x290   : > { %v2141_v35 = vsel %vm2140_vm11, %v6820_v19, %v2139_v46  ;;  %v6897_v29 = vadd.f32 %v2198_v30, %v6846_v61  ;;  %v2251_v39 = vmul.f32 %v4470_v13, %v6867_v38  ;;  %v1561_v31 = vadd.f32 %v1560_v17, %v1511_v33  ;;  %v1658_v30 = vpop.f32.mrf.mxu3 }
 0x291   : > { %v4472_v51 = vpop.eup %4471  ;;  %v2144_v40 = vsel %vm2142_vm12, %v2143_v12, %v2141_v35  ;;  %v2150_v37 = vmul.f32 %v4466_v48, %v2149_v27  ;;  %4475 = vlog2.f32 %v2307_v41  ;;  %v2361_v28 = vmax.f32 %v2359_v11, 1e-07 }
 0x292   : > { %v2157_v63 = vmul.f32 2.0, %v2144_v40  ;;  %v2252_v55 = vmul.f32 %v4470_v13, %v2251_v39  ;;  %v2309_v16 = vmul.f32 0.6931472, %v4472_v51  ;;  %v2360_v4 = vadd.f32 %v2358_v20, %v6548_v23 }
 0x293   : > { %v2151_v45 = vmul.f32 %v2150_v37, %v6836_v7  ;;  %v6905_v61 = vadd.f32 %v2361_v28, %v7872_v25  ;;  %v6908_v36 = vmul.f32 %v2361_v28, %v7872_v25  ;;  %v2409_v60 = vmul.f32 %v7873_v2, %v2361_v28 }
 0x294   : > { %v2159_v19 = vsub.f32 %v6817_v50, %v2157_v63  ;;  %v2253_v48 = vmul.f32 0.5, %v2252_v55  ;;  %v2312_v12 = vand.u32 2147483647, %v2309_v16  ;;  %v6912_v56 = vadd.f32 %v2361_v28, %v2324_v54  ;;  %v1609_v54 = vpop.f32.mrf.mxu2  ;;  %v7874_v16 = vld [vmem:[#allocation34_spill] sm:$0xff] }
 0x295   : > { %v4474_v41 = vpop.eup %4473  ;;  %v2153_v23 = vsel %vm2152_vm13, %v6836_v7, %v2151_v45  ;;  %vm2257_vm0 = vcmp.eq.f32.partialorder %v6867_v38, inf  ;;  %vm2259_vm1 = vcmp.eq.f32.partialorder %v6867_v38, 0.0  ;;  %4477 = vrsqrt.f32 %v6908_v36 }
 0x296   : > { %v2201_v33 = vadd.f32 %v2159_v19, %v6852_v5  ;;  %v2156_v50 = vsel %vm2154_vm15, %v2155_v44, %v2153_v23  ;;  %v2254_v17 = vsub.f32 1.5, %v2253_v48  ;;  %v2314_v46 = vmul.f32 0.5, %v2312_v12 }
 0x297   : > { %v4476_v11 = vpop.eup %4475  ;;  %v2158_v20 = vmul.f32 2.0, %v2156_v50  ;;  %v2260_v27 = vand.u32 2147483648, %v6867_v38  ;;  %v2263_v35 = vmul.f32 %v4474_v41, %v6883_v15  ;;  %4479 = vlog2.f32 %v2409_v60 }
 0x298   : > { %v2255_v39 = vmul.f32 %v4470_v13, %v2254_v17  ;;  %v2330_v51 = vadd.f32 %v2314_v46, %v2213_v6  ;;  %v2311_v40 = vmul.f32 0.6931472, %v4476_v11  ;;  %v2362_v37 = vmax.f32 %v2360_v4, 1e-07  ;;  %v7875_v4 = vld [vmem:[#allocation51_spill] sm:$0xff] }
 0x299   : > { %v2160_v5 = vsub.f32 %v6833_v32, %v2158_v20  ;;  %v2264_v28 = vmul.f32 %v4474_v41, %v2263_v35  ;;  %v2474_v7 = vmul.f32 %v1561_v31, %v1561_v31  ;;  %v1659_v44 = vadd.f32 %v1658_v30, %v1609_v54  ;;  %v1513_v54 = vpop.f32.mrf.mxu0  ;;  %v1562_v30 = vpop.f32.mrf.mxu1 }
 0x29a   : > { %v2256_v63 = vmul.f32 %v2255_v39, %v6867_v38  ;;  %v2313_v55 = vand.u32 2147483647, %v2311_v40  ;;  %v6928_v45 = vadd.f32 %v2362_v37, %v7874_v16  ;;  %v6931_v25 = vmul.f32 %v2362_v37, %v7874_v16 }
 0x29b   : > { %v4478_v2 = vpop.eup %4477  ;;  %v6934_v13 = vadd.f32 %v2160_v5, %v6874_v24  ;;  %v2265_v6 = vmul.f32 0.5, %v2264_v28  ;;  %v2424_v60 = vmul.f32 %v7875_v4, %v2362_v37  ;;  %v6938_v32 = vadd.f32 %v2362_v37, %v6886_v59  ;;  %v1660_v4 = vpop.f32.mrf.mxu3 }
 0x29c   : > { %v2258_v31 = vsel %vm2257_vm0, %v6867_v38, %v2256_v63  ;;  %v2315_v19 = vmul.f32 0.5, %v2313_v55  ;;  %v2368_v48 = vmul.f32 %v4478_v2, %v6908_v36  ;;  %4481 = vrsqrt.f32 %v6931_v25 }
 0x29d   : > { %v4480_v12 = vpop.eup %4479  ;;  %v2261_v24 = vsel %vm2259_vm1, %v2260_v27, %v2258_v31  ;;  %v2266_v23 = vsub.f32 1.5, %v2265_v6  ;;  %vm2269_vm2 = vcmp.eq.f32.partialorder %v6883_v15, inf  ;;  %vm2271_vm3 = vcmp.eq.f32.partialorder %v6883_v15, 0.0  ;;  %v1611_v6 = vpop.f32.mrf.mxu2 }
 0x29e   : > { %v2274_v59 = vmul.f32 2.0, %v2261_v24  ;;  %v6950_v50 = vadd.f32 %v2315_v19, %v6897_v29  ;;  %v2369_v17 = vmul.f32 %v4478_v2, %v2368_v48  ;;  %v2426_v46 = vmul.f32 0.6931472, %v4480_v12 }
 0x29f   : > { %v2267_v11 = vmul.f32 %v4474_v41, %v2266_v23  ;;  %v2272_v20 = vand.u32 2147483648, %v6883_v15  ;;  %4483 = vlog2.f32 %v2424_v60  ;;  %v2476_v38 = vadd.f32 %v2474_v7, %v6552_v42  ;;  %v7876_v7 = vld [vmem:[#allocation36_spill] sm:$0xff] }
 0x2a0   : > { %v2276_v27 = vsub.f32 %v6863_v21, %v2274_v59  ;;  %v2370_v35 = vmul.f32 0.5, %v2369_v17  ;;  %v2429_v39 = vand.u32 2147483647, %v2426_v46  ;;  %v2475_v40 = vmul.f32 %v1659_v44, %v1659_v44 }
 0x2a1   : > { %v2268_v37 = vmul.f32 %v2267_v11, %v6883_v15  ;;  %vm2374_vm4 = vcmp.eq.f32.partialorder %v6908_v36, inf  ;;  %v2478_v29 = vmax.f32 %v2476_v38, 1e-07  ;;  %v1563_v5 = vadd.f32 %v1562_v30, %v1513_v54 }
 0x2a2   : > { %v4482_v28 = vpop.eup %4481  ;;  %v2318_v63 = vadd.f32 %v2276_v27, %v2201_v33  ;;  %v2371_v55 = vsub.f32 1.5, %v2370_v35  ;;  %v2431_v41 = vmul.f32 0.5, %v2429_v39  ;;  %v2477_v16 = vadd.f32 %v2475_v40, %v6571_v8  ;;  %v7877_v8 = vld [vmem:[#allocation54_spill] sm:$0xff] }
 0x2a3   : > { %v2270_v42 = vsel %vm2269_vm2, %v6883_v15, %v2268_v37  ;;  %v2380_v21 = vmul.f32 %v4482_v28, %v6931_v25  ;;  %v6963_v44 = vadd.f32 %v2478_v29, %v7876_v7  ;;  %v6966_v60 = vmul.f32 %v2478_v29, %v7876_v7 }
 0x2a4   : > { %v2273_v33 = vsel %vm2271_vm3, %v2272_v20, %v2270_v42  ;;  %v2372_v31 = vmul.f32 %v4478_v2, %v2371_v55  ;;  %v6970_v19 = vadd.f32 %v2431_v41, %v2330_v51  ;;  %v2526_v48 = vmul.f32 %v7877_v8, %v2478_v29  ;;  %v7878_v41 = vld [vmem:[#allocation39_spill] sm:$0xff] }
 0x2a5   : > { %v4484_v12 = vpop.eup %4483  ;;  %v2275_v24 = vmul.f32 2.0, %v2273_v33  ;;  %v2381_v23 = vmul.f32 %v4482_v28, %v2380_v21  ;;  %4485 = vrsqrt.f32 %v6966_v60  ;;  %v1661_v59 = vadd.f32 %v1660_v4, %v1611_v6  ;;  %v7879_v4 = vld [vmem:[#allocation56_spill] sm:$0xff] }
 0x2a6   : > { %v2373_v17 = vmul.f32 %v2372_v31, %v6908_v36  ;;  %vm2376_vm5 = vcmp.eq.f32.partialorder %v6908_v36, 0.0  ;;  %v2377_v46 = vand.u32 2147483648, %v6908_v36  ;;  %v2428_v54 = vmul.f32 0.6931472, %v4484_v12  ;;  %v1565_v31 = vpop.f32.mrf.mxu1 }
 0x2a7   : > { %v2277_v15 = vsub.f32 %v6880_v53, %v2275_v24  ;;  %v2382_v2 = vmul.f32 0.5, %v2381_v23  ;;  %4487 = vlog2.f32 %v2526_v48  ;;  %v2558_v51 = vadd.f32 %v2478_v29, %v6912_v56 }
 0x2a8   : > { %v2375_v30 = vsel %vm2374_vm4, %v6908_v36, %v2373_v17  ;;  %v2430_v11 = vand.u32 2147483647, %v2428_v54  ;;  %v2479_v20 = vmax.f32 %v2477_v16, 1e-07  ;;  %v2591_v38 = vmul.f32 %v1563_v5, %v1563_v5  ;;  %v1614_v17 = vpop.f32.mrf.mxu2  ;;  %v7880_v54 = vld [vmem:[#allocation40_spill] sm:$0xff] }
 0x2a9   : > { %v2319_v27 = vadd.f32 %v2277_v15, %v6934_v13  ;;  %v2378_v35 = vsel %vm2376_vm5, %v2377_v46, %v2375_v30  ;;  %v2383_v39 = vsub.f32 1.5, %v2382_v2  ;;  %v2592_v40 = vmul.f32 %v1661_v59, %v1661_v59 }
 0x2aa   : > { %v2391_v37 = vmul.f32 2.0, %v2378_v35  ;;  %v2432_v55 = vmul.f32 0.5, %v2430_v11  ;;  %v6984_v53 = vadd.f32 %v2479_v20, %v7878_v41  ;;  %v6987_v6 = vmul.f32 %v2479_v20, %v7878_v41 }
 0x2ab   : > { %v4486_v56 = vpop.eup %4485  ;;  %v2384_v29 = vmul.f32 %v4482_v28, %v2383_v39  ;;  %v2541_v36 = vmul.f32 %v7879_v4, %v2479_v20  ;;  %v2559_v16 = vadd.f32 %v2479_v20, %v6938_v32  ;;  %v2593_v5 = vadd.f32 %v2591_v38, %v6585_v62 }
 0x2ac   : > { %v2393_v13 = vsub.f32 %v6905_v61, %v2391_v37  ;;  %v6994_v42 = vadd.f32 %v2432_v55, %v6950_v50  ;;  %v2485_v21 = vmul.f32 %v4486_v56, %v6966_v60  ;;  %4489 = vrsqrt.f32 %v6987_v6  ;;  %v1516_v50 = vpop.f32.mrf.mxu0 }
 0x2ad   : > { %v4488_v7 = vpop.eup %4487  ;;  %v2385_v33 = vmul.f32 %v2384_v29, %v6931_v25  ;;  %vm2386_vm6 = vcmp.eq.f32.partialorder %v6931_v25, inf  ;;  %vm2388_vm7 = vcmp.eq.f32.partialorder %v6931_v25, 0.0  ;;  %v2389_v32 = vand.u32 2147483648, %v6931_v25 }
 0x2ae   : > { %v7002_v28 = vadd.f32 %v2393_v13, %v2318_v63  ;;  %v2486_v62 = vmul.f32 %v4486_v56, %v2485_v21  ;;  %v2543_v61 = vmul.f32 0.6931472, %v4488_v7  ;;  %4491 = vlog2.f32 %v2541_v36  ;;  %v1663_v63 = vpop.f32.mrf.mxu3  ;;  %v7882_v21 = vld [vmem:[#allocation43_spill] sm:$0xff] }
 0x2af   : > { %v2387_v8 = vsel %vm2386_vm6, %v6931_v25, %v2385_v33  ;;  %vm2491_vm8 = vcmp.eq.f32.partialorder %v6966_v60, inf  ;;  %v2595_v48 = vmax.f32 %v2593_v5, 1e-07  ;;  %v2594_v12 = vadd.f32 %v2592_v40, %v6633_v49  ;;  %v7881_v25 = vld [vmem:[#allocation58_spill] sm:$0xff] }
 0x2b0   : > { %v2390_v24 = vsel %vm2388_vm7, %v2389_v32, %v2387_v8  ;;  %v2487_v23 = vmul.f32 0.5, %v2486_v62  ;;  %vm2493_vm9 = vcmp.eq.f32.partialorder %v6966_v60, 0.0  ;;  %v2546_v59 = vand.u32 2147483647, %v2543_v61  ;;  %v1567_v8 = vpop.f32.mrf.mxu1 }
 0x2b1   : > { %v2392_v46 = vmul.f32 2.0, %v2390_v24  ;;  %v7009_v15 = vadd.f32 %v2595_v48, %v7880_v54  ;;  %v7012_v2 = vmul.f32 %v2595_v48, %v7880_v54  ;;  %v2643_v30 = vmul.f32 %v7881_v25, %v2595_v48 }
 0x2b2   : > { %v4490_v11 = vpop.eup %4489  ;;  %v2488_v20 = vsub.f32 1.5, %v2487_v23  ;;  %v2548_v38 = vmul.f32 0.5, %v2546_v59  ;;  %v7015_v49 = vadd.f32 %v2595_v48, %v2558_v51  ;;  %v2596_v35 = vmax.f32 %v2594_v12, 1e-07 }
 0x2b3   : > { %v2394_v39 = vsub.f32 %v6928_v45, %v2392_v46  ;;  %v2497_v40 = vmul.f32 %v4490_v11, %v6987_v6  ;;  %4493 = vrsqrt.f32 %v7012_v2  ;;  %v1566_v37 = vadd.f32 %v1565_v31, %v1516_v50  ;;  %v1616_v46 = vpop.f32.mrf.mxu2 }
 0x2b4   : > { %v4492_v55 = vpop.eup %4491  ;;  %v2489_v41 = vmul.f32 %v4486_v56, %v2488_v20  ;;  %v2494_v29 = vand.u32 2147483648, %v6966_v60  ;;  %v7022_v4 = vadd.f32 %v2548_v38, %v6970_v19  ;;  %v1664_v36 = vadd.f32 %v1663_v63, %v1614_v17  ;;  %v7883_v56 = vld [vmem:[#allocation60_spill] sm:$0xff]  ;;  %v1518_v31 = vpop.f32.mrf.mxu0 }
 0x2b5   : > { %v7024_v5 = vadd.f32 %v2394_v39, %v2319_v27  ;;  %v2498_v51 = vmul.f32 %v4490_v11, %v2497_v40  ;;  %v2545_v13 = vmul.f32 0.6931472, %v4492_v55  ;;  %4495 = vlog2.f32 %v2643_v30 }
 0x2b6   : > { %v2490_v45 = vmul.f32 %v2489_v41, %v6966_v60  ;;  %v7028_v7 = vadd.f32 %v2596_v35, %v7882_v21  ;;  %v7031_v33 = vmul.f32 %v2596_v35, %v7882_v21  ;;  %v2658_v32 = vmul.f32 %v7883_v56, %v2596_v35  ;;  %v1665_v54 = vpop.f32.mrf.mxu3  ;;  %v7884_v21 = vld [vmem:[#allocation45_spill] sm:$0xff] }
 0x2b7   : > { %v2499_v62 = vmul.f32 0.5, %v2498_v51  ;;  %v2547_v61 = vand.u32 2147483647, %v2545_v13  ;;  %v7034_v19 = vadd.f32 %v2596_v35, %v2559_v16  ;;  %v2708_v50 = vmul.f32 %v1566_v37, %v1566_v37 }
 0x2b8   : > { %v2492_v27 = vsel %vm2491_vm8, %v6966_v60, %v2490_v45  ;;  %vm2503_vm10 = vcmp.eq.f32.partialorder %v6987_v6, inf  ;;  %vm2505_vm11 = vcmp.eq.f32.partialorder %v6987_v6, 0.0  ;;  %4497 = vrsqrt.f32 %v7031_v33 }
 0x2b9   : > { %v4494_v48 = vpop.eup %4493  ;;  %v2495_v12 = vsel %vm2493_vm9, %v2494_v29, %v2492_v27  ;;  %v2500_v24 = vsub.f32 1.5, %v2499_v62  ;;  %v2506_v16 = vand.u32 2147483648, %v6987_v6  ;;  %v2549_v23 = vmul.f32 0.5, %v2547_v61 }
 0x2ba   : > { %v2508_v59 = vmul.f32 2.0, %v2495_v12  ;;  %v2602_v17 = vmul.f32 %v4494_v48, %v7012_v2  ;;  %4499 = vlog2.f32 %v2658_v32  ;;  %v2710_v63 = vadd.f32 %v2708_v50, %v6639_v18 }
 0x2bb   : > { %v4496_v25 = vpop.eup %4495  ;;  %v2501_v30 = vmul.f32 %v4490_v11, %v2500_v24  ;;  %v2565_v20 = vadd.f32 %v2549_v23, %v6994_v42  ;;  %v2709_v38 = vmul.f32 %v1664_v36, %v1664_v36  ;;  %v1568_v35 = vadd.f32 %v1567_v8, %v1518_v31 }
 0x2bc   : > { %v2510_v60 = vsub.f32 %v6963_v44, %v2508_v59  ;;  %v2603_v39 = vmul.f32 %v4494_v48, %v2602_v17  ;;  %v2660_v40 = vmul.f32 0.6931472, %v4496_v25  ;;  %v2712_v37 = vmax.f32 %v2710_v63, 1e-07 }
 0x2bd   : > { %v2502_v55 = vmul.f32 %v2501_v30, %v6987_v6  ;;  %v2711_v41 = vadd.f32 %v2709_v38, %v6648_v26  ;;  %v2825_v29 = vmul.f32 %v1568_v35, %v1568_v35  ;;  %v1666_v51 = vadd.f32 %v1665_v54, %v1616_v46  ;;  %v7885_v26 = vld [vmem:[#allocation63_spill] sm:$0xff] }
 0x2be   : > { %v4498_v18 = vpop.eup %4497  ;;  %v2552_v13 = vadd.f32 %v2510_v60, %v7002_v28  ;;  %v2604_v45 = vmul.f32 0.5, %v2603_v39  ;;  %v2663_v11 = vand.u32 2147483647, %v2660_v40  ;;  %v7053_v42 = vadd.f32 %v2712_v37, %v7884_v21  ;;  %v7886_v38 = vld [vmem:[#allocation47_spill] sm:$0xff]  ;;  %v7887_v60 = vld [vmem:[#allocation64_spill] sm:$0xff] }
 0x2bf   : > { %v2504_v44 = vsel %vm2503_vm10, %v6987_v6, %v2502_v55  ;;  %v2614_v36 = vmul.f32 %v4498_v18, %v7031_v33  ;;  %v7060_v56 = vmul.f32 %v2712_v37, %v7884_v21  ;;  %v2760_v32 = vmul.f32 %v7885_v26, %v2712_v37 }
 0x2c0   : > { %v4500_v62 = vpop.eup %4499  ;;  %v2507_v28 = vsel %vm2505_vm11, %v2506_v16, %v2504_v44  ;;  %v2605_v61 = vsub.f32 1.5, %v2604_v45  ;;  %v2665_v50 = vmul.f32 0.5, %v2663_v11  ;;  %v2792_v27 = vadd.f32 %v2712_v37, %v7015_v49  ;;  %v1570_v45 = vpop.f32.mrf.mxu1 }
 0x2c1   : > { %v2509_v31 = vmul.f32 2.0, %v2507_v28  ;;  %v2615_v8 = vmul.f32 %v4498_v18, %v2614_v36  ;;  %v2662_v12 = vmul.f32 0.6931472, %v4500_v62  ;;  %4501 = vrsqrt.f32 %v7060_v56 }
 0x2c2   : > { %v2606_v24 = vmul.f32 %v4494_v48, %v2605_v61  ;;  %vm2608_vm12 = vcmp.eq.f32.partialorder %v7012_v2, inf  ;;  %vm2610_vm13 = vcmp.eq.f32.partialorder %v7012_v2, 0.0  ;;  %v7070_v23 = vadd.f32 %v2665_v50, %v7022_v4  ;;  %v7888_v50 = vld [vmem:[#allocation49_spill] sm:$0xff] }
 0x2c3   : > { %v2511_v6 = vsub.f32 %v6984_v53, %v2509_v31  ;;  %v2611_v16 = vand.u32 2147483648, %v7012_v2  ;;  %v2616_v59 = vmul.f32 0.5, %v2615_v8  ;;  %v2664_v17 = vand.u32 2147483647, %v2662_v12 }
 0x2c4   : > { %v2607_v49 = vmul.f32 %v2606_v24, %v7012_v2  ;;  %4503 = vlog2.f32 %v2760_v32  ;;  %v2713_v63 = vmax.f32 %v2711_v41, 1e-07  ;;  %v2827_v46 = vadd.f32 %v2825_v29, %v6652_v9  ;;  %v7889_v24 = vld [vmem:[#allocation10_spill] sm:$0xff] }
 0x2c5   : > { %v2553_v48 = vadd.f32 %v2511_v6, %v7024_v5  ;;  %v2617_v54 = vsub.f32 1.5, %v2616_v59  ;;  %v2666_v25 = vmul.f32 0.5, %v2664_v17  ;;  %v2826_v30 = vmul.f32 %v1666_v51, %v1666_v51  ;;  %v1521_v51 = vpop.f32.mrf.mxu0  ;;  %v1619_v6 = vpop.f32.mrf.mxu2 }
 0x2c6   : > { %v2609_v4 = vsel %vm2608_vm12, %v7012_v2, %v2607_v49  ;;  %v7079_v35 = vadd.f32 %v2713_v63, %v7886_v38  ;;  %v7082_v53 = vmul.f32 %v2713_v63, %v7886_v38  ;;  %v2775_v39 = vmul.f32 %v7887_v60, %v2713_v63 }
 0x2c7   : > { %v4502_v40 = vpop.eup %4501  ;;  %v2612_v37 = vsel %vm2610_vm13, %v2611_v16, %v2609_v4  ;;  %v2618_v9 = vmul.f32 %v4498_v18, %v2617_v54  ;;  %v7087_v55 = vadd.f32 %v2666_v25, %v2565_v20  ;;  %v2793_v5 = vadd.f32 %v2713_v63, %v7034_v19 }
 0x2c8   : > { %v2625_v41 = vmul.f32 2.0, %v2612_v37  ;;  %vm2620_vm15 = vcmp.eq.f32.partialorder %v7031_v33, inf  ;;  %v2719_v29 = vmul.f32 %v4502_v40, %v7060_v56  ;;  %4505 = vrsqrt.f32 %v7082_v53 }
 0x2c9   : > { %v2619_v11 = vmul.f32 %v2618_v9, %v7031_v33  ;;  %vm2622_vm0 = vcmp.eq.f32.partialorder %v7031_v33, 0.0  ;;  %v2623_v2 = vand.u32 2147483648, %v7031_v33  ;;  %4507 = vlog2.f32 %v2775_v39 }
 0x2ca   : > { %v4504_v20 = vpop.eup %4503  ;;  %v2627_v18 = vsub.f32 %v7009_v15, %v2625_v41  ;;  %v2720_v19 = vmul.f32 %v4502_v40, %v2719_v29  ;;  %v2829_v21 = vmax.f32 %v2827_v46, 1e-07  ;;  %v2828_v44 = vadd.f32 %v2826_v30, %v6685_v34  ;;  %v7890_v41 = vld [vmem:[#allocation52_spill] sm:$0xff] }
 0x2cb   : > { %v2621_v36 = vsel %vm2620_vm15, %v7031_v33, %v2619_v11  ;;  %vm2725_vm1 = vcmp.eq.f32.partialorder %v7060_v56, inf  ;;  %v2777_v26 = vmul.f32 0.6931472, %v4504_v20  ;;  %v1571_v32 = vadd.f32 %v1570_v45, %v1521_v51  ;;  %v1668_v33 = vpop.f32.mrf.mxu3  ;;  %v7891_v45 = vld [vmem:[#allocation19_spill] sm:$0xff] }
 0x2cc   : > { %v7100_v62 = vadd.f32 %v2627_v18, %v2552_v13  ;;  %v2624_v28 = vsel %vm2622_vm0, %v2623_v2, %v2621_v36  ;;  %v2721_v61 = vmul.f32 0.5, %v2720_v19  ;;  %v7103_v31 = vadd.f32 %v2829_v21, %v7888_v50 }
 0x2cd   : > { %v2626_v8 = vmul.f32 2.0, %v2624_v28  ;;  %v2780_v12 = vand.u32 2147483647, %v2777_v26  ;;  %v7106_v15 = vmul.f32 %v2829_v21, %v7888_v50  ;;  %v2877_v34 = vmul.f32 %v7889_v24, %v2829_v21 }
 0x2ce   : > { %v4506_v16 = vpop.eup %4505  ;;  %v2722_v59 = vsub.f32 1.5, %v2721_v61  ;;  %vm2727_vm2 = vcmp.eq.f32.partialorder %v7060_v56, 0.0  ;;  %v2909_v13 = vadd.f32 %v2829_v21, %v2792_v27  ;;  %v2830_v17 = vmax.f32 %v2828_v44, 1e-07  ;;  %v7892_v21 = vld [vmem:[#allocation20_spill] sm:$0xff] }
 0x2cf   : > { %v4508_v49 = vpop.eup %4507  ;;  %v2628_v63 = vsub.f32 %v7028_v7, %v2626_v8  ;;  %v2782_v46 = vmul.f32 0.5, %v2780_v12  ;;  %v2731_v54 = vmul.f32 %v4506_v16, %v7082_v53  ;;  %4509 = vrsqrt.f32 %v7106_v15 }
 0x2d0   : > { %v2723_v25 = vmul.f32 %v4502_v40, %v2722_v59  ;;  %v2779_v30 = vmul.f32 0.6931472, %v4508_v49  ;;  %v2942_v4 = vmul.f32 %v1571_v32, %v1571_v32  ;;  %v1669_v38 = vadd.f32 %v1668_v33, %v1619_v6  ;;  %v1572_v6 = vpop.f32.mrf.mxu1 }
 0x2d1   : > { %v7113_v60 = vadd.f32 %v2628_v63, %v2553_v48  ;;  %v2728_v39 = vand.u32 2147483648, %v7060_v56  ;;  %v7117_v37 = vadd.f32 %v2782_v46, %v7070_v23  ;;  %v2732_v27 = vmul.f32 %v4506_v16, %v2731_v54  ;;  %v7894_v63 = vld [vmem:[#allocation22_spill] sm:$0xff] }
 0x2d2   : > { %v2724_v9 = vmul.f32 %v2723_v25, %v7060_v56  ;;  %v2781_v7 = vand.u32 2147483647, %v2779_v30  ;;  %4511 = vlog2.f32 %v2877_v34  ;;  %v7121_v29 = vadd.f32 %v2830_v17, %v7890_v41  ;;  %v1523_v34 = vpop.f32.mrf.mxu0 }
 0x2d3   : > { %v2733_v51 = vmul.f32 0.5, %v2732_v27  ;;  %v7124_v40 = vmul.f32 %v2830_v17, %v7890_v41  ;;  %v2892_v48 = vmul.f32 %v7891_v45, %v2830_v17  ;;  %v7127_v11 = vadd.f32 %v2830_v17, %v2793_v5  ;;  %v1621_v27 = vpop.f32.mrf.mxu2 }
 0x2d4   : > { %v2726_v23 = vsel %vm2725_vm1, %v7060_v56, %v2724_v9  ;;  %v2783_v2 = vmul.f32 0.5, %v2781_v7  ;;  %v2944_v20 = vadd.f32 %v2942_v4, %v6689_v57  ;;  %v2943_v18 = vmul.f32 %v1669_v38, %v1669_v38 }
 0x2d5   : > { %v4510_v19 = vpop.eup %4509  ;;  %v7135_v44 = vmul.f32 %v7892_v21, %v7892_v21  ;;  %v2729_v36 = vsel %vm2727_vm2, %v2728_v39, %v2726_v23  ;;  %v2734_v26 = vsub.f32 1.5, %v2733_v51  ;;  %4513 = vrsqrt.f32 %v7124_v40 }
 0x2d6   : > { %v2742_v5 = vmul.f32 2.0, %v2729_v36  ;;  %vm2737_vm3 = vcmp.eq.f32.partialorder %v7082_v53, inf  ;;  %v7142_v32 = vadd.f32 %v2783_v2, %v7087_v55  ;;  %v2836_v57 = vmul.f32 %v4510_v19, %v7106_v15 }
 0x2d7   : > { %v2735_v28 = vmul.f32 %v4506_v16, %v2734_v26  ;;  %vm2739_vm4 = vcmp.eq.f32.partialorder %v7082_v53, 0.0  ;;  %4515 = vlog2.f32 %v2892_v48  ;;  %v2946_v61 = vmax.f32 %v2944_v20, 1e-07  ;;  %v7893_v16 = vld [vmem:[#allocation53_spill] sm:$0xff] }
 0x2d8   : > { %v4512_v50 = vpop.eup %4511  ;;  %v2744_v56 = vsub.f32 %v7053_v42, %v2742_v5  ;;  %v2740_v8 = vand.u32 2147483648, %v7082_v53  ;;  %v2837_v12 = vmul.f32 %v4510_v19, %v2836_v57  ;;  %v2945_v24 = vadd.f32 %v2943_v18, %v6695_v52  ;;  %v7895_v57 = vld [vmem:[#allocation55_spill] sm:$0xff] }
 0x2d9   : > { %v2736_v55 = vmul.f32 %v2735_v28, %v7082_v53  ;;  %vm2842_vm5 = vcmp.eq.f32.partialorder %v7106_v15, inf  ;;  %v2894_v33 = vmul.f32 0.6931472, %v4512_v50  ;;  %v7152_v59 = vadd.f32 %v2946_v61, %v7893_v16 }
 0x2da   : > { %v7155_v17 = vmul.f32 %v2946_v61, %v7893_v16  ;;  %v7158_v42 = vadd.f32 %v2744_v56, %v7100_v62  ;;  %v2838_v49 = vmul.f32 0.5, %v2837_v12  ;;  %v2994_v46 = vmul.f32 %v7894_v63, %v2946_v61  ;;  %v7896_v56 = vld [vmem:[#allocation8_spill] sm:$0xff] }
 0x2db   : > { %v7161_v52 = vadd.f32 %v2946_v61, %v2909_v13  ;;  %v4514_v54 = vpop.eup %4513  ;;  %v2738_v25 = vsel %vm2737_vm3, %v7082_v53, %v2736_v55  ;;  %v2897_v30 = vand.u32 2147483647, %v2894_v33  ;;  %v1573_v4 = vadd.f32 %v1572_v6, %v1523_v34  ;;  %v1670_v13 = vpop.f32.mrf.mxu3 }
 0x2dc   : > { %4517 = vrsqrt.f32 %v7155_v17  ;;  %v2741_v38 = vsel %vm2739_vm4, %v2740_v8, %v2738_v25  ;;  %v2839_v39 = vsub.f32 1.5, %v2838_v49  ;;  %vm2844_vm6 = vcmp.eq.f32.partialorder %v7106_v15, 0.0 }
 0x2dd   : > { %v2848_v62 = vmul.f32 %v4514_v54, %v7124_v40  ;;  %v4516_v9 = vpop.eup %4515  ;;  %v2743_v7 = vmul.f32 2.0, %v2741_v38  ;;  %v2845_v41 = vand.u32 2147483648, %v7106_v15  ;;  %v2899_v51 = vmul.f32 0.5, %v2897_v30  ;;  %v1526_v38 = vpop.f32.mrf.mxu0 }
 0x2de   : > { %4519 = vlog2.f32 %v2994_v46  ;;  %v2840_v45 = vmul.f32 %v4510_v19, %v2839_v39  ;;  %v2896_v23 = vmul.f32 0.6931472, %v4516_v9  ;;  %v2947_v2 = vmax.f32 %v2945_v24, 1e-07  ;;  %v1575_v39 = vpop.f32.mrf.mxu1 }
 0x2df   : > { %v2849_v48 = vmul.f32 %v4514_v54, %v2848_v62  ;;  %v2745_v53 = vsub.f32 %v7079_v35, %v2743_v7  ;;  %v2915_v20 = vadd.f32 %v2899_v51, %v7117_v37  ;;  %v3059_v18 = vmul.f32 %v1573_v4, %v1573_v4 }
 0x2e0   : > { %v1671_v21 = vadd.f32 %v1670_v13, %v1621_v27  ;;  %v2841_v36 = vmul.f32 %v2840_v45, %v7106_v15  ;;  %v2898_v5 = vand.u32 2147483647, %v2896_v23  ;;  %v7176_v28 = vadd.f32 %v2947_v2, %v7895_v57 }
 0x2e1   : > { %v2850_v26 = vmul.f32 0.5, %v2849_v48  ;;  %v2787_v50 = vadd.f32 %v2745_v53, %v7113_v60  ;;  %v7180_v19 = vmul.f32 %v2947_v2, %v7895_v57  ;;  %v3009_v8 = vmul.f32 %v7896_v56, %v2947_v2 }
 0x2e2   : > { %v4518_v61 = vpop.eup %4517  ;;  %v7184_v35 = vadd.f32 %v2947_v2, %v7127_v11  ;;  %v2843_v37 = vsel %vm2842_vm5, %v7106_v15, %v2841_v36  ;;  %v2900_v24 = vmul.f32 0.5, %v2898_v5  ;;  %vm2854_vm7 = vcmp.eq.f32.partialorder %v7124_v40, inf  ;;  %v7898_v2 = vld [vmem:[#allocation21_spill] sm:$0xff] }
 0x2e3   : > { %v2851_v12 = vsub.f32 1.5, %v2850_v26  ;;  %v2953_v34 = vmul.f32 %v4518_v61, %v7155_v17  ;;  %v2846_v60 = vsel %vm2844_vm6, %v2845_v41, %v2843_v37  ;;  %vm2856_vm8 = vcmp.eq.f32.partialorder %v7124_v40, 0.0  ;;  %v7897_v41 = vld [vmem:[#allocation57_spill] sm:$0xff] }
 0x2e4   : > { %v4520_v6 = vpop.eup %4519  ;;  %4521 = vrsqrt.f32 %v7180_v19  ;;  %v2859_v11 = vmul.f32 2.0, %v2846_v60  ;;  %v7196_v33 = vadd.f32 %v2900_v24, %v7142_v32  ;;  %v2857_v49 = vand.u32 2147483648, %v7124_v40  ;;  %v7899_v60 = vld [vmem:[#allocation59_spill] sm:$0xff] }
 0x2e5   : > { %v2852_v55 = vmul.f32 %v4514_v54, %v2851_v12  ;;  %v2954_v16 = vmul.f32 %v4518_v61, %v2953_v34  ;;  %v3011_v63 = vmul.f32 0.6931472, %v4520_v6  ;;  %4523 = vlog2.f32 %v3009_v8 }
 0x2e6   : > { %v3061_v46 = vadd.f32 %v3059_v18, %v6708_v47  ;;  %v2861_v15 = vsub.f32 %v7103_v31, %v2859_v11  ;;  %v3060_v4 = vmul.f32 %v1671_v21, %v1671_v21  ;;  %vm2959_vm9 = vcmp.eq.f32.partialorder %v7155_v17, inf  ;;  %v1624_v18 = vpop.f32.mrf.mxu2  ;;  %v1673_v21 = vpop.f32.mrf.mxu3 }
 0x2e7   : > { %v2853_v25 = vmul.f32 %v2852_v55, %v7124_v40  ;;  %v2955_v30 = vmul.f32 0.5, %v2954_v16  ;;  %vm2961_vm10 = vcmp.eq.f32.partialorder %v7155_v17, 0.0  ;;  %v3014_v32 = vand.u32 2147483647, %v3011_v63 }
 0x2e8   : > { %v3063_v54 = vmax.f32 %v3061_v46, 1e-07  ;;  %v2903_v62 = vadd.f32 %v2861_v15, %v7158_v42  ;;  %v3062_v31 = vadd.f32 %v3060_v4, %v6712_v0  ;;  %v2962_v36 = vand.u32 2147483648, %v7155_v17  ;;  %v1528_v46 = vpop.f32.mrf.mxu0  ;;  %v1577_v15 = vpop.f32.mrf.mxu1 }
 0x2e9   : > { %v2855_v47 = vsel %vm2854_vm7, %v7124_v40, %v2853_v25  ;;  %v2956_v27 = vsub.f32 1.5, %v2955_v30  ;;  %v3016_v7 = vmul.f32 0.5, %v3014_v32  ;;  %v1576_v26 = vadd.f32 %v1575_v39, %v1526_v38 }
 0x2ea   : > { %v4522_v13 = vpop.eup %4521  ;;  %v2858_v9 = vsel %vm2856_vm8, %v2857_v49, %v2855_v47  ;;  %v7212_v51 = vadd.f32 %v3063_v54, %v7897_v41  ;;  %v7215_v45 = vmul.f32 %v3063_v54, %v7897_v41  ;;  %v3111_v53 = vmul.f32 %v7898_v2, %v3063_v54 }
 0x2eb   : > { %v2860_v48 = vmul.f32 2.0, %v2858_v9  ;;  %v2957_v42 = vmul.f32 %v4518_v61, %v2956_v27  ;;  %v2965_v23 = vmul.f32 %v4522_v13, %v7180_v19  ;;  %v4524_v0 = vpop.eup %4523  ;;  %v7220_v40 = vadd.f32 %v3016_v7, %v2915_v20 }
 0x2ec   : > { %4525 = vrsqrt.f32 %v7215_v45  ;;  %v3013_v61 = vmul.f32 0.6931472, %v4524_v0  ;;  %v3143_v8 = vadd.f32 %v3063_v54, %v7161_v52  ;;  %v3064_v37 = vmax.f32 %v3062_v31, 1e-07 }
 0x2ed   : > { %v2862_v5 = vsub.f32 %v7121_v29, %v2860_v48  ;;  %v2958_v57 = vmul.f32 %v2957_v42, %v7155_v17  ;;  %v2966_v56 = vmul.f32 %v4522_v13, %v2965_v23  ;;  %4527 = vlog2.f32 %v3111_v53 }
 0x2ee   : > { %v1674_v12 = vadd.f32 %v1673_v21, %v1624_v18  ;;  %v3015_v6 = vand.u32 2147483647, %v3013_v61  ;;  %v7234_v11 = vadd.f32 %v3064_v37, %v7899_v60  ;;  %v7237_v55 = vmul.f32 %v3064_v37, %v7899_v60  ;;  %v1626_v21 = vpop.f32.mrf.mxu2  ;;  %v1675_v0 = vpop.f32.mrf.mxu3 }
 0x2ef   : > { %v7226_v24 = vadd.f32 %v2862_v5, %v2787_v50  ;;  %v2960_v20 = vsel %vm2959_vm9, %v7155_v17, %v2958_v57  ;;  %v2967_v34 = vmul.f32 0.5, %v2966_v56  ;;  %v3126_v52 = vmul.f32 %v6428_v14, %v3064_v37  ;;  %v7900_v57 = vld [vmem:[#allocation68_spill] sm:$0xff] }
 0x2f0   : > { %v2963_v29 = vsel %vm2961_vm10, %v2962_v36, %v2960_v20  ;;  %v3017_v49 = vmul.f32 0.5, %v3015_v6  ;;  %v7241_v63 = vadd.f32 %v3064_v37, %v7184_v35  ;;  %v7245_v17 = vmul.f32 %v6443_v3, %v6443_v3 }
 0x2f1   : > { %v2976_v16 = vmul.f32 2.0, %v2963_v29  ;;  %v2968_v50 = vsub.f32 1.5, %v2967_v34  ;;  %vm2971_vm11 = vcmp.eq.f32.partialorder %v7180_v19, inf  ;;  %vm2973_vm12 = vcmp.eq.f32.partialorder %v7180_v19, 0.0 }
 0x2f2   : > { %v4526_v25 = vpop.eup %4525  ;;  %4529 = vrsqrt.f32 %v7237_v55  ;;  %v7252_v4 = vadd.f32 %v3017_v49, %v7196_v33  ;;  %v3176_v39 = vmul.f32 %v1576_v26, %v1576_v26  ;;  %v3177_v32 = vmul.f32 %v1674_v12, %v1674_v12 }
 0x2f3   : > { %v2978_v14 = vsub.f32 %v7152_v59, %v2976_v16  ;;  %v2969_v30 = vmul.f32 %v4522_v13, %v2968_v50  ;;  %v3070_v35 = vmul.f32 %v4526_v25, %v7215_v45  ;;  %v4528_v38 = vpop.eup %4527  ;;  %4531 = vlog2.f32 %v3126_v52 }
 0x2f4   : > { %v1578_v3 = vadd.f32 %v1577_v15, %v1528_v46  ;;  %v3128_v31 = vmul.f32 0.6931472, %v4528_v38  ;;  %v2974_v9 = vand.u32 2147483648, %v7180_v19  ;;  %vm3076_vm13 = vcmp.eq.f32.partialorder %v7215_v45, inf  ;;  %v7902_v15 = vld [vmem:[#allocation69_spill] sm:$0xff] }
 0x2f5   : > { %v7255_v54 = vadd.f32 %v2978_v14, %v2903_v62  ;;  %v2970_v47 = vmul.f32 %v2969_v30, %v7180_v19  ;;  %v3071_v27 = vmul.f32 %v4526_v25, %v3070_v35  ;;  %v3178_v59 = vadd.f32 %v3176_v39, %v6716_v58  ;;  %v1531_v14 = vpop.f32.mrf.mxu0 }
 0x2f6   : > { %v3179_v33 = vadd.f32 %v3177_v32, %v6721_v1  ;;  %vm3078_vm15 = vcmp.eq.f32.partialorder %v7215_v45, 0.0  ;;  %v3131_v62 = vand.u32 2147483647, %v3128_v31  ;;  %v3293_v2 = vmul.f32 %v1578_v3, %v1578_v3 }
 0x2f7   : > { %v2972_v13 = vsel %vm2971_vm11, %v7180_v19, %v2970_v47  ;;  %v3072_v7 = vmul.f32 0.5, %v3071_v27  ;;  %v3180_v42 = vmax.f32 %v3178_v59, 1e-07  ;;  %v3079_v34 = vand.u32 2147483648, %v7215_v45 }
 0x2f8   : > { %v4530_v41 = vpop.eup %4529  ;;  %v2975_v48 = vsel %vm2973_vm12, %v2974_v9, %v2972_v13  ;;  %v3181_v23 = vmax.f32 %v3179_v33, 1e-07  ;;  %v3133_v58 = vmul.f32 0.5, %v3131_v62  ;;  %v1676_v29 = vadd.f32 %v1675_v0, %v1626_v21  ;;  %v7903_v13 = vld [vmem:[#allocation62_spill] sm:$0xff] }
 0x2f9   : > { %v2977_v53 = vmul.f32 2.0, %v2975_v48  ;;  %v3073_v18 = vsub.f32 1.5, %v3072_v7  ;;  %v3082_v1 = vmul.f32 %v4530_v41, %v7237_v55  ;;  %v4532_v36 = vpop.eup %4531  ;;  %v7270_v26 = vadd.f32 %v3180_v42, %v6118_v10 }
 0x2fa   : > { %v7273_v5 = vmul.f32 %v3180_v42, %v6118_v10  ;;  %v3228_v19 = vmul.f32 %v7900_v57, %v3180_v42  ;;  %v3260_v56 = vadd.f32 %v3180_v42, %v3143_v8  ;;  %v7278_v12 = vadd.f32 %v3133_v58, %v7220_v40 }
 0x2fb   : > { %v2979_v61 = vsub.f32 %v7176_v28, %v2977_v53  ;;  %v3074_v37 = vmul.f32 %v4526_v25, %v3073_v18  ;;  %v3083_v20 = vmul.f32 %v4530_v41, %v3082_v1  ;;  %v3130_v6 = vmul.f32 0.6931472, %v4532_v36  ;;  %v7901_v28 = vld [vmem:[#allocation61_spill] sm:$0xff] }
 0x2fc   : > { %4533 = vrsqrt.f32 %v7273_v5  ;;  %v3295_v8 = vadd.f32 %v3293_v2, %v6843_v22  ;;  %v7286_v50 = vadd.f32 %v3181_v23, %v7901_v28  ;;  %v7289_v40 = vmul.f32 %v3181_v23, %v7901_v28  ;;  %v1580_v22 = vpop.f32.mrf.mxu1 }
 0x2fd   : > { %v3021_v60 = vadd.f32 %v2979_v61, %v7226_v24  ;;  %v3075_v10 = vmul.f32 %v3074_v37, %v7215_v45  ;;  %v3084_v52 = vmul.f32 0.5, %v3083_v20  ;;  %v3132_v16 = vand.u32 2147483647, %v3130_v6 }
 0x2fe   : > { %4535 = vlog2.f32 %v3228_v19  ;;  %v3243_v24 = vmul.f32 %v7902_v15, %v3181_v23  ;;  %v7296_v25 = vadd.f32 %v3181_v23, %v7241_v63  ;;  %vm3088_vm0 = vcmp.eq.f32.partialorder %v7237_v55, inf }
 0x2ff   : > { %v3077_v49 = vsel %vm3076_vm13, %v7215_v45, %v3075_v10  ;;  %v3085_v46 = vsub.f32 1.5, %v3084_v52  ;;  %v3134_v35 = vmul.f32 0.5, %v3132_v16  ;;  %4537 = vrsqrt.f32 %v7289_v40  ;;  %v1678_v16 = vpop.f32.mrf.mxu3 }
 0x300   : > { %v3080_v30 = vsel %vm3078_vm15, %v3079_v34, %v3077_v49  ;;  %vm3090_vm1 = vcmp.eq.f32.partialorder %v7237_v55, 0.0  ;;  %v3091_v32 = vand.u32 2147483648, %v7237_v55  ;;  %4539 = vlog2.f32 %v3243_v24  ;;  %v7905_v49 = vld [vmem:[#allocation16_spill] sm:$0xff] }
 0x301   : > { %v3093_v38 = vmul.f32 2.0, %v3080_v30  ;;  %v3086_v39 = vmul.f32 %v4530_v41, %v3085_v46  ;;  %v7305_v63 = vadd.f32 %v3134_v35, %v7252_v4  ;;  %v3297_v47 = vmax.f32 %v3295_v8, 1e-07  ;;  %v7904_v41 = vld [vmem:[#allocation71_spill] sm:$0xff]  ;;  %v7906_v24 = vld [vmem:[#allocation72_spill] sm:$0xff] }
 0x302   : > { %v4534_v3 = vpop.eup %4533  ;;  %v1581_v27 = vadd.f32 %v1580_v22, %v1531_v14  ;;  %v3294_v59 = vmul.f32 %v1676_v29, %v1676_v29  ;;  %vm3193_vm2 = vcmp.eq.f32.partialorder %v7273_v5, inf  ;;  %vm3195_vm3 = vcmp.eq.f32.partialorder %v7273_v5, 0.0 }
 0x303   : > { %v3095_v45 = vsub.f32 %v7212_v51, %v3093_v38  ;;  %v3087_v31 = vmul.f32 %v3086_v39, %v7237_v55  ;;  %v3187_v9 = vmul.f32 %v4534_v3, %v7273_v5  ;;  %v7311_v7 = vadd.f32 %v3297_v47, %v7903_v13 }
 0x304   : > { %v4536_v33 = vpop.eup %4535  ;;  %v7314_v62 = vmul.f32 %v3297_v47, %v7903_v13  ;;  %v3345_v4 = vmul.f32 %v7904_v41, %v3297_v47  ;;  %v7317_v48 = vadd.f32 %v3297_v47, %v3260_v56  ;;  %v3410_v58 = vmul.f32 %v1581_v27, %v1581_v27  ;;  %v7907_v41 = vld [vmem:[#allocation17_spill] sm:$0xff] }
 0x305   : > { %v7320_v42 = vadd.f32 %v3095_v45, %v7255_v54  ;;  %v3089_v51 = vsel %vm3088_vm0, %v7237_v55, %v3087_v31  ;;  %v3188_v23 = vmul.f32 %v4534_v3, %v3187_v9  ;;  %v3245_v2 = vmul.f32 0.6931472, %v4536_v33  ;;  %v4538_v53 = vpop.eup %4537 }
 0x306   : > { %v3092_v18 = vsel %vm3090_vm1, %v3091_v32, %v3089_v51  ;;  %4541 = vrsqrt.f32 %v7314_v62  ;;  %v3199_v54 = vmul.f32 %v4538_v53, %v7289_v40  ;;  %v4540_v36 = vpop.eup %4539  ;;  %v3196_v57 = vand.u32 2147483648, %v7273_v5 }
 0x307   : > { %v3094_v1 = vmul.f32 2.0, %v3092_v18  ;;  %v3189_v21 = vmul.f32 0.5, %v3188_v23  ;;  %v3248_v0 = vand.u32 2147483647, %v3245_v2  ;;  %4543 = vlog2.f32 %v3345_v4  ;;  %v7908_v23 = vld [vmem:[#allocation73_spill] sm:$0xff] }
 0x308   : > { %v3296_v19 = vadd.f32 %v3294_v59, %v6858_v43  ;;  %v3200_v37 = vmul.f32 %v4538_v53, %v3199_v54  ;;  %vm3205_vm4 = vcmp.eq.f32.partialorder %v7289_v40, inf  ;;  %v3247_v20 = vmul.f32 0.6931472, %v4540_v36  ;;  %v1629_v43 = vpop.f32.mrf.mxu2  ;;  %v1582_v36 = vpop.f32.mrf.mxu1 }
 0x309   : > { %v3096_v55 = vsub.f32 %v7234_v11, %v3094_v1  ;;  %v3190_v56 = vsub.f32 1.5, %v3189_v21  ;;  %v3250_v61 = vmul.f32 0.5, %v3248_v0  ;;  %v3412_v6 = vadd.f32 %v3410_v58, %v7135_v44  ;;  %v7909_v21 = vld [vmem:[#allocation29_spill] sm:$0xff] }
 0x30a   : > { %v3298_v34 = vmax.f32 %v3296_v19, 1e-07  ;;  %v3201_v8 = vmul.f32 0.5, %v3200_v37  ;;  %vm3207_vm5 = vcmp.eq.f32.partialorder %v7289_v40, 0.0  ;;  %v3249_v28 = vand.u32 2147483647, %v3247_v20 }
 0x30b   : > { %v7336_v29 = vadd.f32 %v3096_v55, %v3021_v60  ;;  %v3191_v10 = vmul.f32 %v4534_v3, %v3190_v56  ;;  %v3266_v52 = vadd.f32 %v3250_v61, %v7278_v12  ;;  %v3208_v35 = vand.u32 2147483648, %v7289_v40  ;;  %v1680_v61 = vpop.f32.mrf.mxu3 }
 0x30c   : > { %v4542_v11 = vpop.eup %4541  ;;  %v7341_v46 = vadd.f32 %v3298_v34, %v7905_v49  ;;  %v7344_v15 = vmul.f32 %v3298_v34, %v7905_v49  ;;  %v3360_v44 = vmul.f32 %v7906_v24, %v3298_v34  ;;  %v3202_v14 = vsub.f32 1.5, %v3201_v8 }
 0x30d   : > { %v3192_v60 = vmul.f32 %v3191_v10, %v7273_v5  ;;  %v3304_v12 = vmul.f32 %v4542_v11, %v7314_v62  ;;  %v7350_v22 = vadd.f32 %v3298_v34, %v7296_v25  ;;  %v4544_v30 = vpop.eup %4543  ;;  %v3251_v38 = vmul.f32 0.5, %v3249_v28 }
 0x30e   : > { %4545 = vrsqrt.f32 %v7344_v15  ;;  %v3414_v39 = vmax.f32 %v3412_v6, 1e-07  ;;  %v3203_v3 = vmul.f32 %v4538_v53, %v3202_v14  ;;  %v3362_v27 = vmul.f32 0.6931472, %v4544_v30 }
 0x30f   : > { %v3194_v32 = vsel %vm3193_vm2, %v7273_v5, %v3192_v60  ;;  %v3305_v47 = vmul.f32 %v4542_v11, %v3304_v12  ;;  %v3267_v25 = vadd.f32 %v3251_v38, %v7305_v63  ;;  %4547 = vlog2.f32 %v3360_v44 }
 0x310   : > { %v3197_v45 = vsel %vm3195_vm3, %v3196_v57, %v3194_v32  ;;  %v1679_v31 = vadd.f32 %v1678_v16, %v1629_v43  ;;  %v3204_v59 = vmul.f32 %v3203_v3, %v7289_v40  ;;  %v3365_v13 = vand.u32 2147483647, %v3362_v27  ;;  %v1631_v56 = vpop.f32.mrf.mxu2  ;;  %v7910_v32 = vld [vmem:[#allocation18_spill] sm:$0xff]  ;;  %v7911_v27 = vld [vmem:[#allocation75_spill] sm:$0xff] }
 0x311   : > { %v3210_v9 = vmul.f32 2.0, %v3197_v45  ;;  %v3306_v33 = vmul.f32 0.5, %v3305_v47  ;;  %v7362_v4 = vadd.f32 %v3414_v39, %v7907_v41  ;;  %v7365_v51 = vmul.f32 %v3414_v39, %v7907_v41 }
 0x312   : > { %v3462_v2 = vmul.f32 %v7908_v23, %v3414_v39  ;;  %v7369_v5 = vadd.f32 %v3414_v39, %v7317_v48  ;;  %v3206_v53 = vsel %vm3205_vm4, %v7289_v40, %v3204_v59  ;;  %v3367_v58 = vmul.f32 0.5, %v3365_v13  ;;  %v1533_v48 = vpop.f32.mrf.mxu0 }
 0x313   : > { %v3212_v63 = vsub.f32 %v7270_v26, %v3210_v9  ;;  %v3307_v18 = vsub.f32 1.5, %v3306_v33  ;;  %v3525_v0 = vmul.f32 %v7909_v21, %v7909_v21  ;;  %v3209_v54 = vsel %vm3207_vm5, %v3208_v35, %v3206_v53  ;;  %v7912_v33 = vld [vmem:[#allocation70_spill] sm:$0xff] }
 0x314   : > { %v4546_v1 = vpop.eup %4545  ;;  %vm3310_vm6 = vcmp.eq.f32.partialorder %v7314_v62, inf  ;;  %4549 = vrsqrt.f32 %v7365_v51  ;;  %v3211_v57 = vmul.f32 2.0, %v3209_v54  ;;  %v3383_v55 = vadd.f32 %v3367_v58, %v3266_v52  ;;  %v7913_v54 = vld [vmem:[#allocation11_spill] sm:$0xff] }
 0x315   : > { %v3254_v26 = vadd.f32 %v3212_v63, %v7320_v42  ;;  %v3308_v19 = vmul.f32 %v4542_v11, %v3307_v18  ;;  %v4548_v37 = vpop.eup %4547  ;;  %vm3312_vm7 = vcmp.eq.f32.partialorder %v7314_v62, 0.0  ;;  %v3316_v20 = vmul.f32 %v4546_v1, %v7344_v15 }
 0x316   : > { %4551 = vlog2.f32 %v3462_v2  ;;  %v3411_v40 = vmul.f32 %v1679_v31, %v1679_v31  ;;  %v3213_v34 = vsub.f32 %v7286_v50, %v3211_v57  ;;  %v3364_v10 = vmul.f32 0.6931472, %v4548_v37 }
 0x317   : > { %v3309_v6 = vmul.f32 %v3308_v19, %v7314_v62  ;;  %v1583_v8 = vadd.f32 %v1582_v36, %v1533_v48  ;;  %v3313_v42 = vand.u32 2147483648, %v7314_v62  ;;  %v3317_v43 = vmul.f32 %v4546_v1, %v3316_v20 }
 0x318   : > { %v3413_v52 = vadd.f32 %v3411_v40, %v7245_v17  ;;  %v1681_v16 = vadd.f32 %v1680_v61, %v1631_v56  ;;  %v7389_v11 = vadd.f32 %v3213_v34, %v7336_v29  ;;  %v3366_v49 = vand.u32 2147483647, %v3364_v10  ;;  %v7915_v40 = vld [vmem:[#allocation25_spill] sm:$0xff] }
 0x319   : > { %v3311_v28 = vsel %vm3310_vm6, %v7314_v62, %v3309_v6  ;;  %v3527_v24 = vmul.f32 %v1583_v8, %v1583_v8  ;;  %v3318_v60 = vmul.f32 0.5, %v3317_v43  ;;  %v3526_v13 = vmul.f32 %v7912_v33, %v7912_v33  ;;  %v7918_v8 = vld [vmem:[#allocation12_spill] sm:$0xff]  ;;  %v7921_v43 = vld [vmem:[#allocation74_spill] sm:$0xff] }
 0x31a   : > { %v4550_v50 = vpop.eup %4549  ;;  %v3314_v44 = vsel %vm3312_vm7, %v3313_v42, %v3311_v28  ;;  %v3415_v14 = vmax.f32 %v3413_v52, 1e-07  ;;  %v3528_v12 = vmul.f32 %v1681_v16, %v1681_v16  ;;  %v3368_v35 = vmul.f32 0.5, %v3366_v49  ;;  %v7919_v42 = vld [vmem:[#allocation23_spill] sm:$0xff] }
 0x31b   : > { %v3327_v30 = vmul.f32 2.0, %v3314_v44  ;;  %v3421_v17 = vmul.f32 %v4550_v50, %v7365_v51  ;;  %v3529_v38 = vadd.f32 %v3527_v24, %v3525_v0  ;;  %v3319_v39 = vsub.f32 1.5, %v3318_v60 }
 0x31c   : > { %v4552_v29 = vpop.eup %4551  ;;  %v7398_v3 = vadd.f32 %v3415_v14, %v7910_v32  ;;  %v7401_v47 = vmul.f32 %v3415_v14, %v7910_v32  ;;  %v3477_v45 = vmul.f32 %v7911_v27, %v3415_v14  ;;  %v7405_v31 = vadd.f32 %v3368_v35, %v3267_v25 }
 0x31d   : > { %v3329_v62 = vsub.f32 %v7311_v7, %v3327_v30  ;;  %v3422_v9 = vmul.f32 %v4550_v50, %v3421_v17  ;;  %v3479_v59 = vmul.f32 0.6931472, %v4552_v29  ;;  %v3320_v41 = vmul.f32 %v4546_v1, %v3319_v39 }
 0x31e   : > { %vm3322_vm8 = vcmp.eq.f32.partialorder %v7344_v15, inf  ;;  %4553 = vrsqrt.f32 %v7401_v47  ;;  %vm3324_vm9 = vcmp.eq.f32.partialorder %v7344_v15, 0.0  ;;  %v3495_v7 = vadd.f32 %v3415_v14, %v7350_v22 }
 0x31f   : > { %v3371_v23 = vadd.f32 %v3329_v62, %v3254_v26  ;;  %v3423_v2 = vmul.f32 0.5, %v3422_v9  ;;  %v3482_v63 = vand.u32 2147483647, %v3479_v59  ;;  %v3321_v53 = vmul.f32 %v3320_v41, %v7344_v15  ;;  %v7914_v26 = vld [vmem:[#allocation76_spill] sm:$0xff] }
 0x320   : > { %4555 = vlog2.f32 %v3477_v45  ;;  %v3531_v25 = vmax.f32 %v3529_v38, 1e-07  ;;  %v3325_v18 = vand.u32 2147483648, %v7344_v15  ;;  %v3530_v1 = vadd.f32 %v3528_v12, %v3526_v13 }
 0x321   : > { %v3424_v58 = vsub.f32 1.5, %v3423_v2  ;;  %v3484_v21 = vmul.f32 0.5, %v3482_v63  ;;  %v3323_v0 = vsel %vm3322_vm8, %v7344_v15, %v3321_v53  ;;  %v7916_v34 = vand.u32 2147483647, %v7915_v40 }
 0x322   : > { %v7417_v48 = vadd.f32 %v3531_v25, %v7913_v54  ;;  %v7420_v36 = vmul.f32 %v3531_v25, %v7913_v54  ;;  %v3579_v57 = vmul.f32 %v7914_v26, %v3531_v25  ;;  %v3326_v19 = vsel %vm3324_vm9, %v3325_v18, %v3323_v0 }
 0x323   : > { %v3425_v56 = vmul.f32 %v4550_v50, %v3424_v58  ;;  %v3500_v22 = vadd.f32 %v3484_v21, %v3383_v55  ;;  %v3611_v61 = vadd.f32 %v3531_v25, %v7369_v5  ;;  %v3328_v20 = vmul.f32 2.0, %v3326_v19 }
 0x324   : > { %v4554_v37 = vpop.eup %4553  ;;  %4557 = vrsqrt.f32 %v7420_v36  ;;  %vm3590_vm10 = vcmp.eq.f32.partialorder %v7916_v34, 8.507059e+37  ;;  %v7920_v55 = vsel %vm6665_vm14, %v7918_v8, %v7919_v42  ;;  %vm3427_vm11 = vcmp.eq.f32.partialorder %v7365_v51, inf }
 0x325   : > { %v3426_v15 = vmul.f32 %v3425_v56, %v7365_v51  ;;  %v3433_v6 = vmul.f32 %v4554_v37, %v7401_v47  ;;  %4559 = vlog2.f32 %v3579_v57  ;;  %4254 = vst [vmem:[%s4664_s19 + $0x10] sm:$0xff] %v3611_v61  ;;  %v3593_v5 = vsel %vm3590_vm10, %v7921_v43, %v7920_v55 }
 0x326   : > { %v4556_v52 = vpop.eup %4555  ;;  %v3330_v16 = vsub.f32 %v7341_v46, %v3328_v20  ;;  %v3430_v28 = vand.u32 2147483648, %v7365_v51  ;;  %v3532_v49 = vmax.f32 %v3530_v1, 1e-07  ;;  %vm3429_vm12 = vcmp.eq.f32.partialorder %v7365_v51, 0.0 }
 0x327   : > { %v3428_v24 = vsel %vm3427_vm11, %v7365_v51, %v3426_v15  ;;  %v3434_v50 = vmul.f32 %v4554_v37, %v3433_v6  ;;  %v3481_v44 = vmul.f32 0.6931472, %v4556_v52  ;;  %vm3439_vm14 = vcmp.eq.f32.partialorder %v7401_v47, inf }
 0x328   : > { %v3372_v60 = vadd.f32 %v3330_v16, %v7389_v11  ;;  %v3431_v14 = vsel %vm3429_vm12, %v3430_v28, %v3428_v24  ;;  %v7443_v12 = vadd.f32 %v3532_v49, %v7915_v40  ;;  %v7446_v30 = vmul.f32 %v3532_v49, %v7915_v40 }
 0x329   : > { %v3444_v46 = vmul.f32 2.0, %v3431_v14  ;;  %v3435_v35 = vmul.f32 0.5, %v3434_v50  ;;  %v3483_v17 = vand.u32 2147483647, %v3481_v44  ;;  %v3594_v38 = vmul.f32 %v3593_v5, %v3532_v49 }
 0x32a   : > { %v4558_v29 = vpop.eup %4557  ;;  %4561 = vrsqrt.f32 %v7446_v30  ;;  %v3612_v62 = vadd.f32 %v3532_v49, %v3495_v7  ;;  %vm3441_vm13 = vcmp.eq.f32.partialorder %v7401_v47, 0.0  ;;  %vm3544_vm15 = vcmp.eq.f32.partialorder %v7420_v36, inf }
 0x32b   : > { %v4560_v51 = vpop.eup %4559  ;;  %v3446_v39 = vsub.f32 %v7362_v4, %v3444_v46  ;;  %v3436_v32 = vsub.f32 1.5, %v3435_v35  ;;  %v3485_v11 = vmul.f32 0.5, %v3483_v17  ;;  %v3538_v27 = vmul.f32 %v4558_v29, %v7420_v36 }
 0x32c   : > { %v3596_v45 = vmul.f32 0.6931472, %v4560_v51  ;;  %4563 = vlog2.f32 %v3594_v38  ;;  %4255 = vst [vmem:[%s4664_s19 + $0x18] sm:$0xff] %v3612_v62  ;;  %v3442_v4 = vand.u32 2147483648, %v7401_v47  ;;  %vm3546_vm0 = vcmp.eq.f32.partialorder %v7420_v36, 0.0 }
 0x32d   : > { %v3488_v9 = vadd.f32 %v3446_v39, %v3371_v23  ;;  %v3437_v59 = vmul.f32 %v4554_v37, %v3436_v32  ;;  %v3501_v33 = vadd.f32 %v3485_v11, %v7405_v31  ;;  %v3539_v13 = vmul.f32 %v4558_v29, %v3538_v27 }
 0x32e   : > { %v3599_v41 = vand.u32 2147483647, %v3596_v45  ;;  %vm3556_vm1 = vcmp.eq.f32.partialorder %v7446_v30, inf  ;;  %v3559_v42 = vand.u32 2147483648, %v7446_v30  ;;  %vm3558_vm2 = vcmp.eq.f32.partialorder %v7446_v30, 0.0 }
 0x32f   : > { %v3438_v2 = vmul.f32 %v3437_v59, %v7401_v47  ;;  %v3540_v63 = vmul.f32 0.5, %v3539_v13 }
 0x330   : > { %v4562_v53 = vpop.eup %4561  ;;  %v3601_v25 = vmul.f32 0.5, %v3599_v41 }
 0x331   : > { %v3440_v18 = vsel %vm3439_vm14, %v7401_v47, %v3438_v2  ;;  %v3541_v23 = vsub.f32 1.5, %v3540_v63  ;;  %v3550_v31 = vmul.f32 %v4562_v53, %v7446_v30  ;;  %v3547_v47 = vand.u32 2147483648, %v7420_v36 }
 0x332   : > { %v4564_v7 = vpop.eup %4563  ;;  %v3443_v58 = vsel %vm3441_vm13, %v3442_v4, %v3440_v18  ;;  %v3617_v21 = vadd.f32 %v3601_v25, %v3500_v22 }
 0x333   : > { %v3445_v1 = vmul.f32 2.0, %v3443_v58  ;;  %v3542_v0 = vmul.f32 %v4558_v29, %v3541_v23  ;;  %v3551_v54 = vmul.f32 %v4562_v53, %v3550_v31  ;;  %v3598_v26 = vmul.f32 0.6931472, %v4564_v7 }
 0x334   : > { %4258 = vst [vmem:[%s4664_s19 + $0x20] sm:$0xff] %v3617_v21 }
 0x335   : > { %v3447_v57 = vsub.f32 %v7398_v3, %v3445_v1  ;;  %v3543_v19 = vmul.f32 %v3542_v0, %v7420_v36  ;;  %v3552_v56 = vmul.f32 0.5, %v3551_v54  ;;  %v3600_v61 = vand.u32 2147483647, %v3598_v26 }
 0x337   : > { %v3489_v37 = vadd.f32 %v3447_v57, %v3372_v60  ;;  %v3545_v22 = vsel %vm3544_vm15, %v7420_v36, %v3543_v19  ;;  %v3553_v20 = vsub.f32 1.5, %v3552_v56  ;;  %v3602_v40 = vmul.f32 0.5, %v3600_v61 }
 0x338   : > { %v3548_v34 = vsel %vm3546_vm0, %v3547_v47, %v3545_v22 }
 0x339   : > { %v3561_v15 = vmul.f32 2.0, %v3548_v34  ;;  %v3554_v3 = vmul.f32 %v4562_v53, %v3553_v20  ;;  %v3618_v6 = vadd.f32 %v3602_v40, %v3501_v33 }
 0x33b   : > { %v3563_v10 = vsub.f32 %v7417_v48, %v3561_v15  ;;  %v3555_v8 = vmul.f32 %v3554_v3, %v7446_v30  ;;  %4259 = vst [vmem:[%s4664_s19 + $0x28] sm:$0xff] %v3618_v6 }
 0x33d   : > { %v3605_v55 = vadd.f32 %v3563_v10, %v3488_v9  ;;  %v3557_v36 = vsel %vm3556_vm1, %v7446_v30, %v3555_v8 }
 0x33e   : > { %v3560_v43 = vsel %vm3558_vm2, %v3559_v42, %v3557_v36 }
 0x33f   : > { %3607 = vst [vmem:[%s4664_s19] sm:$0xff] %v3605_v55  ;;  %v3562_v5 = vmul.f32 2.0, %v3560_v43 }
 0x341   : > { %v3564_v52 = vsub.f32 %v7443_v12, %v3562_v5 }
 0x343   : > { %v3606_v16 = vadd.f32 %v3564_v52, %v3489_v37 }
 0x345   : > { %3608 = vst [vmem:[%s4664_s19 + $0x8] sm:$0xff] %v3606_v16 }
 0x346 PF: > { %s28_s26 = sadd.s32 1, %s4597_s26  }
 0x347   : > { %p25_p7 = scmp.ge.s32.totalorder %s28_s26, 5  }
 0x349   :  { %27 = sbr.rel (!%p25_p7) target bundleno = 8 (0x8), region = 106 }

</bundles_post_ra>
